<compile_context>
chip_gen: v6e
topology: v6e:2x2x1
jax: 0.10.0
libtpu: 0.0.40
codegen_flags: <defaults>
</compile_context>

<pallas_src>
import jax
import jax.numpy as jnp
from jax.experimental import pallas as pl
from jax.experimental.pallas import tpu as pltpu

NEG_SLOPE = 0.1     # get_nn_act_func('lrelu') -> nn.LeakyReLU(0.1)
HEAD_PAD = 128      # padded head width: cols 0:6 = rot, 6:8 = t_xy, 8 = z


def _lrelu(x):
    return jnp.where(x > 0, x, NEG_SLOPE * x)


# ------------------------------------------------------------------ kernel
def _fused_head_kernel(x_ref, cw_ref, cb_ref, w1_ref, b1_ref,
                       w2a_ref, b2a_ref, w2b_ref, b2b_ref,
                       wha_ref, whb_ref, bh_ref, o_ref, flat_ref):
    """Whole TRHead_linear forward in one launch.

    x_ref   : (C, M, HW)    f32 VMEM  input, channel-leading, batch padded to M
    cw_ref  : (feat, C)     f32 SMEM  1x1 conv weight (scalar reads)
    cb_ref  : (feat,)       f32 SMEM  1x1 conv bias
    w1_ref  : (fc_in, 2048) bf16      [fc1 | fc1_z]
    w2a/w2b : (1024, 256)   bf16      fc2 / fc2_z (dense, no zero blocks)
    wha/whb : (256, 128)    bf16      merged lane-padded heads (r,t | z)
    bias refs (1, N) f32; flat_ref (M, fc_in) f32 scratch; o_ref (M, 128) f32.
    """
    f32, bf16 = jnp.float32, jnp.bfloat16
    feat, cin = cw_ref.shape
    hw = x_ref.shape[-1]

    # ---- 1x1 conv + LeakyReLU on the VPU.  Each feature's (M, HW) slab is
    # stored into the flat scratch at the column offset torch's
    # .flatten(2).flatten(1) would give it -> no in-kernel transpose/reshape.
    for f in range(feat):
        r = cw_ref[f, 0] * x_ref[0]
        for c in range(1, cin):
            r = r + cw_ref[f, c] * x_ref[c]
        flat_ref[:, f * hw:(f + 1) * hw] = _lrelu(r + cb_ref[f])

    flat = flat_ref[...].astype(bf16)                              # (M, fc_in)

    # ---- fc1 | fc1_z as one (fc_in, 2048) matmul, f32 accumulation
    h1 = jnp.dot(flat, w1_ref[...], preferred_element_type=f32)
    h1 = _lrelu(h1 + b1_ref[...]).astype(bf16)                     # (M, 2048)

    # ---- fc2 / fc2_z as two real matmuls (no zero-padded block diagonal)
    n1 = w2a_ref.shape[0]                                          # 1024
    h2a = jnp.dot(h1[:, :n1], w2a_ref[...], preferred_element_type=f32)
    h2a = _lrelu(h2a + b2a_ref[...]).astype(bf16)                  # (M, 256)
    h2b = jnp.dot(h1[:, n1:], w2b_ref[...], preferred_element_type=f32)
    h2b = _lrelu(h2b + b2b_ref[...]).astype(bf16)                  # (M, 256)

    # ---- merged heads: lane-dense (M, 128) f32 output
    out = (jnp.dot(h2a, wha_ref[...], preferred_element_type=f32)
           + jnp.dot(h2b, whb_ref[...], preferred_element_type=f32)
           + bh_ref[...])
    o_ref[...] = out


# ------------------------------------------------------------------ params
def init_params(key, in_dim, feat_dim):
    """Synthetic init mirroring the PyTorch module (torch weight layouts)."""
    HW = 8 * 8                      # flat_op='flatten' implies 8x8 spatial maps
    fc_in = feat_dim * HW
    ks = jax.random.split(key, 8)

    def nrm(k, shape, std):
        return (std * jax.random.normal(k, shape)).astype(jnp.float32)

    def zb(n):
        return jnp.zeros((n,), jnp.float32)

    return {
        "conv1_w": nrm(ks[0], (feat_dim, in_dim), 1e-3), "conv1_b": zb(feat_dim),
        "fc1_w": nrm(ks[1], (1024, fc_in), 1e-3), "fc1_b": zb(1024),
        "fc2_w": nrm(ks[2], (256, 1024), 1e-3), "fc2_b": zb(256),
        "fc_r_w": nrm(ks[3], (6, 256), 1e-2), "fc_r_b": zb(6),
        "fc_t_w": nrm(ks[4], (2, 256), 1e-2), "fc_t_b": zb(2),
        "fc1_z_w": nrm(ks[5], (1024, fc_in), 1e-3), "fc1_z_b": zb(1024),
        "fc2_z_w": nrm(ks[6], (256, 1024), 1e-3), "fc2_z_b": zb(256),
        "fc_z_w": nrm(ks[7], (1, 256), 1e-3), "fc_z_b": zb(1),
    }


def prepare_params(p):
    """One-time host-side restructure: concat / split / pad / bf16 cast."""
    bf16, f32 = jnp.bfloat16, jnp.float32

    conv_w = p["conv1_w"].astype(f32)                       # (feat, C) -> SMEM
    conv_b = p["conv1_b"].astype(f32)                       # (feat,)   -> SMEM

    # fc1 | fc1_z : (fc_in, 2048)
    w1 = jnp.concatenate([p["fc1_w"].T, p["fc1_z_w"].T], axis=1).astype(bf16)
    b1 = jnp.concatenate([p["fc1_b"], p["fc1_z_b"]])[None, :].astype(f32)

    # fc2 / fc2_z as two dense matmuls (no zero block-diagonal padding)
    w2a = p["fc2_w"].T.astype(bf16)                         # (1024, 256)
    w2b = p["fc2_z_w"].T.astype(bf16)                       # (1024, 256)
    b2a = p["fc2_b"][None, :].astype(f32)
    b2b = p["fc2_z_b"][None, :].astype(f32)

    # merged, lane-padded heads: wha acts on the fc2 path, whb on the fc2_z path
    wha = jnp.zeros((256, HEAD_PAD), f32)
    wha = wha.at[:, 0:6].set(p["fc_r_w"].T).at[:, 6:8].set(p["fc_t_w"].T)
    whb = jnp.zeros((256, HEAD_PAD), f32)
    whb = whb.at[:, 8:9].set(p["fc_z_w"].T)
    bh = jnp.zeros((1, HEAD_PAD), f32)
    bh = bh.at[0, 0:6].set(p["fc_r_b"]).at[0, 6:8].set(p["fc_t_b"])
    bh = bh.at[0, 8].set(p["fc_z_b"][0])

    return dict(conv_w=conv_w, conv_b=conv_b, w1=w1, b1=b1,
                w2a=w2a, b2a=b2a, w2b=w2b, b2b=b2b,
                wha=wha.astype(bf16), whb=whb.astype(bf16), bh=bh)


# ------------------------------------------------------------------ forward
def trhead_linear_forward(prep, x):
    """x: NCHW [B, C_in, H, W] -> (rot [B, 6], t [B, 3])."""
    B, C, H, W = x.shape
    feat = prep["conv_w"].shape[0]
    HW = H * W
    fc_in = feat * HW
    m_pad = max(16, ((B + 15) // 16) * 16)      # bf16 packs 16 rows per vreg

    # Channel-leading layout so the kernel reads each input channel as a
    # lane-dense (m_pad, HW) slab with no in-kernel transpose.  Padded batch
    # rows are zeros and are sliced off after the kernel.
    x_cbs = jnp.transpose(x.astype(jnp.float32).reshape(B, C, HW), (1, 0, 2))
    x_cbs = jnp.pad(x_cbs, ((0, 0), (0, m_pad - B), (0, 0)))

    vmem = pl.BlockSpec(memory_space=pltpu.MemorySpace.VMEM)
    smem = pl.BlockSpec(memory_space=pltpu.MemorySpace.SMEM)

    args = (x_cbs, prep["conv_w"], prep["conv_b"], prep["w1"], prep["b1"],
            prep["w2a"], prep["b2a"], prep["w2b"], prep["b2b"],
            prep["wha"], prep["whb"], prep["bh"])

    # All-resident design (no pipelining): size the scoped-VMEM limit from the
    # actual footprint so v5e's 16 MiB default never silently blocks scaling.
    resident = sum(int(a.size) * a.dtype.itemsize for a in args)
    resident += m_pad * HEAD_PAD * 4 + m_pad * fc_in * 4
    vmem_limit = min(int(1.5 * resident) + (4 << 20), 96 << 20)

    # TODO(synk): at production feat_dim (fc_in ~8K+) add a K-tiled grid over
    # fc_in ('arbitrary') with an f32 accumulator so w1 streams and the kernel
    # fits v7x's 64 MiB VMEM; add an M-parallel grid once batch exceeds a
    # sublane tile (v7x 2nd TensorCore); int8 (v5e/v6e) / fp8 (v7x) weight
    # storage would further halve the weight-DMA bound.
    out = pl.pallas_call(
        _fused_head_kernel,
        out_shape=jax.ShapeDtypeStruct((m_pad, HEAD_PAD), jnp.float32),
        in_specs=[vmem, smem, smem] + [vmem] * 9,
        out_specs=vmem,
        scratch_shapes=[pltpu.VMEM((m_pad, fc_in), jnp.float32)],
        compiler_params=pltpu.CompilerParams(vmem_limit_bytes=vmem_limit),
    )(*args)

    rot = out[:B, 0:6]
    t = out[:B, 6:9]            # [t_x, t_y, z] == torch.cat([t, z], dim=1)
    return rot, t


# ------------------------------------------------------------------ reference
def _reference_forward(params, x):
    """Pure-JAX reference on torch-layout weights, mimicking kernel numerics
    (f32 conv, bf16 fc weights/intermediates, f32 accumulation)."""
    f32, bf = jnp.float32, jnp.bfloat16
    hi = jax.lax.Precision.HIGHEST
    B, C, H, W = x.shape
    feat = params["conv1_w"].shape[0]

    xm = x.astype(f32).reshape(B, C, H * W)
    conv = jnp.einsum("fc,bcs->bfs", params["conv1_w"], xm, precision=hi)
    conv = _lrelu(conv + params["conv1_b"][None, :, None])
    flat = conv.reshape(B, feat * H * W).astype(bf).astype(f32)

    def lin(v, wn, bn, act):
        w = params[wn].astype(bf).astype(f32)
        y = jnp.dot(v, w.T, precision=hi) + params[bn]
        return _lrelu(y) if act else y

    h = lin(flat, "fc1_w", "fc1_b", True).astype(bf).astype(f32)
    h = lin(h, "fc2_w", "fc2_b", True).astype(bf).astype(f32)
    rot = lin(h, "fc_r_w", "fc_r_b", False)
    txy = lin(h, "fc_t_w", "fc_t_b", False)

    hz = lin(flat, "fc1_z_w", "fc1_z_b", True).astype(bf).astype(f32)
    hz = lin(hz, "fc2_z_w", "fc2_z_b", True).astype(bf).astype(f32)
    z = lin(hz, "fc_z_w", "fc_z_b", False)
    return rot, jnp.concatenate([txy, z], axis=1)


if __name__ == "__main__":
    key = jax.random.PRNGKey(0)
    k_param, k_x = jax.random.split(key)

    B, in_dim, feat_dim, H, W = 2, 4, 8, 8, 8   # flat_op='flatten' => 8x8 maps
    params = init_params(k_param, in_dim, feat_dim)
    prep = prepare_params(params)
    x = jax.random.normal(k_x, (B, in_dim, H, W), jnp.float32)

    fwd = jax.jit(trhead_linear_forward)
    rot, t = fwd(prep, x)
    rot = jax.block_until_ready(rot)
    t = jax.block_until_ready(t)

    rot_ref, t_ref = _reference_forward(params, x)
    assert rot.shape == (B, 6) and t.shape == (B, 3)
    assert jnp.allclose(rot, rot_ref, rtol=2e-3, atol=1e-9), "rot mismatch vs reference"
    assert jnp.allclose(t, t_ref, rtol=2e-3, atol=1e-9), "t mismatch vs reference"

    print("KERNEL_OK")
</pallas_src>

<mosaic_0001>
module attributes {stable_mosaic.version = 11 : i64} {
  func.func @_fused_head_kernel(%arg0: memref<4x16x64xf32, #tpu.memory_space<vmem>>, %arg1: memref<8x4xf32, #tpu.memory_space<smem>>, %arg2: memref<8xf32, #tpu.memory_space<smem>>, %arg3: memref<512x2048xbf16, #tpu.memory_space<vmem>>, %arg4: memref<1x2048xf32, #tpu.memory_space<vmem>>, %arg5: memref<1024x256xbf16, #tpu.memory_space<vmem>>, %arg6: memref<1x256xf32, #tpu.memory_space<vmem>>, %arg7: memref<1024x256xbf16, #tpu.memory_space<vmem>>, %arg8: memref<1x256xf32, #tpu.memory_space<vmem>>, %arg9: memref<256x128xbf16, #tpu.memory_space<vmem>>, %arg10: memref<256x128xbf16, #tpu.memory_space<vmem>>, %arg11: memref<1x128xf32, #tpu.memory_space<vmem>>, %arg12: memref<16x128xf32, #tpu.memory_space<vmem>>, %arg13: memref<16x512xf32, #tpu.memory_space<vmem>>) attributes {dimension_semantics = [], scalar_prefetch = 0 : i64, scratch_operands = 1 : i64, tpu.core_type = #tpu.core_type<tc>} {
    %c0 = arith.constant 0 : index
    %c0_0 = arith.constant 0 : index
    %0 = memref.load %arg1[%c0, %c0_0] : memref<8x4xf32, #tpu.memory_space<smem>>
    %c0_1 = arith.constant 0 : index
    %c0_2 = arith.constant 0 : index
    %c0_3 = arith.constant 0 : index
    %1 = vector.load %arg0[%c0_1, %c0_2, %c0_3] : memref<4x16x64xf32, #tpu.memory_space<vmem>>, vector<1x16x64xf32>
    %2 = vector.shape_cast %1 : vector<1x16x64xf32> to vector<16x64xf32>
    %3 = vector.broadcast %0 : f32 to vector<16x64xf32>
    %4 = arith.mulf %3, %2 : vector<16x64xf32>
    %c0_4 = arith.constant 0 : index
    %c1 = arith.constant 1 : index
    %5 = memref.load %arg1[%c0_4, %c1] : memref<8x4xf32, #tpu.memory_space<smem>>
    %c1_5 = arith.constant 1 : index
    %c0_6 = arith.constant 0 : index
    %c0_7 = arith.constant 0 : index
    %6 = vector.load %arg0[%c1_5, %c0_6, %c0_7] : memref<4x16x64xf32, #tpu.memory_space<vmem>>, vector<1x16x64xf32>
    %7 = vector.shape_cast %6 : vector<1x16x64xf32> to vector<16x64xf32>
    %8 = vector.broadcast %5 : f32 to vector<16x64xf32>
    %9 = arith.mulf %8, %7 : vector<16x64xf32>
    %10 = arith.addf %4, %9 : vector<16x64xf32>
    %c0_8 = arith.constant 0 : index
    %c2 = arith.constant 2 : index
    %11 = memref.load %arg1[%c0_8, %c2] : memref<8x4xf32, #tpu.memory_space<smem>>
    %c2_9 = arith.constant 2 : index
    %c0_10 = arith.constant 0 : index
    %c0_11 = arith.constant 0 : index
    %12 = vector.load %arg0[%c2_9, %c0_10, %c0_11] : memref<4x16x64xf32, #tpu.memory_space<vmem>>, vector<1x16x64xf32>
    %13 = vector.shape_cast %12 : vector<1x16x64xf32> to vector<16x64xf32>
    %14 = vector.broadcast %11 : f32 to vector<16x64xf32>
    %15 = arith.mulf %14, %13 : vector<16x64xf32>
    %16 = arith.addf %10, %15 : vector<16x64xf32>
    %c0_12 = arith.constant 0 : index
    %c3 = arith.constant 3 : index
    %17 = memref.load %arg1[%c0_12, %c3] : memref<8x4xf32, #tpu.memory_space<smem>>
    %c3_13 = arith.constant 3 : index
    %c0_14 = arith.constant 0 : index
    %c0_15 = arith.constant 0 : index
    %18 = vector.load %arg0[%c3_13, %c0_14, %c0_15] : memref<4x16x64xf32, #tpu.memory_space<vmem>>, vector<1x16x64xf32>
    %19 = vector.shape_cast %18 : vector<1x16x64xf32> to vector<16x64xf32>
    %20 = vector.broadcast %17 : f32 to vector<16x64xf32>
    %21 = arith.mulf %20, %19 : vector<16x64xf32>
    %22 = arith.addf %16, %21 : vector<16x64xf32>
    %c0_16 = arith.constant 0 : index
    %23 = memref.load %arg2[%c0_16] : memref<8xf32, #tpu.memory_space<smem>>
    %24 = vector.broadcast %23 : f32 to vector<16x64xf32>
    %25 = arith.addf %22, %24 : vector<16x64xf32>
    %cst = arith.constant 0.000000e+00 : f32
    %26 = vector.broadcast %cst : f32 to vector<16x64xf32>
    %27 = arith.cmpf ogt, %25, %26 : vector<16x64xf32>
    %cst_17 = arith.constant 1.000000e-01 : f32
    %28 = vector.broadcast %cst_17 : f32 to vector<16x64xf32>
    %29 = arith.mulf %28, %25 : vector<16x64xf32>
    %30 = arith.select %27, %25, %29 : vector<16x64xi1>, vector<16x64xf32>
    %c0_18 = arith.constant 0 : index
    %c0_19 = arith.constant 0 : index
    %31 = vector.load %arg13[%c0_18, %c0_19] : memref<16x512xf32, #tpu.memory_space<vmem>>, vector<16x64xf32>
    tpu.vector_store %arg13[%c0_18, %c0_19], %30 {strides = array<i32>} : memref<16x512xf32, #tpu.memory_space<vmem>>, vector<16x64xf32>,
    %c1_20 = arith.constant 1 : index
    %c0_21 = arith.constant 0 : index
    %32 = memref.load %arg1[%c1_20, %c0_21] : memref<8x4xf32, #tpu.memory_space<smem>>
    %c0_22 = arith.constant 0 : index
    %c0_23 = arith.constant 0 : index
    %c0_24 = arith.constant 0 : index
    %33 = vector.load %arg0[%c0_22, %c0_23, %c0_24] : memref<4x16x64xf32, #tpu.memory_space<vmem>>, vector<1x16x64xf32>
    %34 = vector.shape_cast %33 : vector<1x16x64xf32> to vector<16x64xf32>
    %35 = vector.broadcast %32 : f32 to vector<16x64xf32>
    %36 = arith.mulf %35, %34 : vector<16x64xf32>
    %c1_25 = arith.constant 1 : index
    %c1_26 = arith.constant 1 : index
    %37 = memref.load %arg1[%c1_25, %c1_26] : memref<8x4xf32, #tpu.memory_space<smem>>
    %c1_27 = arith.constant 1 : index
    %c0_28 = arith.constant 0 : index
    %c0_29 = arith.constant 0 : index
    %38 = vector.load %arg0[%c1_27, %c0_28, %c0_29] : memref<4x16x64xf32, #tpu.memory_space<vmem>>, vector<1x16x64xf32>
    %39 = vector.shape_cast %38 : vector<1x16x64xf32> to vector<16x64xf32>
    %40 = vector.broadcast %37 : f32 to vector<16x64xf32>
    %41 = arith.mulf %40, %39 : vector<16x64xf32>
    %42 = arith.addf %36, %41 : vector<16x64xf32>
    %c1_30 = arith.constant 1 : index
    %c2_31 = arith.constant 2 : index
    %43 = memref.load %arg1[%c1_30, %c2_31] : memref<8x4xf32, #tpu.memory_space<smem>>
    %c2_32 = arith.constant 2 : index
    %c0_33 = arith.constant 0 : index
    %c0_34 = arith.constant 0 : index
    %44 = vector.load %arg0[%c2_32, %c0_33, %c0_34] : memref<4x16x64xf32, #tpu.memory_space<vmem>>, vector<1x16x64xf32>
    %45 = vector.shape_cast %44 : vector<1x16x64xf32> to vector<16x64xf32>
    %46 = vector.broadcast %43 : f32 to vector<16x64xf32>
    %47 = arith.mulf %46, %45 : vector<16x64xf32>
    %48 = arith.addf %42, %47 : vector<16x64xf32>
    %c1_35 = arith.constant 1 : index
    %c3_36 = arith.constant 3 : index
    %49 = memref.load %arg1[%c1_35, %c3_36] : memref<8x4xf32, #tpu.memory_space<smem>>
    %c3_37 = arith.constant 3 : index
    %c0_38 = arith.constant 0 : index
    %c0_39 = arith.constant 0 : index
    %50 = vector.load %arg0[%c3_37, %c0_38, %c0_39] : memref<4x16x64xf32, #tpu.memory_space<vmem>>, vector<1x16x64xf32>
    %51 = vector.shape_cast %50 : vector<1x16x64xf32> to vector<16x64xf32>
    %52 = vector.broadcast %49 : f32 to vector<16x64xf32>
    %53 = arith.mulf %52, %51 : vector<16x64xf32>
    %54 = arith.addf %48, %53 : vector<16x64xf32>
    %c1_40 = arith.constant 1 : index
    %55 = memref.load %arg2[%c1_40] : memref<8xf32, #tpu.memory_space<smem>>
    %56 = vector.broadcast %55 : f32 to vector<16x64xf32>
    %57 = arith.addf %54, %56 : vector<16x64xf32>
    %cst_41 = arith.constant 0.000000e+00 : f32
    %58 = vector.broadcast %cst_41 : f32 to vector<16x64xf32>
    %59 = arith.cmpf ogt, %57, %58 : vector<16x64xf32>
    %cst_42 = arith.constant 1.000000e-01 : f32
    %60 = vector.broadcast %cst_42 : f32 to vector<16x64xf32>
    %61 = arith.mulf %60, %57 : vector<16x64xf32>
    %62 = arith.select %59, %57, %61 : vector<16x64xi1>, vector<16x64xf32>
    %c0_43 = arith.constant 0 : index
    %c64 = arith.constant 64 : index
    %63 = vector.load %arg13[%c0_43, %c64] : memref<16x512xf32, #tpu.memory_space<vmem>>, vector<16x64xf32>
    tpu.vector_store %arg13[%c0_43, %c64], %62 {strides = array<i32>} : memref<16x512xf32, #tpu.memory_space<vmem>>, vector<16x64xf32>,
    %c2_44 = arith.constant 2 : index
    %c0_45 = arith.constant 0 : index
    %64 = memref.load %arg1[%c2_44, %c0_45] : memref<8x4xf32, #tpu.memory_space<smem>>
    %c0_46 = arith.constant 0 : index
    %c0_47 = arith.constant 0 : index
    %c0_48 = arith.constant 0 : index
    %65 = vector.load %arg0[%c0_46, %c0_47, %c0_48] : memref<4x16x64xf32, #tpu.memory_space<vmem>>, vector<1x16x64xf32>
    %66 = vector.shape_cast %65 : vector<1x16x64xf32> to vector<16x64xf32>
    %67 = vector.broadcast %64 : f32 to vector<16x64xf32>
    %68 = arith.mulf %67, %66 : vector<16x64xf32>
    %c2_49 = arith.constant 2 : index
    %c1_50 = arith.constant 1 : index
    %69 = memref.load %arg1[%c2_49, %c1_50] : memref<8x4xf32, #tpu.memory_space<smem>>
    %c1_51 = arith.constant 1 : index
    %c0_52 = arith.constant 0 : index
    %c0_53 = arith.constant 0 : index
    %70 = vector.load %arg0[%c1_51, %c0_52, %c0_53] : memref<4x16x64xf32, #tpu.memory_space<vmem>>, vector<1x16x64xf32>
    %71 = vector.shape_cast %70 : vector<1x16x64xf32> to vector<16x64xf32>
    %72 = vector.broadcast %69 : f32 to vector<16x64xf32>
    %73 = arith.mulf %72, %71 : vector<16x64xf32>
    %74 = arith.addf %68, %73 : vector<16x64xf32>
    %c2_54 = arith.constant 2 : index
    %c2_55 = arith.constant 2 : index
    %75 = memref.load %arg1[%c2_54, %c2_55] : memref<8x4xf32, #tpu.memory_space<smem>>
    %c2_56 = arith.constant 2 : index
    %c0_57 = arith.constant 0 : index
    %c0_58 = arith.constant 0 : index
    %76 = vector.load %arg0[%c2_56, %c0_57, %c0_58] : memref<4x16x64xf32, #tpu.memory_space<vmem>>, vector<1x16x64xf32>
    %77 = vector.shape_cast %76 : vector<1x16x64xf32> to vector<16x64xf32>
    %78 = vector.broadcast %75 : f32 to vector<16x64xf32>
    %79 = arith.mulf %78, %77 : vector<16x64xf32>
    %80 = arith.addf %74, %79 : vector<16x64xf32>
    %c2_59 = arith.constant 2 : index
    %c3_60 = arith.constant 3 : index
    %81 = memref.load %arg1[%c2_59, %c3_60] : memref<8x4xf32, #tpu.memory_space<smem>>
    %c3_61 = arith.constant 3 : index
    %c0_62 = arith.constant 0 : index
    %c0_63 = arith.constant 0 : index
    %82 = vector.load %arg0[%c3_61, %c0_62, %c0_63] : memref<4x16x64xf32, #tpu.memory_space<vmem>>, vector<1x16x64xf32>
    %83 = vector.shape_cast %82 : vector<1x16x64xf32> to vector<16x64xf32>
    %84 = vector.broadcast %81 : f32 to vector<16x64xf32>
    %85 = arith.mulf %84, %83 : vector<16x64xf32>
    %86 = arith.addf %80, %85 : vector<16x64xf32>
    %c2_64 = arith.constant 2 : index
    %87 = memref.load %arg2[%c2_64] : memref<8xf32, #tpu.memory_space<smem>>
    %88 = vector.broadcast %87 : f32 to vector<16x64xf32>
    %89 = arith.addf %86, %88 : vector<16x64xf32>
    %cst_65 = arith.constant 0.000000e+00 : f32
    %90 = vector.broadcast %cst_65 : f32 to vector<16x64xf32>
    %91 = arith.cmpf ogt, %89, %90 : vector<16x64xf32>
    %cst_66 = arith.constant 1.000000e-01 : f32
    %92 = vector.broadcast %cst_66 : f32 to vector<16x64xf32>
    %93 = arith.mulf %92, %89 : vector<16x64xf32>
    %94 = arith.select %91, %89, %93 : vector<16x64xi1>, vector<16x64xf32>
    %c0_67 = arith.constant 0 : index
    %c128 = arith.constant 128 : index
    %95 = vector.load %arg13[%c0_67, %c128] : memref<16x512xf32, #tpu.memory_space<vmem>>, vector<16x64xf32>
    tpu.vector_store %arg13[%c0_67, %c128], %94 {strides = array<i32>} : memref<16x512xf32, #tpu.memory_space<vmem>>, vector<16x64xf32>,
    %c3_68 = arith.constant 3 : index
    %c0_69 = arith.constant 0 : index
    %96 = memref.load %arg1[%c3_68, %c0_69] : memref<8x4xf32, #tpu.memory_space<smem>>
    %c0_70 = arith.constant 0 : index
    %c0_71 = arith.constant 0 : index
    %c0_72 = arith.constant 0 : index
    %97 = vector.load %arg0[%c0_70, %c0_71, %c0_72] : memref<4x16x64xf32, #tpu.memory_space<vmem>>, vector<1x16x64xf32>
    %98 = vector.shape_cast %97 : vector<1x16x64xf32> to vector<16x64xf32>
    %99 = vector.broadcast %96 : f32 to vector<16x64xf32>
    %100 = arith.mulf %99, %98 : vector<16x64xf32>
    %c3_73 = arith.constant 3 : index
    %c1_74 = arith.constant 1 : index
    %101 = memref.load %arg1[%c3_73, %c1_74] : memref<8x4xf32, #tpu.memory_space<smem>>
    %c1_75 = arith.constant 1 : index
    %c0_76 = arith.constant 0 : index
    %c0_77 = arith.constant 0 : index
    %102 = vector.load %arg0[%c1_75, %c0_76, %c0_77] : memref<4x16x64xf32, #tpu.memory_space<vmem>>, vector<1x16x64xf32>
    %103 = vector.shape_cast %102 : vector<1x16x64xf32> to vector<16x64xf32>
    %104 = vector.broadcast %101 : f32 to vector<16x64xf32>
    %105 = arith.mulf %104, %103 : vector<16x64xf32>
    %106 = arith.addf %100, %105 : vector<16x64xf32>
    %c3_78 = arith.constant 3 : index
    %c2_79 = arith.constant 2 : index
    %107 = memref.load %arg1[%c3_78, %c2_79] : memref<8x4xf32, #tpu.memory_space<smem>>
    %c2_80 = arith.constant 2 : index
    %c0_81 = arith.constant 0 : index
    %c0_82 = arith.constant 0 : index
    %108 = vector.load %arg0[%c2_80, %c0_81, %c0_82] : memref<4x16x64xf32, #tpu.memory_space<vmem>>, vector<1x16x64xf32>
    %109 = vector.shape_cast %108 : vector<1x16x64xf32> to vector<16x64xf32>
    %110 = vector.broadcast %107 : f32 to vector<16x64xf32>
    %111 = arith.mulf %110, %109 : vector<16x64xf32>
    %112 = arith.addf %106, %111 : vector<16x64xf32>
    %c3_83 = arith.constant 3 : index
    %c3_84 = arith.constant 3 : index
    %113 = memref.load %arg1[%c3_83, %c3_84] : memref<8x4xf32, #tpu.memory_space<smem>>
    %c3_85 = arith.constant 3 : index
    %c0_86 = arith.constant 0 : index
    %c0_87 = arith.constant 0 : index
    %114 = vector.load %arg0[%c3_85, %c0_86, %c0_87] : memref<4x16x64xf32, #tpu.memory_space<vmem>>, vector<1x16x64xf32>
    %115 = vector.shape_cast %114 : vector<1x16x64xf32> to vector<16x64xf32>
    %116 = vector.broadcast %113 : f32 to vector<16x64xf32>
    %117 = arith.mulf %116, %115 : vector<16x64xf32>
    %118 = arith.addf %112, %117 : vector<16x64xf32>
    %c3_88 = arith.constant 3 : index
    %119 = memref.load %arg2[%c3_88] : memref<8xf32, #tpu.memory_space<smem>>
    %120 = vector.broadcast %119 : f32 to vector<16x64xf32>
    %121 = arith.addf %118, %120 : vector<16x64xf32>
    %cst_89 = arith.constant 0.000000e+00 : f32
    %122 = vector.broadcast %cst_89 : f32 to vector<16x64xf32>
    %123 = arith.cmpf ogt, %121, %122 : vector<16x64xf32>
    %cst_90 = arith.constant 1.000000e-01 : f32
    %124 = vector.broadcast %cst_90 : f32 to vector<16x64xf32>
    %125 = arith.mulf %124, %121 : vector<16x64xf32>
    %126 = arith.select %123, %121, %125 : vector<16x64xi1>, vector<16x64xf32>
    %c0_91 = arith.constant 0 : index
    %c192 = arith.constant 192 : index
    %127 = vector.load %arg13[%c0_91, %c192] : memref<16x512xf32, #tpu.memory_space<vmem>>, vector<16x64xf32>
    tpu.vector_store %arg13[%c0_91, %c192], %126 {strides = array<i32>} : memref<16x512xf32, #tpu.memory_space<vmem>>, vector<16x64xf32>,
    %c4 = arith.constant 4 : index
    %c0_92 = arith.constant 0 : index
    %128 = memref.load %arg1[%c4, %c0_92] : memref<8x4xf32, #tpu.memory_space<smem>>
    %c0_93 = arith.constant 0 : index
    %c0_94 = arith.constant 0 : index
    %c0_95 = arith.constant 0 : index
    %129 = vector.load %arg0[%c0_93, %c0_94, %c0_95] : memref<4x16x64xf32, #tpu.memory_space<vmem>>, vector<1x16x64xf32>
    %130 = vector.shape_cast %129 : vector<1x16x64xf32> to vector<16x64xf32>
    %131 = vector.broadcast %128 : f32 to vector<16x64xf32>
    %132 = arith.mulf %131, %130 : vector<16x64xf32>
    %c4_96 = arith.constant 4 : index
    %c1_97 = arith.constant 1 : index
    %133 = memref.load %arg1[%c4_96, %c1_97] : memref<8x4xf32, #tpu.memory_space<smem>>
    %c1_98 = arith.constant 1 : index
    %c0_99 = arith.constant 0 : index
    %c0_100 = arith.constant 0 : index
    %134 = vector.load %arg0[%c1_98, %c0_99, %c0_100] : memref<4x16x64xf32, #tpu.memory_space<vmem>>, vector<1x16x64xf32>
    %135 = vector.shape_cast %134 : vector<1x16x64xf32> to vector<16x64xf32>
    %136 = vector.broadcast %133 : f32 to vector<16x64xf32>
    %137 = arith.mulf %136, %135 : vector<16x64xf32>
    %138 = arith.addf %132, %137 : vector<16x64xf32>
    %c4_101 = arith.constant 4 : index
    %c2_102 = arith.constant 2 : index
    %139 = memref.load %arg1[%c4_101, %c2_102] : memref<8x4xf32, #tpu.memory_space<smem>>
    %c2_103 = arith.constant 2 : index
    %c0_104 = arith.constant 0 : index
    %c0_105 = arith.constant 0 : index
    %140 = vector.load %arg0[%c2_103, %c0_104, %c0_105] : memref<4x16x64xf32, #tpu.memory_space<vmem>>, vector<1x16x64xf32>
    %141 = vector.shape_cast %140 : vector<1x16x64xf32> to vector<16x64xf32>
    %142 = vector.broadcast %139 : f32 to vector<16x64xf32>
    %143 = arith.mulf %142, %141 : vector<16x64xf32>
    %144 = arith.addf %138, %143 : vector<16x64xf32>
    %c4_106 = arith.constant 4 : index
    %c3_107 = arith.constant 3 : index
    %145 = memref.load %arg1[%c4_106, %c3_107] : memref<8x4xf32, #tpu.memory_space<smem>>
    %c3_108 = arith.constant 3 : index
    %c0_109 = arith.constant 0 : index
    %c0_110 = arith.constant 0 : index
    %146 = vector.load %arg0[%c3_108, %c0_109, %c0_110] : memref<4x16x64xf32, #tpu.memory_space<vmem>>, vector<1x16x64xf32>
    %147 = vector.shape_cast %146 : vector<1x16x64xf32> to vector<16x64xf32>
    %148 = vector.broadcast %145 : f32 to vector<16x64xf32>
    %149 = arith.mulf %148, %147 : vector<16x64xf32>
    %150 = arith.addf %144, %149 : vector<16x64xf32>
    %c4_111 = arith.constant 4 : index
    %151 = memref.load %arg2[%c4_111] : memref<8xf32, #tpu.memory_space<smem>>
    %152 = vector.broadcast %151 : f32 to vector<16x64xf32>
    %153 = arith.addf %150, %152 : vector<16x64xf32>
    %cst_112 = arith.constant 0.000000e+00 : f32
    %154 = vector.broadcast %cst_112 : f32 to vector<16x64xf32>
    %155 = arith.cmpf ogt, %153, %154 : vector<16x64xf32>
    %cst_113 = arith.constant 1.000000e-01 : f32
    %156 = vector.broadcast %cst_113 : f32 to vector<16x64xf32>
    %157 = arith.mulf %156, %153 : vector<16x64xf32>
    %158 = arith.select %155, %153, %157 : vector<16x64xi1>, vector<16x64xf32>
    %c0_114 = arith.constant 0 : index
    %c256 = arith.constant 256 : index
    %159 = vector.load %arg13[%c0_114, %c256] : memref<16x512xf32, #tpu.memory_space<vmem>>, vector<16x64xf32>
    tpu.vector_store %arg13[%c0_114, %c256], %158 {strides = array<i32>} : memref<16x512xf32, #tpu.memory_space<vmem>>, vector<16x64xf32>,
    %c5 = arith.constant 5 : index
    %c0_115 = arith.constant 0 : index
    %160 = memref.load %arg1[%c5, %c0_115] : memref<8x4xf32, #tpu.memory_space<smem>>
    %c0_116 = arith.constant 0 : index
    %c0_117 = arith.constant 0 : index
    %c0_118 = arith.constant 0 : index
    %161 = vector.load %arg0[%c0_116, %c0_117, %c0_118] : memref<4x16x64xf32, #tpu.memory_space<vmem>>, vector<1x16x64xf32>
    %162 = vector.shape_cast %161 : vector<1x16x64xf32> to vector<16x64xf32>
    %163 = vector.broadcast %160 : f32 to vector<16x64xf32>
    %164 = arith.mulf %163, %162 : vector<16x64xf32>
    %c5_119 = arith.constant 5 : index
    %c1_120 = arith.constant 1 : index
    %165 = memref.load %arg1[%c5_119, %c1_120] : memref<8x4xf32, #tpu.memory_space<smem>>
    %c1_121 = arith.constant 1 : index
    %c0_122 = arith.constant 0 : index
    %c0_123 = arith.constant 0 : index
    %166 = vector.load %arg0[%c1_121, %c0_122, %c0_123] : memref<4x16x64xf32, #tpu.memory_space<vmem>>, vector<1x16x64xf32>
    %167 = vector.shape_cast %166 : vector<1x16x64xf32> to vector<16x64xf32>
    %168 = vector.broadcast %165 : f32 to vector<16x64xf32>
    %169 = arith.mulf %168, %167 : vector<16x64xf32>
    %170 = arith.addf %164, %169 : vector<16x64xf32>
    %c5_124 = arith.constant 5 : index
    %c2_125 = arith.constant 2 : index
    %171 = memref.load %arg1[%c5_124, %c2_125] : memref<8x4xf32, #tpu.memory_space<smem>>
    %c2_126 = arith.constant 2 : index
    %c0_127 = arith.constant 0 : index
    %c0_128 = arith.constant 0 : index
    %172 = vector.load %arg0[%c2_126, %c0_127, %c0_128] : memref<4x16x64xf32, #tpu.memory_space<vmem>>, vector<1x16x64xf32>
    %173 = vector.shape_cast %172 : vector<1x16x64xf32> to vector<16x64xf32>
    %174 = vector.broadcast %171 : f32 to vector<16x64xf32>
    %175 = arith.mulf %174, %173 : vector<16x64xf32>
    %176 = arith.addf %170, %175 : vector<16x64xf32>
    %c5_129 = arith.constant 5 : index
    %c3_130 = arith.constant 3 : index
    %177 = memref.load %arg1[%c5_129, %c3_130] : memref<8x4xf32, #tpu.memory_space<smem>>
    %c3_131 = arith.constant 3 : index
    %c0_132 = arith.constant 0 : index
    %c0_133 = arith.constant 0 : index
    %178 = vector.load %arg0[%c3_131, %c0_132, %c0_133] : memref<4x16x64xf32, #tpu.memory_space<vmem>>, vector<1x16x64xf32>
    %179 = vector.shape_cast %178 : vector<1x16x64xf32> to vector<16x64xf32>
    %180 = vector.broadcast %177 : f32 to vector<16x64xf32>
    %181 = arith.mulf %180, %179 : vector<16x64xf32>
    %182 = arith.addf %176, %181 : vector<16x64xf32>
    %c5_134 = arith.constant 5 : index
    %183 = memref.load %arg2[%c5_134] : memref<8xf32, #tpu.memory_space<smem>>
    %184 = vector.broadcast %183 : f32 to vector<16x64xf32>
    %185 = arith.addf %182, %184 : vector<16x64xf32>
    %cst_135 = arith.constant 0.000000e+00 : f32
    %186 = vector.broadcast %cst_135 : f32 to vector<16x64xf32>
    %187 = arith.cmpf ogt, %185, %186 : vector<16x64xf32>
    %cst_136 = arith.constant 1.000000e-01 : f32
    %188 = vector.broadcast %cst_136 : f32 to vector<16x64xf32>
    %189 = arith.mulf %188, %185 : vector<16x64xf32>
    %190 = arith.select %187, %185, %189 : vector<16x64xi1>, vector<16x64xf32>
    %c0_137 = arith.constant 0 : index
    %c320 = arith.constant 320 : index
    %191 = vector.load %arg13[%c0_137, %c320] : memref<16x512xf32, #tpu.memory_space<vmem>>, vector<16x64xf32>
    tpu.vector_store %arg13[%c0_137, %c320], %190 {strides = array<i32>} : memref<16x512xf32, #tpu.memory_space<vmem>>, vector<16x64xf32>,
    %c6 = arith.constant 6 : index
    %c0_138 = arith.constant 0 : index
    %192 = memref.load %arg1[%c6, %c0_138] : memref<8x4xf32, #tpu.memory_space<smem>>
    %c0_139 = arith.constant 0 : index
    %c0_140 = arith.constant 0 : index
    %c0_141 = arith.constant 0 : index
    %193 = vector.load %arg0[%c0_139, %c0_140, %c0_141] : memref<4x16x64xf32, #tpu.memory_space<vmem>>, vector<1x16x64xf32>
    %194 = vector.shape_cast %193 : vector<1x16x64xf32> to vector<16x64xf32>
    %195 = vector.broadcast %192 : f32 to vector<16x64xf32>
    %196 = arith.mulf %195, %194 : vector<16x64xf32>
    %c6_142 = arith.constant 6 : index
    %c1_143 = arith.constant 1 : index
    %197 = memref.load %arg1[%c6_142, %c1_143] : memref<8x4xf32, #tpu.memory_space<smem>>
    %c1_144 = arith.constant 1 : index
    %c0_145 = arith.constant 0 : index
    %c0_146 = arith.constant 0 : index
    %198 = vector.load %arg0[%c1_144, %c0_145, %c0_146] : memref<4x16x64xf32, #tpu.memory_space<vmem>>, vector<1x16x64xf32>
    %199 = vector.shape_cast %198 : vector<1x16x64xf32> to vector<16x64xf32>
    %200 = vector.broadcast %197 : f32 to vector<16x64xf32>
    %201 = arith.mulf %200, %199 : vector<16x64xf32>
    %202 = arith.addf %196, %201 : vector<16x64xf32>
    %c6_147 = arith.constant 6 : index
    %c2_148 = arith.constant 2 : index
    %203 = memref.load %arg1[%c6_147, %c2_148] : memref<8x4xf32, #tpu.memory_space<smem>>
    %c2_149 = arith.constant 2 : index
    %c0_150 = arith.constant 0 : index
    %c0_151 = arith.constant 0 : index
    %204 = vector.load %arg0[%c2_149, %c0_150, %c0_151] : memref<4x16x64xf32, #tpu.memory_space<vmem>>, vector<1x16x64xf32>
    %205 = vector.shape_cast %204 : vector<1x16x64xf32> to vector<16x64xf32>
    %206 = vector.broadcast %203 : f32 to vector<16x64xf32>
    %207 = arith.mulf %206, %205 : vector<16x64xf32>
    %208 = arith.addf %202, %207 : vector<16x64xf32>
    %c6_152 = arith.constant 6 : index
    %c3_153 = arith.constant 3 : index
    %209 = memref.load %arg1[%c6_152, %c3_153] : memref<8x4xf32, #tpu.memory_space<smem>>
    %c3_154 = arith.constant 3 : index
    %c0_155 = arith.constant 0 : index
    %c0_156 = arith.constant 0 : index
    %210 = vector.load %arg0[%c3_154, %c0_155, %c0_156] : memref<4x16x64xf32, #tpu.memory_space<vmem>>, vector<1x16x64xf32>
    %211 = vector.shape_cast %210 : vector<1x16x64xf32> to vector<16x64xf32>
    %212 = vector.broadcast %209 : f32 to vector<16x64xf32>
    %213 = arith.mulf %212, %211 : vector<16x64xf32>
    %214 = arith.addf %208, %213 : vector<16x64xf32>
    %c6_157 = arith.constant 6 : index
    %215 = memref.load %arg2[%c6_157] : memref<8xf32, #tpu.memory_space<smem>>
    %216 = vector.broadcast %215 : f32 to vector<16x64xf32>
    %217 = arith.addf %214, %216 : vector<16x64xf32>
    %cst_158 = arith.constant 0.000000e+00 : f32
    %218 = vector.broadcast %cst_158 : f32 to vector<16x64xf32>
    %219 = arith.cmpf ogt, %217, %218 : vector<16x64xf32>
    %cst_159 = arith.constant 1.000000e-01 : f32
    %220 = vector.broadcast %cst_159 : f32 to vector<16x64xf32>
    %221 = arith.mulf %220, %217 : vector<16x64xf32>
    %222 = arith.select %219, %217, %221 : vector<16x64xi1>, vector<16x64xf32>
    %c0_160 = arith.constant 0 : index
    %c384 = arith.constant 384 : index
    %223 = vector.load %arg13[%c0_160, %c384] : memref<16x512xf32, #tpu.memory_space<vmem>>, vector<16x64xf32>
    tpu.vector_store %arg13[%c0_160, %c384], %222 {strides = array<i32>} : memref<16x512xf32, #tpu.memory_space<vmem>>, vector<16x64xf32>,
    %c7 = arith.constant 7 : index
    %c0_161 = arith.constant 0 : index
    %224 = memref.load %arg1[%c7, %c0_161] : memref<8x4xf32, #tpu.memory_space<smem>>
    %c0_162 = arith.constant 0 : index
    %c0_163 = arith.constant 0 : index
    %c0_164 = arith.constant 0 : index
    %225 = vector.load %arg0[%c0_162, %c0_163, %c0_164] : memref<4x16x64xf32, #tpu.memory_space<vmem>>, vector<1x16x64xf32>
    %226 = vector.shape_cast %225 : vector<1x16x64xf32> to vector<16x64xf32>
    %227 = vector.broadcast %224 : f32 to vector<16x64xf32>
    %228 = arith.mulf %227, %226 : vector<16x64xf32>
    %c7_165 = arith.constant 7 : index
    %c1_166 = arith.constant 1 : index
    %229 = memref.load %arg1[%c7_165, %c1_166] : memref<8x4xf32, #tpu.memory_space<smem>>
    %c1_167 = arith.constant 1 : index
    %c0_168 = arith.constant 0 : index
    %c0_169 = arith.constant 0 : index
    %230 = vector.load %arg0[%c1_167, %c0_168, %c0_169] : memref<4x16x64xf32, #tpu.memory_space<vmem>>, vector<1x16x64xf32>
    %231 = vector.shape_cast %230 : vector<1x16x64xf32> to vector<16x64xf32>
    %232 = vector.broadcast %229 : f32 to vector<16x64xf32>
    %233 = arith.mulf %232, %231 : vector<16x64xf32>
    %234 = arith.addf %228, %233 : vector<16x64xf32>
    %c7_170 = arith.constant 7 : index
    %c2_171 = arith.constant 2 : index
    %235 = memref.load %arg1[%c7_170, %c2_171] : memref<8x4xf32, #tpu.memory_space<smem>>
    %c2_172 = arith.constant 2 : index
    %c0_173 = arith.constant 0 : index
    %c0_174 = arith.constant 0 : index
    %236 = vector.load %arg0[%c2_172, %c0_173, %c0_174] : memref<4x16x64xf32, #tpu.memory_space<vmem>>, vector<1x16x64xf32>
    %237 = vector.shape_cast %236 : vector<1x16x64xf32> to vector<16x64xf32>
    %238 = vector.broadcast %235 : f32 to vector<16x64xf32>
    %239 = arith.mulf %238, %237 : vector<16x64xf32>
    %240 = arith.addf %234, %239 : vector<16x64xf32>
    %c7_175 = arith.constant 7 : index
    %c3_176 = arith.constant 3 : index
    %241 = memref.load %arg1[%c7_175, %c3_176] : memref<8x4xf32, #tpu.memory_space<smem>>
    %c3_177 = arith.constant 3 : index
    %c0_178 = arith.constant 0 : index
    %c0_179 = arith.constant 0 : index
    %242 = vector.load %arg0[%c3_177, %c0_178, %c0_179] : memref<4x16x64xf32, #tpu.memory_space<vmem>>, vector<1x16x64xf32>
    %243 = vector.shape_cast %242 : vector<1x16x64xf32> to vector<16x64xf32>
    %244 = vector.broadcast %241 : f32 to vector<16x64xf32>
    %245 = arith.mulf %244, %243 : vector<16x64xf32>
    %246 = arith.addf %240, %245 : vector<16x64xf32>
    %c7_180 = arith.constant 7 : index
    %247 = memref.load %arg2[%c7_180] : memref<8xf32, #tpu.memory_space<smem>>
    %248 = vector.broadcast %247 : f32 to vector<16x64xf32>
    %249 = arith.addf %246, %248 : vector<16x64xf32>
    %cst_181 = arith.constant 0.000000e+00 : f32
    %250 = vector.broadcast %cst_181 : f32 to vector<16x64xf32>
    %251 = arith.cmpf ogt, %249, %250 : vector<16x64xf32>
    %cst_182 = arith.constant 1.000000e-01 : f32
    %252 = vector.broadcast %cst_182 : f32 to vector<16x64xf32>
    %253 = arith.mulf %252, %249 : vector<16x64xf32>
    %254 = arith.select %251, %249, %253 : vector<16x64xi1>, vector<16x64xf32>
    %c0_183 = arith.constant 0 : index
    %c448 = arith.constant 448 : index
    %255 = vector.load %arg13[%c0_183, %c448] : memref<16x512xf32, #tpu.memory_space<vmem>>, vector<16x64xf32>
    tpu.vector_store %arg13[%c0_183, %c448], %254 {strides = array<i32>} : memref<16x512xf32, #tpu.memory_space<vmem>>, vector<16x64xf32>,
    %c0_184 = arith.constant 0 : index
    %c0_185 = arith.constant 0 : index
    %256 = vector.load %arg13[%c0_184, %c0_185] : memref<16x512xf32, #tpu.memory_space<vmem>>, vector<16x512xf32>
    %257 = arith.truncf %256 : vector<16x512xf32> to vector<16x512xbf16>
    %c0_186 = arith.constant 0 : index
    %c0_187 = arith.constant 0 : index
    %258 = vector.load %arg3[%c0_186, %c0_187] : memref<512x2048xbf16, #tpu.memory_space<vmem>>, vector<512x2048xbf16>
    %cst_188 = arith.constant dense<0.000000e+00> : vector<16x2048xf32>
    %259 = tpu.matmul %257, %258, %cst_188 {dimension_numbers = #tpu.dot_dimension_numbers<[1], [0], [0], [1], [0, 0, 1, 1], [], []>} : vector<16x512xbf16>, vector<512x2048xbf16>, vector<16x2048xf32> -> vector<16x2048xf32>
    %c0_189 = arith.constant 0 : index
    %c0_190 = arith.constant 0 : index
    %260 = vector.load %arg4[%c0_189, %c0_190] : memref<1x2048xf32, #tpu.memory_space<vmem>>, vector<1x2048xf32>
    %261 = vector.broadcast %260 : vector<1x2048xf32> to vector<16x2048xf32>
    %262 = arith.addf %259, %261 : vector<16x2048xf32>
    %cst_191 = arith.constant 0.000000e+00 : f32
    %263 = vector.broadcast %cst_191 : f32 to vector<16x2048xf32>
    %264 = arith.cmpf ogt, %262, %263 : vector<16x2048xf32>
    %cst_192 = arith.constant 1.000000e-01 : f32
    %265 = vector.broadcast %cst_192 : f32 to vector<16x2048xf32>
    %266 = arith.mulf %265, %262 : vector<16x2048xf32>
    %267 = arith.select %264, %262, %266 : vector<16x2048xi1>, vector<16x2048xf32>
    %268 = arith.truncf %267 : vector<16x2048xf32> to vector<16x2048xbf16>
    %269 = vector.extract_strided_slice %268 {offsets = [0, 0], sizes = [16, 1024], strides = [1, 1]} : vector<16x2048xbf16> to vector<16x1024xbf16>
    %c0_193 = arith.constant 0 : index
    %c0_194 = arith.constant 0 : index
    %270 = vector.load %arg5[%c0_193, %c0_194] : memref<1024x256xbf16, #tpu.memory_space<vmem>>, vector<1024x256xbf16>
    %cst_195 = arith.constant dense<0.000000e+00> : vector<16x256xf32>
    %271 = tpu.matmul %269, %270, %cst_195 {dimension_numbers = #tpu.dot_dimension_numbers<[1], [0], [0], [1], [0, 0, 1, 1], [], []>} : vector<16x1024xbf16>, vector<1024x256xbf16>, vector<16x256xf32> -> vector<16x256xf32>
    %c0_196 = arith.constant 0 : index
    %c0_197 = arith.constant 0 : index
    %272 = vector.load %arg6[%c0_196, %c0_197] : memref<1x256xf32, #tpu.memory_space<vmem>>, vector<1x256xf32>
    %273 = vector.broadcast %272 : vector<1x256xf32> to vector<16x256xf32>
    %274 = arith.addf %271, %273 : vector<16x256xf32>
    %cst_198 = arith.constant 0.000000e+00 : f32
    %275 = vector.broadcast %cst_198 : f32 to vector<16x256xf32>
    %276 = arith.cmpf ogt, %274, %275 : vector<16x256xf32>
    %cst_199 = arith.constant 1.000000e-01 : f32
    %277 = vector.broadcast %cst_199 : f32 to vector<16x256xf32>
    %278 = arith.mulf %277, %274 : vector<16x256xf32>
    %279 = arith.select %276, %274, %278 : vector<16x256xi1>, vector<16x256xf32>
    %280 = arith.truncf %279 : vector<16x256xf32> to vector<16x256xbf16>
    %281 = vector.extract_strided_slice %268 {offsets = [0, 1024], sizes = [16, 1024], strides = [1, 1]} : vector<16x2048xbf16> to vector<16x1024xbf16>
    %c0_200 = arith.constant 0 : index
    %c0_201 = arith.constant 0 : index
    %282 = vector.load %arg7[%c0_200, %c0_201] : memref<1024x256xbf16, #tpu.memory_space<vmem>>, vector<1024x256xbf16>
    %cst_202 = arith.constant dense<0.000000e+00> : vector<16x256xf32>
    %283 = tpu.matmul %281, %282, %cst_202 {dimension_numbers = #tpu.dot_dimension_numbers<[1], [0], [0], [1], [0, 0, 1, 1], [], []>} : vector<16x1024xbf16>, vector<1024x256xbf16>, vector<16x256xf32> -> vector<16x256xf32>
    %c0_203 = arith.constant 0 : index
    %c0_204 = arith.constant 0 : index
    %284 = vector.load %arg8[%c0_203, %c0_204] : memref<1x256xf32, #tpu.memory_space<vmem>>, vector<1x256xf32>
    %285 = vector.broadcast %284 : vector<1x256xf32> to vector<16x256xf32>
    %286 = arith.addf %283, %285 : vector<16x256xf32>
    %cst_205 = arith.constant 0.000000e+00 : f32
    %287 = vector.broadcast %cst_205 : f32 to vector<16x256xf32>
    %288 = arith.cmpf ogt, %286, %287 : vector<16x256xf32>
    %cst_206 = arith.constant 1.000000e-01 : f32
    %289 = vector.broadcast %cst_206 : f32 to vector<16x256xf32>
    %290 = arith.mulf %289, %286 : vector<16x256xf32>
    %291 = arith.select %288, %286, %290 : vector<16x256xi1>, vector<16x256xf32>
    %292 = arith.truncf %291 : vector<16x256xf32> to vector<16x256xbf16>
    %c0_207 = arith.constant 0 : index
    %c0_208 = arith.constant 0 : index
    %293 = vector.load %arg9[%c0_207, %c0_208] : memref<256x128xbf16, #tpu.memory_space<vmem>>, vector<256x128xbf16>
    %cst_209 = arith.constant dense<0.000000e+00> : vector<16x128xf32>
    %294 = tpu.matmul %280, %293, %cst_209 {dimension_numbers = #tpu.dot_dimension_numbers<[1], [0], [0], [1], [0, 0, 1, 1], [], []>} : vector<16x256xbf16>, vector<256x128xbf16>, vector<16x128xf32> -> vector<16x128xf32>
    %c0_210 = arith.constant 0 : index
    %c0_211 = arith.constant 0 : index
    %295 = vector.load %arg10[%c0_210, %c0_211] : memref<256x128xbf16, #tpu.memory_space<vmem>>, vector<256x128xbf16>
    %cst_212 = arith.constant dense<0.000000e+00> : vector<16x128xf32>
    %296 = tpu.matmul %292, %295, %cst_212 {dimension_numbers = #tpu.dot_dimension_numbers<[1], [0], [0], [1], [0, 0, 1, 1], [], []>} : vector<16x256xbf16>, vector<256x128xbf16>, vector<16x128xf32> -> vector<16x128xf32>
    %297 = arith.addf %294, %296 : vector<16x128xf32>
    %c0_213 = arith.constant 0 : index
    %c0_214 = arith.constant 0 : index
    %298 = vector.load %arg11[%c0_213, %c0_214] : memref<1x128xf32, #tpu.memory_space<vmem>>, vector<1x128xf32>
    %299 = vector.broadcast %298 : vector<1x128xf32> to vector<16x128xf32>
    %300 = arith.addf %297, %299 : vector<16x128xf32>
    %c0_215 = arith.constant 0 : index
    %c0_216 = arith.constant 0 : index
    %301 = vector.load %arg12[%c0_215, %c0_216] : memref<16x128xf32, #tpu.memory_space<vmem>>, vector<16x128xf32>
    tpu.vector_store %arg12[%c0_215, %c0_216], %300 {strides = array<i32>} : memref<16x128xf32, #tpu.memory_space<vmem>>, vector<16x128xf32>,
    return
  }
}

</mosaic_0001>

<bundles_post_ra>
// kernel: trhead_linear_forward.1
= control target key start
LH: loop header
LB: loop body
LE: loop exit
PB: predicated region body
PF: predicated region fallthrough
CT: control target
= control target key end

     0   :  { %17 = vsyncpa [#allocation6], 0  ;;  %s9299_s0 = inlined_call_operand.vmem [shape: f32[4,16,64], index: 0, kind: input, shape index: {}]   ;;  %s9300_s1 = inlined_call_operand.vmem [shape: f32[8,4], index: 1, kind: input, shape index: {}]   ;;  %s9301_s2 = inlined_call_operand.hbm [shape: f32[8], index: 2, kind: input, shape index: {}]   ;;  %s9302_s3 = inlined_call_operand.hbm [shape: bf16[512,2048], index: 3, kind: input, shape index: {}]   ;;  %s9303_s4 = inlined_call_operand.hbm [shape: f32[1,2048], index: 4, kind: input, shape index: {}]   ;;  %s9304_s5 = inlined_call_operand.hbm [shape: bf16[1024,256], index: 5, kind: input, shape index: {}]   ;;  %s9305_s6 = inlined_call_operand.hbm [shape: f32[1,256], index: 6, kind: input, shape index: {}]   ;;  %s9306_s7 = inlined_call_operand.hbm [shape: bf16[1024,256], index: 7, kind: input, shape index: {}]   ;;  %s9307_s8 = inlined_call_operand.hbm [shape: f32[1,256], index: 8, kind: input, shape index: {}]   ;;  %s9308_s9 = inlined_call_operand.hbm [shape: bf16[256,128], index: 9, kind: input, shape index: {}]   ;;  %s9309_s10 = inlined_call_operand.hbm [shape: bf16[256,128], index: 10, kind: input, shape index: {}]   ;;  %s9310_s11 = inlined_call_operand.hbm [shape: f32[1,128], index: 11, kind: input, shape index: {}]   ;;  %s9311_s12 = inlined_call_operand.vmem [shape: f32[16,128], index: 12, kind: output, shape index: {}]  }
   0x1   :  { %18 = vsyncpa [#allocation5], 0 }
   0x2   :  { %19 = vsyncpa [#allocation4], 0 }
   0x3   :  { %20 = vsyncpa [#allocation10], 0 }
   0x4   :  { %21 = vsyncpa [#allocation13], 0 }
   0x5   :  { %22 = vsyncpa [#allocation16], 0 }
   0x6   :  { %23 = vsyncpa [#allocation19], 0  ;;  %s8391_s21 = smov [#allocation9]   ;;  %s8392_s23 = smov [#allocation12]  }
   0x7   :  { %s62_s22 = sshll.u32 %s8391_s21, 4  ;;  %s84_s24 = sshll.u32 %s8392_s23, 4  ;;  %s63_s22 = int_to_ptr.vmem [resolvable:$true] %s62_s22  ;;  %s85_s24 = int_to_ptr.vmem [resolvable:$true] %s84_s24 }
   0x8   :  { %s8185_s25 = scalar_lea.vmem %s63_s22, 256  ;;  %p8190_p1 = scmp.lt.s32.totalorder %s63_s22, %s63_s22 }
   0x9   :  { %p8186_p0 = scmp.ne.s32.totalorder %s63_s22, %s8185_s25  ;;  %p8191_p2 = scmp.lt.s32.totalorder %s8185_s25, %s8185_s25 }
   0xb   :  { %p8192_p3 = por %p8191_p2, %p8190_p1 }
   0xd   :  { %p8193_p4 = pnand %p8192_p3, %p8186_p0 }
   0xf   :  { %8196 = shalt.err (!%p8193_p4)
}
  0x10   :  { %65 = dma.hbm_to_vmem [thread:$0]  %s9303_s4, 256, %s63_s22, [#allocation10]  }
  0x11   :  { %s8205_s28 = scalar_lea.vmem %s85_s24, 32  ;;  %p8210_p6 = scmp.lt.s32.totalorder %s85_s24, %s85_s24 }
  0x12   :  { %p8206_p5 = scmp.ne.s32.totalorder %s85_s24, %s8205_s28  ;;  %p8211_p7 = scmp.lt.s32.totalorder %s8205_s28, %s8205_s28 }
  0x14   :  { %p8212_p8 = por %p8211_p7, %p8210_p6 }
  0x16   :  { %p8213_p9 = pnand %p8212_p8, %p8206_p5 }
  0x18   :  { %8216 = shalt.err (!%p8213_p9)
}
  0x19   :  { %87 = dma.hbm_to_vmem [thread:$0]  %s9305_s6, 32, %s85_s24, [#allocation13]  }
  0x1a   :  { %s8393_s13 = smov [#allocation15]  }
  0x1b   :  { %s106_s14 = sshll.u32 %s8393_s13, 4  ;;  %s107_s14 = int_to_ptr.vmem [resolvable:$true] %s106_s14 }
  0x1c   :  { %s8225_s15 = scalar_lea.vmem %s107_s14, 32  ;;  %p8230_p11 = scmp.lt.s32.totalorder %s107_s14, %s107_s14 }
  0x1d   :  { %p8226_p10 = scmp.ne.s32.totalorder %s107_s14, %s8225_s15  ;;  %p8231_p12 = scmp.lt.s32.totalorder %s8225_s15, %s8225_s15 }
  0x1f   :  { %p8232_p13 = por %p8231_p12, %p8230_p11 }
  0x21   :  { %p8233_p0 = pnand %p8232_p13, %p8226_p10 }
  0x23   :  { %8236 = shalt.err (!%p8233_p0)
}
  0x24   :  { %109 = dma.hbm_to_vmem [thread:$0]  %s9307_s8, 32, %s107_s14, [#allocation16]  }
  0x25   :  { %s8394_s17 = smov [#allocation18]   ;;  %s32_s6 = sshll.u32 %s9300_s1, 4  ;;  %s33_s6 = int_to_ptr.vmem [resolvable:$true] %s32_s6 }
  0x26   :  { %s127_s18 = sshll.u32 %s8394_s17, 4  ;;  %s128_s18 = int_to_ptr.vmem [resolvable:$true] %s127_s18 }
  0x27   :  { %s8245_s21 = scalar_lea.vmem %s128_s18, 2048  ;;  %p8250_p2 = scmp.lt.s32.totalorder %s128_s18, %s128_s18 }
  0x28   :  { %p8246_p1 = scmp.ne.s32.totalorder %s128_s18, %s8245_s21  ;;  %p8251_p3 = scmp.lt.s32.totalorder %s8245_s21, %s8245_s21 }
  0x2a   :  { %p8252_p4 = por %p8251_p3, %p8250_p2 }
  0x2c   :  { %p8253_p5 = pnand %p8252_p4, %p8246_p1 }
  0x2e   :  { %8256 = shalt.err (!%p8253_p5)
}
  0x2f   :  { %s8395_s22 = smov 64   ;;  %s8396_s23 = smov 4  }
  0x30   :  { %133 = dma.hbm_to_vmem [thread:$0]  %s9309_s10, 2048, %s128_s18, [#allocation19], %s8395_s22, %s8395_s22, %s8396_s23  }
  0x31   :  { %s8257_s25 = scalar_lea.vmem %s33_s6, 128  ;;  %p8262_p7 = scmp.lt.s32.totalorder %s33_s6, %s33_s6 }
  0x32   :  { %p8258_p6 = scmp.ne.s32.totalorder %s33_s6, %s8257_s25  ;;  %p8263_p8 = scmp.lt.s32.totalorder %s8257_s25, %s8257_s25 }
  0x34   :  { %p8264_p9 = por %p8263_p8, %p8262_p7 }
  0x36   :  { %p8265_p10 = pnand %p8264_p9, %p8258_p6 }
  0x38   :  { %8268 = shalt.err (!%p8265_p10)
}
  0x39   :  { %s8397_s1 = smov [#allocation3]   ;;  %s8398_s26 = smov [#allocation7]  }
  0x3a   :  { %35 = dma.vmem_to_smem %s33_s6, 128, %s8397_s1, [#allocation6]  }
  0x3b   :  { %43 = dma.hbm_to_smem %s9301_s2, 16, %s8398_s26, [#allocation5]  }
  0x3c   :  { %s8399_s29 = smov [#allocation8]   ;;  %s8400_s13 = smov [#allocation11]  }
  0x3d   :  { %s49_s30 = sshll.u32 %s8399_s29, 4  ;;  %s71_s14 = sshll.u32 %s8400_s13, 4  ;;  %s50_s30 = int_to_ptr.vmem [resolvable:$true] %s49_s30  ;;  %s72_s14 = int_to_ptr.vmem [resolvable:$true] %s71_s14 }
  0x3e   :  { %s8285_s10 = scalar_lea.vmem %s50_s30, 65536  ;;  %p8290_p12 = scmp.lt.s32.totalorder %s50_s30, %s50_s30 }
  0x3f   :  { %p8286_p11 = scmp.ne.s32.totalorder %s50_s30, %s8285_s10  ;;  %p8291_p13 = scmp.lt.s32.totalorder %s8285_s10, %s8285_s10 }
  0x41   :  { %p8292_p0 = por %p8291_p13, %p8290_p12 }
  0x43   :  { %p8293_p1 = pnand %p8292_p0, %p8286_p11 }
  0x45   :  { %8296 = shalt.err (!%p8293_p1)
}
  0x46   :  { %s8401_s15 = smov 1024   ;;  %s8305_s2 = scalar_lea.vmem %s72_s14, 16384 }
  0x47   :  { %55 = dma.hbm_to_vmem [thread:$0]  %s9302_s3, 65536, %s50_s30, [#allocation4], %s8401_s15, %s8401_s15, %s8395_s22  }
  0x48   :  { %p8306_p2 = scmp.ne.s32.totalorder %s72_s14, %s8305_s2  ;;  %p8310_p3 = scmp.lt.s32.totalorder %s72_s14, %s72_s14 }
  0x49   :  { %p8311_p4 = scmp.lt.s32.totalorder %s8305_s2, %s8305_s2 }
  0x4b   :  { %p8312_p5 = por %p8311_p4, %p8310_p3 }
  0x4d   :  { %p8313_p6 = pnand %p8312_p5, %p8306_p2 }
  0x4f   :  { %8316 = shalt.err (!%p8313_p6)
}
  0x50   :  { %s8402_s17 = smov 128   ;;  %s8403_s18 = smov 8  }
  0x51   :  { %77 = dma.hbm_to_vmem [thread:$0]  %s9304_s5, 16384, %s72_s14, [#allocation10], %s8402_s17, %s8402_s17, %s8403_s18  }
  0x52   :  { %s8404_s6 = smov [#allocation14]   ;;  %s8405_s8 = smov [#allocation17]  }
  0x53   :  { %s93_s21 = sshll.u32 %s8404_s6, 4  ;;  %s115_s24 = sshll.u32 %s8405_s8, 4  ;;  %s94_s21 = int_to_ptr.vmem [resolvable:$true] %s93_s21  ;;  %s116_s24 = int_to_ptr.vmem [resolvable:$true] %s115_s24 }
  0x54   :  { %s8325_s3 = scalar_lea.vmem %s94_s21, 16384  ;;  %p8330_p8 = scmp.lt.s32.totalorder %s94_s21, %s94_s21 }
  0x55   :  { %p8326_p7 = scmp.ne.s32.totalorder %s94_s21, %s8325_s3  ;;  %p8331_p9 = scmp.lt.s32.totalorder %s8325_s3, %s8325_s3 }
  0x57   :  { %p8332_p10 = por %p8331_p9, %p8330_p8 }
  0x59   :  { %p8333_p11 = pnand %p8332_p10, %p8326_p7 }
  0x5b   :  { %8336 = shalt.err (!%p8333_p11)
}
  0x5c   :  { %99 = dma.hbm_to_vmem [thread:$0]  %s9306_s7, 16384, %s94_s21, [#allocation13], %s8402_s17, %s8402_s17, %s8403_s18  }
  0x5d   :  { %s8345_s26 = scalar_lea.vmem %s116_s24, 2048  ;;  %p8350_p13 = scmp.lt.s32.totalorder %s116_s24, %s116_s24 }
  0x5e   :  { %p8346_p12 = scmp.ne.s32.totalorder %s116_s24, %s8345_s26  ;;  %p8351_p0 = scmp.lt.s32.totalorder %s8345_s26, %s8345_s26 }
  0x60   :  { %p8352_p1 = por %p8351_p0, %p8350_p13 }
  0x62   :  { %p8353_p2 = pnand %p8352_p1, %p8346_p12 }
  0x64   :  { %8356 = shalt.err (!%p8353_p2)
}
  0x65   :  { %121 = dma.hbm_to_vmem [thread:$0]  %s9308_s9, 2048, %s116_s24, [#allocation16], %s8395_s22, %s8395_s22, %s8396_s23  }
  0x66   :  { %s8406_s28 = smov [#allocation20]  }
  0x67   :  { %s140_s29 = sshll.u32 %s8406_s28, 4  ;;  %s141_s29 = int_to_ptr.vmem [resolvable:$true] %s140_s29 }
  0x68   :  { %s8365_s30 = scalar_lea.vmem %s141_s29, 16  ;;  %s8369_s7 = scalar_lea.vmem %s141_s29, 32 }
  0x69   :  { %p8366_p3 = scmp.ne.s32.totalorder %s141_s29, %s8365_s30  ;;  %p8370_p4 = scmp.lt.s32.totalorder %s141_s29, %s141_s29 }
  0x6a   :  { %p8371_p5 = scmp.lt.s32.totalorder %s8369_s7, %s8365_s30 }
  0x6c   :  { %p8372_p6 = por %p8371_p5, %p8370_p4 }
  0x6e   :  { %p8373_p7 = pnand %p8372_p6, %p8366_p3 }
  0x70   :  { %8376 = shalt.err (!%p8373_p7)
}
  0x71   :  { %143 = dma.hbm_to_vmem [thread:$0]  %s9310_s11, 16, %s141_s29, [#allocation19]  }
  0x72   :  { %8377 = dma.done.wait [#allocation6], 128  }
  0x73   :  { %8378 = vsyncadd [#allocation6], 4294967168 }
  0x74   :  { %8379 = dma.done.wait [#allocation5], 16  }
  0x75   :  { %8380 = vsyncadd [#allocation5], 4294967280 }
  0x76   :  { %8381 = dma.done.wait [#allocation4], 65536  }
  0x77   :  { %8382 = vsyncadd [#allocation4], 4294901760 }
  0x78   :  { %8383 = dma.done.wait [#allocation10], 16640  }
  0x79   :  { %8384 = vsyncadd [#allocation10], 4294950656 }
  0x7a   :  { %8385 = dma.done.wait [#allocation13], 16416  }
  0x7b   :  { %8386 = vsyncadd [#allocation13], 4294950880 }
  0x7c   :  { %8387 = dma.done.wait [#allocation16], 2080  }
  0x7d   :  { %8388 = vsyncadd [#allocation16], 4294965216 }
  0x7e   :  { %8389 = dma.done.wait [#allocation19], 2064  }
  0x7f   :  { %8390 = vsyncadd [#allocation19], 4294965232 }
  0x80   :  { %177 = sfence }
  0x81   :  { %s8512_s9 = sld [smem:[#allocation3 + $0x180]]  ;;  %v8519_v0 = vld [vmem:[%s9299_s0] sm:$0xff]  ;;  %v8526_v1 = vld [vmem:[%s9299_s0 + $0x8] sm:$0xff]  ;;  %v8531_v3 = vld [vmem:[%s9299_s0 + $0x10] sm:$0xff]  ;;  %vm222_vm8 = vcmask 523264  }
  0x82   :  { %s8514_s23 = sld [smem:[#allocation3 + $0x181]]  ;;  %v676_v2 = vld [vmem:[#allocation8 + $0x380] sm:$0xff]  ;;  %v8538_v4 = vld [vmem:[%s9299_s0 + $0x18] sm:$0xff]  ;;  %v8559_v22 = vld [vmem:[%s9299_s0 + $0x28] sm:$0xff] }
  0x83   :  { %s8521_s15 = sld [smem:[#allocation3 + $0x182]]  ;;  %v684_v5 = vld [vmem:[#allocation8 + $0x3c0] sm:$0xff]  ;;  %v8574_v30 = vld [vmem:[%s9299_s0 + $0x30] sm:$0xff]  ;;  %v8582_v32 = vld [vmem:[%s9299_s0 + $0x38] sm:$0xff] }
  0x84   :  { %s8533_s18 = sld [smem:[#allocation3 + $0x183]]  ;;  %v660_v6 = vld [vmem:[#allocation8 + $0x300] sm:$0xff]  ;;  %v7011_v9 = vcombine.high %v676_v2, %v684_v5  ;;  %v7010_v10 = vcombine.low %v676_v2, %v684_v5 }
  0x85   :  { %v668_v7 = vld [vmem:[#allocation8 + $0x340] sm:$0xff]  ;;  %s8545_s8 = sld [smem:[#allocation7 + $0x3]] }
  0x86   :  { %v8543_v8 = vld [vmem:[%s9299_s0 + $0x20] sm:$0xff]  ;;  %v6995_v11 = vcombine.high %v660_v6, %v668_v7  ;;  %s8549_s24 = sld [smem:[#allocation3 + $0x80]]  ;;  %v6994_v15 = vcombine.low %v660_v6, %v668_v7  ;;  %3720 = vmatprep.subr.bf16.mxu0 %v7011_v9 }
  0x87   :  { %v932_v12 = vld [vmem:[#allocation8 + $0xb80] sm:$0xff]  ;;  %v321_v21 = vstv %s8512_s9  ;;  %s8554_s3 = sld [smem:[#allocation3 + $0x81]]  ;;  %3721 = vmatpush1.bf16.msra.mxu0 %v7010_v10 }
  0x88   :  { %v940_v13 = vld [vmem:[#allocation8 + $0xbc0] sm:$0xff]  ;;  %v322_v28 = vmul.f32 %v321_v21, %v8519_v0  ;;  %v327_v29 = vstv %s8514_s23  ;;  %s8576_s27 = sld [smem:[#allocation3 + $0x82]]  ;;  %v323_v31 = vmul.f32 %v321_v21, %v8526_v1  ;;  %3722 = vmatprep.subr.bf16.mxu0 %v6995_v11 }
  0x89   :  { %v8547_v14 = vld [vmem:[#allocation8 + $0x280] sm:$0xff]  ;;  %v7267_v16 = vcombine.high %v932_v12, %v940_v13  ;;  %v7266_v18 = vcombine.low %v932_v12, %v940_v13  ;;  %v328_v35 = vmul.f32 %v8531_v3, %v327_v29  ;;  %v335_v36 = vstv %s8521_s15  ;;  %s8590_s30 = sld [smem:[#allocation3 + $0x83]] }
  0x8a   :  { %v8551_v17 = vld [vmem:[#allocation8 + $0x2c0] sm:$0xff]  ;;  %v329_v37 = vmul.f32 %v8538_v4, %v327_v29  ;;  %v336_v42 = vmul.f32 %v8543_v8, %v335_v36  ;;  %v343_v43 = vstv %s8533_s18  ;;  %s8601_s0 = sld [smem:[#allocation7 + $0x1]]  ;;  %v337_v44 = vmul.f32 %v8559_v22, %v335_v36 }
  0x8b   :  { %v916_v19 = vld [vmem:[#allocation8 + $0xb00] sm:$0xff]  ;;  %v6979_v23 = vcombine.high %v8547_v14, %v8551_v17  ;;  %v6978_v24 = vcombine.low %v8547_v14, %v8551_v17  ;;  %3763 = vmatprep.subr.bf16.mxu1 %v7267_v16  ;;  %v330_v46 = vadd.f32 %v328_v35, %v322_v28  ;;  %v344_v47 = vmul.f32 %v8574_v30, %v343_v43  ;;  %s8608_s7 = sld [smem:[#allocation3 + $0x380]] }
  0x8c   :  { %v924_v20 = vld [vmem:[#allocation8 + $0xb40] sm:$0xff]  ;;  %3764 = vmatpush1.bf16.msra.mxu1 %v7266_v18  ;;  %v349_v48 = vstv %s8545_s8  ;;  %v331_v49 = vadd.f32 %v329_v37, %v323_v31  ;;  %v228_v50 = vstv %s8549_s24  ;;  %v345_v51 = vmul.f32 %v8582_v32, %v343_v43  ;;  %s8612_s13 = sld [smem:[#allocation3 + $0x381]]  ;;  %3723 = vmatpush1.bf16.msra.mxu0 %v6994_v15 }
  0x8d   :  { %v7251_v25 = vcombine.high %v916_v19, %v924_v20  ;;  %v8565_v26 = vld [vmem:[#allocation8 + $0x200] sm:$0xff]  ;;  %v7250_v38 = vcombine.low %v916_v19, %v924_v20  ;;  %v338_v54 = vadd.f32 %v336_v42, %v330_v46  ;;  %v229_v55 = vmul.f32 %v8519_v0, %v228_v50  ;;  %s8620_s14 = sld [smem:[#allocation3 + $0x382]]  ;;  %3724 = vmatprep.subr.bf16.mxu0 %v6979_v23 }
  0x8e   :  { %v8567_v27 = vld [vmem:[#allocation8 + $0x240] sm:$0xff]  ;;  %v234_v56 = vstv %s8554_s3  ;;  %v339_v57 = vadd.f32 %v337_v44, %v331_v49  ;;  %v242_v59 = vstv %s8576_s27  ;;  %v230_v60 = vmul.f32 %v8526_v1, %v228_v50  ;;  %s8626_s9 = sld [smem:[#allocation3 + $0x383]] }
  0x8f   :  { %v6963_v33 = vcombine.high %v8565_v26, %v8567_v27  ;;  %v8586_v34 = vld [vmem:[#allocation8 + $0xa80] sm:$0xff]  ;;  %3765 = vmatprep.subr.bf16.mxu1 %v7251_v25  ;;  %v6962_v45 = vcombine.low %v8565_v26, %v8567_v27  ;;  %v235_v58 = vmul.f32 %v8531_v3, %v234_v56  ;;  %v236_v61 = vmul.f32 %v8538_v4, %v234_v56  ;;  %s8630_s23 = sld [smem:[#allocation7 + $0x7]] }
  0x90   :  { %v8593_v39 = vld [vmem:[#allocation8 + $0xac0] sm:$0xff]  ;;  %3766 = vmatpush1.bf16.msra.mxu1 %v7250_v38  ;;  %v346_v62 = vadd.f32 %v344_v47, %v338_v54  ;;  %v243_v63 = vmul.f32 %v8543_v8, %v242_v59  ;;  %v250_v2 = vstv %s8590_s30  ;;  %v347_v5 = vadd.f32 %v345_v51, %v339_v57  ;;  %s8634_s11 = sld [smem:[#allocation3 + $0x280]]  ;;  %3725 = vmatpush1.bf16.msra.mxu0 %v6978_v24 }
  0x91   :  { %v8595_v40 = vld [vmem:[#allocation8 + $0x180] sm:$0xff]  ;;  %v7235_v52 = vcombine.high %v8586_v34, %v8593_v39  ;;  %v237_v6 = vadd.f32 %v235_v58, %v229_v55  ;;  %v251_v7 = vmul.f32 %v8574_v30, %v250_v2  ;;  %v256_v9 = vstv %s8601_s0  ;;  %s8641_s10 = sld [smem:[#allocation3 + $0x281]]  ;;  %3726 = vmatprep.subr.bf16.mxu0 %v6963_v33 }
  0x92   :  { %v8597_v41 = vld [vmem:[#allocation8 + $0x1c0] sm:$0xff]  ;;  %v238_v10 = vadd.f32 %v236_v61, %v230_v60  ;;  %v350_v11 = vadd.f32 %v349_v48, %v346_v62  ;;  %v351_v12 = vadd.f32 %v349_v48, %v347_v5  ;;  %v244_v13 = vmul.f32 %v8559_v22, %v242_v59  ;;  %s8645_s15 = sld [smem:[#allocation3 + $0x282]] }
  0x93   :  { %v6947_v53 = vcombine.high %v8595_v40, %v8597_v41  ;;  %3767 = vmatprep.subr.bf16.mxu1 %v7235_v52  ;;  %v252_v15 = vmul.f32 %v8582_v32, %v250_v2  ;;  %v245_v16 = vadd.f32 %v243_v63, %v237_v6  ;;  %v505_v18 = vstv %s8608_s7  ;;  %s8651_s4 = sld [smem:[#allocation3 + $0x283]]  ;;  %v884_v2 = vld [vmem:[#allocation8 + $0xa00] sm:$0xff] }
  0x94   :  { %v511_v19 = vstv %s8612_s13  ;;  %v7234_v14 = vcombine.low %v8586_v34, %v8593_v39  ;;  %vm352_vm0 = vcmp.gt.f32.partialorder %v350_v11, 0.0  ;;  %v354_v17 = vmul.f32 0.1, %v350_v11  ;;  %3727 = vmatpush1.bf16.msra.mxu0 %v6962_v45  ;;  %s8655_s16 = sld [smem:[#allocation7 + $0x5]]  ;;  %v892_v5 = vld [vmem:[#allocation8 + $0xa40] sm:$0xff] }
  0x95   :  { %vm353_vm1 = vcmp.gt.f32.partialorder %v351_v12, 0.0  ;;  %v355_v20 = vmul.f32 0.1, %v351_v12  ;;  %v253_v21 = vadd.f32 %v251_v7, %v245_v16  ;;  %v246_v23 = vadd.f32 %v244_v13, %v238_v10  ;;  %3728 = vmatprep.subr.bf16.mxu0 %v6947_v53  ;;  %v596_v10 = vld [vmem:[#allocation8 + $0x100] sm:$0xff]  ;;  %s8694_s2 = sld [smem:[#allocation3 + $0x100]] }
  0x96   :  { %v506_v24 = vmul.f32 %v505_v18, %v8519_v0  ;;  %v512_v25 = vmul.f32 %v8531_v3, %v511_v19  ;;  %v356_v26 = vsel %vm352_vm0, %v350_v11, %v354_v17  ;;  %v519_v28 = vstv %s8620_s14  ;;  %3768 = vmatpush1.bf16.msra.mxu1 %v7234_v14  ;;  %v604_v11 = vld [vmem:[#allocation8 + $0x140] sm:$0xff]  ;;  %s8702_s17 = sld [smem:[#allocation3 + $0x101]] }
  0x97   :  { %v357_v27 = vsel %vm353_vm1, %v351_v12, %v355_v20  ;;  %v527_v29 = vstv %s8626_s9  ;;  %360 = vrot.lane.b32.xlu0 %v356_v26, %s8395_s22  ;;  %v257_v31 = vadd.f32 %v256_v9, %v253_v21  ;;  %v254_v33 = vadd.f32 %v252_v15, %v246_v23  ;;  %v8677_v12 = vld [vmem:[#allocation8 + $0x980] sm:$0xff]  ;;  %s8716_s18 = sld [smem:[#allocation3 + $0x102]] }
  0x98   :  { %v514_v34 = vadd.f32 %v512_v25, %v506_v24  ;;  %v520_v35 = vmul.f32 %v8543_v8, %v519_v28  ;;  %v528_v36 = vmul.f32 %v8574_v30, %v527_v29  ;;  %v533_v37 = vstv %s8630_s23  ;;  %v8685_v14 = vld [vmem:[#allocation8 + $0x80] sm:$0xff]  ;;  %s8727_s19 = sld [smem:[#allocation3 + $0x103]] }
  0x99   :  { %v507_v38 = vmul.f32 %v505_v18, %v8526_v1  ;;  %v513_v39 = vmul.f32 %v8538_v4, %v511_v19  ;;  %vm259_vm2 = vcmp.gt.f32.partialorder %v257_v31, 0.0  ;;  %v261_v42 = vmul.f32 0.1, %v257_v31  ;;  %v8683_v19 = vld [vmem:[#allocation8 + $0x9c0] sm:$0xff]  ;;  %s8739_s20 = sld [smem:[#allocation3]] }
  0x9a   :  { %v258_v43 = vadd.f32 %v256_v9, %v254_v33  ;;  %v522_v44 = vadd.f32 %v520_v35, %v514_v34  ;;  %v521_v46 = vmul.f32 %v8559_v22, %v519_v28  ;;  %v529_v47 = vmul.f32 %v8582_v32, %v527_v29  ;;  %v8687_v17 = vld [vmem:[#allocation8 + $0xc0] sm:$0xff]  ;;  %s8747_s6 = sld [smem:[#allocation3 + $0x1]] }
  0x9b   :  { %v515_v45 = vadd.f32 %v513_v39, %v507_v38  ;;  %v413_v48 = vstv %s8634_s11  ;;  %v263_v49 = vsel %vm259_vm2, %v257_v31, %v261_v42  ;;  %362 = vrot.lane.b32.xlu0 %v357_v27, %s8395_s22  ;;  %v419_v54 = vstv %s8641_s10  ;;  %v8692_v28 = vld [vmem:[#allocation8 + $0x900] sm:$0xff]  ;;  %s8765_s21 = sld [smem:[#allocation3 + $0x2]] }
  0x9c   :  { %vm260_vm3 = vcmp.gt.f32.partialorder %v258_v43, 0.0  ;;  %v262_v50 = vmul.f32 0.1, %v258_v43  ;;  %v530_v51 = vadd.f32 %v528_v36, %v522_v44  ;;  %267 = vrot.lane.b32.xlu1 %v263_v49, %s8395_s22  ;;  %v414_v53 = vmul.f32 %v413_v48, %v8519_v0  ;;  %v8696_v34 = vld [vmem:[#allocation8 + $0x940] sm:$0xff]  ;;  %s8779_s8 = sld [smem:[#allocation3 + $0x3]] }
  0x9d   :  { %v523_v52 = vadd.f32 %v521_v46, %v515_v45  ;;  %v427_v55 = vstv %s8645_s15  ;;  %v420_v58 = vmul.f32 %v8531_v3, %v419_v54  ;;  %v435_v61 = vstv %s8651_s4  ;;  %v8708_v39 = vld [vmem:[#allocation8 + $0x880] sm:$0xff]  ;;  %s8789_s24 = sld [smem:[#allocation7 + $0x2]] }
  0x9e   :  { %v264_v56 = vsel %vm260_vm3, %v258_v43, %v262_v50  ;;  %v534_v57 = vadd.f32 %v533_v37, %v530_v51  ;;  %v428_v59 = vmul.f32 %v8543_v8, %v427_v55  ;;  %v441_v62 = vstv %s8655_s16  ;;  %v8710_v42 = vld [vmem:[#allocation8 + $0x8c0] sm:$0xff]  ;;  %s8801_s3 = sld [smem:[#allocation7]] }
  0x9f   :  { %v531_v60 = vadd.f32 %v529_v47, %v523_v52  ;;  %v415_v63 = vmul.f32 %v413_v48, %v8526_v1  ;;  %v422_v7 = vadd.f32 %v420_v58, %v414_v53  ;;  %v436_v9 = vmul.f32 %v8574_v30, %v435_v61  ;;  %v8712_v43 = vld [vmem:[#allocation8 + $0x780] sm:$0xff]  ;;  %s8845_s25 = sld [smem:[#allocation3 + $0x301]] }
  0xa0   :  { %vm536_vm4 = vcmp.gt.f32.partialorder %v534_v57, 0.0  ;;  %v538_v6 = vmul.f32 0.1, %v534_v57  ;;  %269 = vrot.lane.b32.xlu1 %v264_v56, %s8395_s22  ;;  %v421_v15 = vmul.f32 %v8538_v4, %v419_v54  ;;  %v429_v16 = vmul.f32 %v8559_v22, %v427_v55  ;;  %v8714_v44 = vld [vmem:[#allocation8 + $0x7c0] sm:$0xff]  ;;  %s8849_s1 = sld [smem:[#allocation3 + $0x302]] }
  0xa1   :  { %v535_v13 = vadd.f32 %v533_v37, %v531_v60  ;;  %v437_v18 = vmul.f32 %v8582_v32, %v435_v61  ;;  %v430_v21 = vadd.f32 %v428_v59, %v422_v7  ;;  %v6946_v23 = vcombine.low %v8595_v40, %v8597_v41  ;;  %v8698_v40 = vld [vmem:[#allocation8] sm:$0xff]  ;;  %s8859_s26 = sld [smem:[#allocation3 + $0x303]] }
  0xa2   :  { %v540_v20 = vsel %vm536_vm4, %v534_v57, %v538_v6  ;;  %v7219_v24 = vcombine.high %v884_v2, %v892_v5  ;;  %v423_v26 = vadd.f32 %v421_v15, %v415_v63  ;;  %v6931_v27 = vcombine.high %v596_v10, %v604_v11  ;;  %v8700_v41 = vld [vmem:[#allocation8 + $0x40] sm:$0xff]  ;;  %s8880_s5 = sld [smem:[#allocation7 + $0x6]] }
  0xa3   :  { %544 = vrot.lane.b32.xlu0 %v540_v20, %s8395_s22  ;;  %vm537_vm5 = vcmp.gt.f32.partialorder %v535_v13, 0.0  ;;  %v539_v25 = vmul.f32 0.1, %v535_v13  ;;  %v438_v29 = vadd.f32 %v436_v9, %v430_v21  ;;  %3729 = vmatpush1.bf16.msra.mxu0 %v6946_v23  ;;  %v7218_v31 = vcombine.low %v884_v2, %v892_v5  ;;  %v8723_v47 = vld [vmem:[#allocation8 + $0x800] sm:$0xff]  ;;  %s8888_s27 = sld [smem:[#allocation3 + $0x200]] }
  0xa4   :  { %3769 = vmatprep.subr.bf16.mxu1 %v7219_v24  ;;  %v6930_v33 = vcombine.low %v596_v10, %v604_v11  ;;  %v431_v36 = vadd.f32 %v429_v16, %v423_v26  ;;  %3730 = vmatprep.subr.bf16.mxu0 %v6931_v27  ;;  %v7203_v37 = vcombine.high %v8677_v12, %v8683_v19  ;;  %v8725_v48 = vld [vmem:[#allocation8 + $0x840] sm:$0xff]  ;;  %s8905_s28 = sld [smem:[#allocation3 + $0x201]]  ;;  %vm273_vm1 = vcmask 1048064  }
  0xa5   :  { %v541_v35 = vsel %vm537_vm5, %v535_v13, %v539_v25  ;;  %v6915_v38 = vcombine.high %v8685_v14, %v8687_v17  ;;  %v442_v45 = vadd.f32 %v441_v62, %v438_v29  ;;  %3770 = vmatpush1.bf16.msra.mxu1 %v7218_v31  ;;  %v7202_v46 = vcombine.low %v8677_v12, %v8683_v19  ;;  %v8731_v51 = vld [vmem:[#allocation8 + $0x700] sm:$0xff]  ;;  %s8911_s29 = sld [smem:[#allocation3 + $0x202]] }
  0xa6   :  { %546 = vrot.lane.b32.xlu1 %v541_v35, %s8395_s22  ;;  %v439_v49 = vadd.f32 %v437_v18, %v431_v36  ;;  %3771 = vmatprep.subr.bf16.mxu1 %v7203_v37  ;;  %v7187_v50 = vcombine.high %v8692_v28, %v8696_v34  ;;  %v8733_v52 = vld [vmem:[#allocation8 + $0x740] sm:$0xff]  ;;  %v6914_v56 = vcombine.low %v8685_v14, %v8687_v17  ;;  %v279_v29 = vstv %s8694_s2  ;;  %s8923_s30 = sld [smem:[#allocation3 + $0x203]] }
  0xa7   :  { %v8735_v53 = vld [vmem:[#allocation8 + $0xf80] sm:$0xff]  ;;  %vm444_vm6 = vcmp.gt.f32.partialorder %v442_v45, 0.0  ;;  %v446_v55 = vmul.f32 0.1, %v442_v45  ;;  %3731 = vmatpush1.bf16.msra.mxu0 %v6930_v33  ;;  %v6899_v60 = vcombine.high %v8698_v40, %v8700_v41  ;;  %v7186_v61 = vcombine.low %v8692_v28, %v8696_v34  ;;  %s8959_s0 = sld [smem:[#allocation7 + $0x4]] }
  0xa8   :  { %v8737_v54 = vld [vmem:[#allocation8 + $0xfc0] sm:$0xff]  ;;  %v443_v59 = vadd.f32 %v441_v62, %v439_v49  ;;  %3732 = vmatprep.subr.bf16.mxu0 %v6915_v38  ;;  %v6898_v63 = vcombine.low %v8698_v40, %v8700_v41  ;;  %v7171_v9 = vcombine.high %v8708_v39, %v8710_v42  ;;  %v7139_v10 = vcombine.high %v8712_v43, %v8714_v44 }
  0xa9   :  { %v8743_v57 = vld [vmem:[#allocation8 + $0x680] sm:$0xff]  ;;  %v448_v62 = vsel %vm444_vm6, %v442_v45, %v446_v55  ;;  %3772 = vmatpush1.bf16.msra.mxu1 %v7202_v46  ;;  %v7170_v11 = vcombine.low %v8708_v39, %v8710_v42  ;;  %v7138_v13 = vcombine.low %v8712_v43, %v8714_v44  ;;  %v7155_v15 = vcombine.high %v8723_v47, %v8725_v48 }
  0xaa   :  { %v8745_v58 = vld [vmem:[#allocation8 + $0x6c0] sm:$0xff]  ;;  %452 = vrot.lane.b32.xlu0 %v448_v62, %s8395_s22  ;;  %vm445_vm7 = vcmp.gt.f32.partialorder %v443_v59, 0.0  ;;  %v447_v12 = vmul.f32 0.1, %v443_v59  ;;  %3773 = vmatprep.subr.bf16.mxu1 %v7187_v50  ;;  %v7123_v16 = vcombine.high %v8731_v51, %v8733_v52  ;;  %v7154_v18 = vcombine.low %v8723_v47, %v8725_v48 }
  0xab   :  { %v8757_v2 = vld [vmem:[#allocation8 + $0xf00] sm:$0xff]  ;;  %3733 = vmatpush1.bf16.msra.mxu0 %v6914_v56  ;;  %v7122_v19 = vcombine.low %v8731_v51, %v8733_v52  ;;  %v7395_v14 = vcombine.high %v8735_v53, %v8737_v54  ;;  %v7107_v20 = vcombine.high %v8743_v57, %v8745_v58  ;;  %v7394_v21 = vcombine.low %v8735_v53, %v8737_v54 }
  0xac   :  { %v8759_v5 = vld [vmem:[#allocation8 + $0xf40] sm:$0xff]  ;;  %v449_v17 = vsel %vm445_vm7, %v443_v59, %v447_v12  ;;  %3734 = vmatprep.subr.bf16.mxu0 %v6899_v60  ;;  %v7106_v23 = vcombine.low %v8743_v57, %v8745_v58  ;;  %v280_v33 = vmul.f32 %v8519_v0, %v279_v29  ;;  %v285_v34 = vstv %s8702_s17 }
  0xad   :  { %v8761_v6 = vld [vmem:[#allocation8 + $0x600] sm:$0xff]  ;;  %454 = vrot.lane.b32.xlu1 %v449_v17, %s8395_s22  ;;  %3774 = vmatpush1.bf16.msra.mxu1 %v7186_v61  ;;  %v7379_v26 = vcombine.high %v8757_v2, %v8759_v5  ;;  %v7378_v28 = vcombine.low %v8757_v2, %v8759_v5  ;;  %v293_v40 = vstv %s8716_s18  ;;  %v286_v37 = vmul.f32 %v8531_v3, %v285_v34  ;;  %s8836_s22 = sld [smem:[#allocation3 + $0x300]] }
  0xae   :  { %v8763_v7 = vld [vmem:[#allocation8 + $0x640] sm:$0xff]  ;;  %3775 = vmatprep.subr.bf16.mxu1 %v7171_v9  ;;  %v294_v38 = vmul.f32 %v8543_v8, %v293_v40  ;;  %v301_v39 = vstv %s8727_s19  ;;  %v182_v43 = vstv %s8739_s20  ;;  %v189_v44 = vstv %s8747_s6 }
  0xaf   :  { %v8797_v24 = vld [vmem:[#allocation8 + $0xe80] sm:$0xff]  ;;  %v7091_v27 = vcombine.high %v8761_v6, %v8763_v7  ;;  %v7090_v31 = vcombine.low %v8761_v6, %v8763_v7  ;;  %3735 = vmatpush1.bf16.msra.mxu0 %v6898_v63  ;;  %v302_v42 = vmul.f32 %v8574_v30, %v301_v39  ;;  %v198_v45 = vstv %s8765_s21 }
  0xb0   :  { %v8799_v25 = vld [vmem:[#allocation8 + $0xec0] sm:$0xff]  ;;  %3736 = vmatprep.subr.bf16.mxu0 %v7139_v10  ;;  %v288_v50 = vadd.f32 %v286_v37, %v280_v33  ;;  %v183_v55 = vmul.f32 %v8519_v0, %v182_v43  ;;  %v190_v56 = vmul.f32 %v8531_v3, %v189_v44  ;;  %v199_v59 = vmul.f32 %v8543_v8, %v198_v45 }
  0xb1   :  { %v7363_v41 = vcombine.high %v8797_v24, %v8799_v25  ;;  %v8818_v35 = vld [vmem:[#allocation8 + $0x580] sm:$0xff]  ;;  %3776 = vmatpush1.bf16.msra.mxu1 %v7170_v11  ;;  %v207_v62 = vstv %s8779_s8  ;;  %v307_v10 = vstv %s8789_s24  ;;  %v281_v37 = vmul.f32 %v8526_v1, %v279_v29 }
  0xb2   :  { %v8820_v36 = vld [vmem:[#allocation8 + $0x5c0] sm:$0xff]  ;;  %3777 = vmatprep.subr.bf16.mxu1 %v7155_v15  ;;  %v296_v9 = vadd.f32 %v294_v38, %v288_v50  ;;  %v192_v11 = vadd.f32 %v190_v56, %v183_v55  ;;  %v208_v12 = vmul.f32 %v8574_v30, %v207_v62  ;;  %v213_v15 = vstv %s8801_s3 }
  0xb3   :  { %v8829_v46 = vld [vmem:[#allocation8 + $0xe00] sm:$0xff]  ;;  %v7075_v60 = vcombine.high %v8818_v35, %v8820_v36  ;;  %3737 = vmatpush2.bf16.msra.mxu0 %v7138_v13  ;;  %v287_v63 = vmul.f32 %v8538_v4, %v285_v34  ;;  %v295_v61 = vmul.f32 %v8559_v22, %v293_v40  ;;  %v184_v50 = vmul.f32 %v8526_v1, %v182_v43 }
  0xb4   :  { %v8831_v49 = vld [vmem:[#allocation8 + $0xe40] sm:$0xff]  ;;  %3738 = vmatprep.subr.bf16.mxu0 %v7123_v16  ;;  %v304_v13 = vadd.f32 %v302_v42, %v296_v9  ;;  %v201_v38 = vadd.f32 %v199_v59, %v192_v11  ;;  %v303_v34 = vmul.f32 %v8582_v32, %v301_v39  ;;  %v191_v40 = vmul.f32 %v8538_v4, %v189_v44 }
  0xb5   :  { %v8852_v17 = vld [vmem:[#allocation8 + $0x500] sm:$0xff]  ;;  %3778 = vmatpush1.bf16.msra.mxu1 %v7154_v18  ;;  %v7347_v16 = vcombine.high %v8829_v46, %v8831_v49  ;;  %v289_v29 = vadd.f32 %v287_v63, %v281_v37  ;;  %v200_v55 = vmul.f32 %v8559_v22, %v198_v45  ;;  %v209_v39 = vmul.f32 %v8582_v32, %v207_v62 }
  0xb6   :  { %v8854_v33 = vld [vmem:[#allocation8 + $0x540] sm:$0xff]  ;;  %3779 = vmatprep.subr.bf16.mxu1 %v7395_v14  ;;  %v308_v47 = vadd.f32 %v307_v10, %v304_v13  ;;  %v210_v48 = vadd.f32 %v208_v12, %v201_v38  ;;  %v7346_v14 = vcombine.low %v8829_v46, %v8831_v49  ;;  %v463_v45 = vstv %s8836_s22 }
  0xb7   :  { %3739 = vmatpush2.bf16.msra.mxu0 %v7122_v19  ;;  %v7059_v18 = vcombine.high %v8852_v17, %v8854_v33  ;;  %v7058_v51 = vcombine.low %v8852_v17, %v8854_v33  ;;  %v297_v52 = vadd.f32 %v295_v61, %v289_v29  ;;  %v193_v19 = vadd.f32 %v191_v40, %v184_v50  ;;  %v8895_v44 = vld [vmem:[#allocation8 + $0xd80] sm:$0xff]  ;;  %v9005_v33 = vld [vmem:[#allocation8 + $0xb88] sm:$0xff] }
  0xb8   :  { %3740 = vmatprep.subr.bf16.mxu0 %v7107_v20  ;;  %vm310_vm9 = vcmp.gt.f32.partialorder %v308_v47, 0.0  ;;  %v312_v42 = vmul.f32 0.1, %v308_v47  ;;  %v214_v43 = vadd.f32 %v213_v15, %v210_v48  ;;  %v8897_v20 = vld [vmem:[#allocation8 + $0xdc0] sm:$0xff]  ;;  %v464_v61 = vmul.f32 %v463_v45, %v8519_v0 }
  0xb9   :  { %3780 = vmatpush2.bf16.msra.mxu1 %v7394_v21  ;;  %v305_v56 = vadd.f32 %v303_v34, %v297_v52  ;;  %v202_v59 = vadd.f32 %v200_v55, %v193_v19  ;;  %v469_v53 = vstv %s8845_s25  ;;  %v8917_v9 = vld [vmem:[#allocation8 + $0x480] sm:$0xff]  ;;  %v477_v58 = vstv %s8849_s1 }
  0xba   :  { %3781 = vmatprep.subr.bf16.mxu1 %v7379_v26  ;;  %v314_v54 = vsel %vm310_vm9, %v308_v47, %v312_v42  ;;  %vm216_vm10 = vcmp.gt.f32.partialorder %v214_v43, 0.0  ;;  %v218_v21 = vmul.f32 0.1, %v214_v43  ;;  %v470_v63 = vmul.f32 %v8531_v3, %v469_v53  ;;  %v8919_v57 = vld [vmem:[#allocation8 + $0x4c0] sm:$0xff] }
  0xbb   :  { %3741 = vmatpush2.bf16.msra.mxu0 %v7106_v23  ;;  %316 = vst.msk [vmem:[#allocation2 + $0x8] sm:$0xff] %vm222_vm8, %v314_v54  ;;  %v309_v26 = vadd.f32 %v307_v10, %v305_v56  ;;  %v211_v62 = vadd.f32 %v209_v39, %v202_v59  ;;  %v485_v23 = vstv %s8859_s26  ;;  %v7331_v2 = vcombine.high %v8895_v44, %v8897_v20  ;;  %v8948_v34 = vld [vmem:[#allocation8 + $0xd00] sm:$0xff]  ;;  %v8985_v56 = vld [vmem:[#allocation8 + $0x388] sm:$0xff] }
  0xbc   :  { %3742 = vmatprep.subr.bf16.mxu0 %v7091_v27  ;;  %v220_v11 = vsel %vm216_vm10, %v214_v43, %v218_v21  ;;  %v472_v12 = vadd.f32 %v470_v63, %v464_v61  ;;  %v478_v27 = vmul.f32 %v8543_v8, %v477_v58  ;;  %v486_v10 = vmul.f32 %v8574_v30, %v485_v23  ;;  %v8950_v6 = vld [vmem:[#allocation8 + $0xd40] sm:$0xff]  ;;  %v8987_v59 = vld [vmem:[#allocation8 + $0x3c8] sm:$0xff] }
  0xbd   :  { %3782 = vmatpush2.bf16.msra.mxu1 %v7378_v28  ;;  %223 = vst.msk [vmem:[#allocation2] sm:$0xff] %vm222_vm8, %v220_v11  ;;  %vm311_vm11 = vcmp.gt.f32.partialorder %v309_v26, 0.0  ;;  %v313_v37 = vmul.f32 0.1, %v309_v26  ;;  %v215_v13 = vadd.f32 %v213_v15, %v211_v62  ;;  %v465_v28 = vmul.f32 %v463_v45, %v8526_v1  ;;  %v8973_v42 = vld [vmem:[#allocation8 + $0x400] sm:$0xff] }
  0xbe   :  { %3783 = vmatprep.subr.bf16.mxu1 %v7363_v41  ;;  %v480_v5 = vadd.f32 %v478_v27, %v472_v12  ;;  %v471_v38 = vmul.f32 %v8538_v4, %v469_v53  ;;  %v479_v41 = vmul.f32 %v8559_v22, %v477_v58  ;;  %v491_v29 = vstv %s8880_s5  ;;  %v956_v27 = vld [vmem:[#allocation8 + $0xc40] sm:$0xff] }
  0xbf   :  { %3743 = vmatpush2.bf16.msra.mxu0 %v7090_v31  ;;  %v315_v50 = vsel %vm311_vm11, %v309_v26, %v313_v37  ;;  %vm217_vm12 = vcmp.gt.f32.partialorder %v215_v13, 0.0  ;;  %v219_v15 = vmul.f32 0.1, %v215_v13  ;;  %v9312_v7 = vcombine.low %v8797_v24, %v8799_v25  ;;  %v972_v26 = vld [vmem:[#allocation8 + $0xcc0] sm:$0xff] }
  0xc0   :  { %3744 = vmatprep.subr.bf16.mxu0 %v7075_v60  ;;  %317 = vst.msk [vmem:[#allocation2 + $0x28] sm:$0xff] %vm222_vm8, %v315_v50  ;;  %v7043_v31 = vcombine.high %v8917_v9, %v8919_v57  ;;  %v488_v40 = vadd.f32 %v486_v10, %v480_v5  ;;  %v473_v60 = vadd.f32 %v471_v38, %v465_v28  ;;  %v371_v48 = vstv %s8888_s27 }
  0xc1   :  { %3784 = vmatpush2.bf16.msra.mxu1 %v9312_v7  ;;  %v487_v55 = vmul.f32 %v8582_v32, %v485_v23  ;;  %v221_v47 = vsel %vm217_vm12, %v215_v13, %v219_v15  ;;  %v7330_v24 = vcombine.low %v8895_v44, %v8897_v20  ;;  %v7042_v25 = vcombine.low %v8917_v9, %v8919_v57 }
  0xc2   :  { %3785 = vmatprep.subr.bf16.mxu1 %v7347_v16  ;;  %v9313_v52 = vcombine.low %v8818_v35, %v8820_v36  ;;  %224 = vst.msk [vmem:[#allocation2 + $0x20] sm:$0xff] %vm222_vm8, %v221_v47  ;;  %v492_v19 = vadd.f32 %v491_v29, %v488_v40  ;;  %v481_v39 = vadd.f32 %v479_v41, %v473_v60  ;;  %v700_v16 = vld [vmem:[#allocation8 + $0x440] sm:$0xff]  ;;  %v377_v45 = vstv %s8905_s28 }
  0xc3   :  { %v372_v43 = vmul.f32 %v371_v48, %v8519_v0  ;;  %v7315_v44 = vcombine.high %v8948_v34, %v8950_v6  ;;  %v378_v35 = vmul.f32 %v8531_v3, %v377_v45  ;;  %v385_v36 = vstv %s8911_s29 }
  0xc4   :  { %3745 = vmatpush2.bf16.msra.mxu0 %v9313_v52  ;;  %v393_v20 = vstv %s8923_s30  ;;  %vm494_vm13 = vcmp.gt.f32.partialorder %v492_v19, 0.0  ;;  %v496_v0 = vmul.f32 0.1, %v492_v19  ;;  %v489_v61 = vadd.f32 %v487_v55, %v481_v39  ;;  %v661_v52 = vld [vmem:[#allocation8 + $0x308] sm:$0xff] }
  0xc5   :  { %3746 = vmatprep.subr.bf16.mxu0 %v7059_v18  ;;  %3786 = vmatpush2.bf16.msra.mxu1 %v7346_v14  ;;  %v386_v18 = vmul.f32 %v8543_v8, %v385_v36  ;;  %v380_v53 = vadd.f32 %v378_v35, %v372_v43  ;;  %v394_v54 = vmul.f32 %v8574_v30, %v393_v20  ;;  %v964_v8 = vld [vmem:[#allocation8 + $0xc80] sm:$0xff]  ;;  %v669_v39 = vld [vmem:[#allocation8 + $0x348] sm:$0xff] }
  0xc6   :  { %3787 = vmatprep.subr.bf16.mxu1 %v7331_v2  ;;  %v373_v3 = vmul.f32 %v371_v48, %v8526_v1  ;;  %v379_v21 = vmul.f32 %v8538_v4, %v377_v45  ;;  %v498_v63 = vsel %vm494_vm13, %v492_v19, %v496_v0  ;;  %v493_v46 = vadd.f32 %v491_v29, %v489_v61  ;;  %v645_v35 = vld [vmem:[#allocation8 + $0x288] sm:$0xff] }
  0xc7   :  { %v7027_v49 = vcombine.high %v8973_v42, %v700_v16  ;;  %v387_v14 = vmul.f32 %v8559_v22, %v385_v36  ;;  %500 = vst.msk [vmem:[#allocation2 + $0x18] sm:$0xff] %vm222_vm8, %v498_v63  ;;  %v7314_v1 = vcombine.low %v8948_v34, %v8950_v6  ;;  %v388_v4 = vadd.f32 %v386_v18, %v380_v53  ;;  %v653_v36 = vld [vmem:[#allocation8 + $0x2c8] sm:$0xff] }
  0xc8   :  { %3747 = vmatpush2.bf16.msra.mxu0 %v7058_v51  ;;  %v381_v30 = vadd.f32 %v379_v21, %v373_v3  ;;  %v395_v17 = vmul.f32 %v8582_v32, %v393_v20  ;;  %v9007_v51 = vld [vmem:[#allocation8 + $0xbc8] sm:$0xff]  ;;  %vm495_vm14 = vcmp.gt.f32.partialorder %v493_v46, 0.0  ;;  %v497_v62 = vmul.f32 0.1, %v493_v46  ;;  %v948_v32 = vld [vmem:[#allocation8 + $0xc00] sm:$0xff] }
  0xc9   :  { %3748 = vmatprep.subr.bf16.mxu0 %v7043_v31  ;;  %3788 = vmatpush2.bf16.msra.mxu1 %v7330_v24  ;;  %v399_v22 = vstv %s8959_s0  ;;  %v7012_v9 = vcombine.low %v8985_v56, %v8987_v59  ;;  %v396_v57 = vadd.f32 %v394_v54, %v388_v4  ;;  %v7299_v23 = vcombine.high %v964_v8, %v972_v26  ;;  %v629_v54 = vld [vmem:[#allocation8 + $0x208] sm:$0xff] }
  0xca   :  { %3789 = vmatprep.subr.bf16.mxu1 %v7315_v44  ;;  %v389_v58 = vadd.f32 %v387_v14, %v381_v30  ;;  %v499_v11 = vsel %vm495_vm14, %v493_v46, %v497_v62  ;;  %v7026_v12 = vcombine.low %v8973_v42, %v700_v16  ;;  %v7268_v10 = vcombine.low %v9005_v33, %v9007_v51  ;;  %v637_v3 = vld [vmem:[#allocation8 + $0x248] sm:$0xff] }
  0xcb   :  { %501 = vst.msk [vmem:[#allocation2 + $0x38] sm:$0xff] %vm222_vm8, %v499_v11  ;;  %v400_v37 = vadd.f32 %v399_v22, %v396_v57  ;;  %v7013_v2 = vcombine.high %v8985_v56, %v8987_v59  ;;  %v7298_v5 = vcombine.low %v964_v8, %v972_v26  ;;  %v7283_v41 = vcombine.high %v948_v32, %v956_v27  ;;  %v917_v56 = vld [vmem:[#allocation8 + $0xb08] sm:$0xff] }
  0xcc   :  { %3749 = vmatpush2.bf16.msra.mxu0 %v7042_v25  ;;  %v397_v13 = vadd.f32 %v395_v17, %v389_v58  ;;  %v7282_v29 = vcombine.low %v948_v32, %v956_v27  ;;  %v7269_v6 = vcombine.high %v9005_v33, %v9007_v51  ;;  %v6997_v43 = vcombine.high %v661_v52, %v669_v39  ;;  %v925_v59 = vld [vmem:[#allocation8 + $0xb48] sm:$0xff] }
  0xcd   :  { %3750 = vmatprep.subr.bf16.mxu0 %v7027_v49  ;;  %3790 = vmatpush2.bf16.msra.mxu1 %v7314_v1  ;;  %vm402_vm15 = vcmp.gt.f32.partialorder %v400_v37, 0.0  ;;  %v404_v28 = vmul.f32 0.1, %v400_v37  ;;  %v6996_v20 = vcombine.low %v661_v52, %v669_v39  ;;  %v6981_v18 = vcombine.high %v645_v35, %v653_v36  ;;  %v613_v49 = vld [vmem:[#allocation8 + $0x188] sm:$0xff] }
  0xce   :  { %v401_v38 = vadd.f32 %v399_v22, %v397_v13  ;;  %3791 = vmatprep.subr.bf16.mxu1 %v7299_v23  ;;  %v6980_v21 = vcombine.low %v645_v35, %v653_v36  ;;  %v6965_v63 = vcombine.high %v629_v54, %v637_v3  ;;  %v621_v14 = vld [vmem:[#allocation8 + $0x1c8] sm:$0xff]  ;;  %v6964_v8 = vcombine.low %v629_v54, %v637_v3 }
  0xcf   :  { %v406_v50 = vsel %vm402_vm15, %v400_v37, %v404_v28  ;;  %v901_v1 = vld [vmem:[#allocation8 + $0xa88] sm:$0xff]  ;;  %v7253_v17 = vcombine.high %v917_v56, %v925_v59  ;;  %v6949_v62 = vcombine.high %v613_v49, %v621_v14  ;;  %v6948_v57 = vcombine.low %v613_v49, %v621_v14 }
  0xd0   :  { %3751 = vmatpush2.bf16.msra.mxu0 %v7026_v12  ;;  %vm403_vm0 = vcmp.gt.f32.partialorder %v401_v38, 0.0  ;;  %v405_v15 = vmul.f32 0.1, %v401_v38  ;;  %408 = vst.msk [vmem:[#allocation2 + $0x10] sm:$0xff] %vm222_vm8, %v406_v50  ;;  %v909_v4 = vld [vmem:[#allocation8 + $0xac8] sm:$0xff]  ;;  %v7252_v58 = vcombine.low %v917_v56, %v925_v59 }
  0xd1   :  { %3806 = vmatprep.subr.bf16.mxu0 %v7013_v2  ;;  %3792 = vmatpush2.bf16.msra.mxu1 %v7298_v5  ;;  %v597_v22 = vld [vmem:[#allocation8 + $0x108] sm:$0xff]  ;;  %v7237_v32 = vcombine.high %v901_v1, %v909_v4  ;;  %v7236_v2 = vcombine.low %v901_v1, %v909_v4 }
  0xd2   :  { %v407_v34 = vsel %vm403_vm0, %v401_v38, %v405_v15  ;;  %3793 = vmatprep.subr.bf16.mxu1 %v7283_v41  ;;  %v885_v23 = vld [vmem:[#allocation8 + $0xa08] sm:$0xff] }
  0xd3   :  { %409 = vst.msk [vmem:[#allocation2 + $0x30] sm:$0xff] %vm222_vm8, %v407_v34  ;;  %v893_v11 = vld [vmem:[#allocation8 + $0xa48] sm:$0xff] }
  0xd4   :  { %v581_v27 = vld [vmem:[#allocation8 + $0x88] sm:$0xff]  ;;  %v7221_v51 = vcombine.high %v885_v23, %v893_v11  ;;  %v7220_v50 = vcombine.low %v885_v23, %v893_v11 }
  0xd5   :  { %3794 = vmatpush2.bf16.msra.mxu1 %v7282_v29  ;;  %v589_v37 = vld [vmem:[#allocation8 + $0xc8] sm:$0xff] }
  0xd6   :  { %3849 = vmatprep.subr.bf16.mxu1 %v7269_v6  ;;  %v869_v5 = vld [vmem:[#allocation8 + $0x988] sm:$0xff]  ;;  %v6917_v33 = vcombine.high %v581_v27, %v589_v37  ;;  %v6916_v41 = vcombine.low %v581_v27, %v589_v37 }
  0xd7   :  { %v877_v28 = vld [vmem:[#allocation8 + $0x9c8] sm:$0xff] }
  0xd8   :  { %v573_v38 = vld [vmem:[#allocation8 + $0x48] sm:$0xff]  ;;  %v7205_v6 = vcombine.high %v869_v5, %v877_v28 }
  0xd9   :  { %v853_v15 = vld [vmem:[#allocation8 + $0x908] sm:$0xff] }
  0xda   :  { %v861_v29 = vld [vmem:[#allocation8 + $0x948] sm:$0xff] }
  0xdb   :  { %v789_v52 = vld [vmem:[#allocation8 + $0x708] sm:$0xff] }
  0xdc   :  { %v773_v36 = vld [vmem:[#allocation8 + $0x688] sm:$0xff] }
  0xdd   :  { %v765_v56 = vld [vmem:[#allocation8 + $0x648] sm:$0xff] }
  0xde   :  { %v1069_v59 = vld [vmem:[#allocation8 + $0xfc8] sm:$0xff] }
  0xdf   :  { %v1045_v1 = vld [vmem:[#allocation8 + $0xf08] sm:$0xff] }
  0xe0   :  { %v1053_v4 = vld [vmem:[#allocation8 + $0xf48] sm:$0xff] }
  0xe1   :  { %v1029_v23 = vld [vmem:[#allocation8 + $0xe88] sm:$0xff] }
  0xe2   :  { %v1037_v11 = vld [vmem:[#allocation8 + $0xec8] sm:$0xff] }
  0xe3   :  { %v7365_v37 = vcombine.high %v1029_v23, %v1037_v11 }
 0x109   :  { %v361_v7 = vpop.permute.xlu0 %360 }
 0x10a   :  { %366 = vst.msk [vmem:[#allocation2 + $0x8] sm:$0xff] %vm273_vm1, %v361_v7  ;;  %v805_v7 = vld [vmem:[#allocation8 + $0x788] sm:$0xff] }
 0x10d   :  { %v363_v31 = vpop.permute.xlu0 %362 }
 0x10e   :  { %v268_v40 = vpop.permute.xlu1 %267  ;;  %367 = vst.msk [vmem:[#allocation2 + $0x28] sm:$0xff] %vm273_vm1, %v363_v31  ;;  %v813_v31 = vld [vmem:[#allocation8 + $0x7c8] sm:$0xff] }
 0x10f   :  { %274 = vst.msk [vmem:[#allocation2] sm:$0xff] %vm273_vm1, %v268_v40  ;;  %v7140_v39 = vcombine.low %v805_v7, %v813_v31 }
 0x111   :  { %v553_v47 = vld [vmem:[#allocation2 + $0x8] sm:$0xff] }
 0x112   :  { %v270_v60 = vpop.permute.xlu1 %269 }
 0x113   :  { %275 = vst.msk [vmem:[#allocation2 + $0x20] sm:$0xff] %vm273_vm1, %v270_v60  ;;  %v7204_v60 = vcombine.low %v869_v5, %v877_v28  ;;  %v1013_v5 = vld [vmem:[#allocation8 + $0xe08] sm:$0xff] }
 0x114   :  { %v1021_v28 = vld [vmem:[#allocation8 + $0xe48] sm:$0xff] }
 0x115   :  { %v545_v55 = vpop.permute.xlu0 %544  ;;  %v557_v24 = vld [vmem:[#allocation2 + $0x28] sm:$0xff] }
 0x116   :  { %550 = vst.msk [vmem:[#allocation2 + $0x18] sm:$0xff] %vm273_vm1, %v545_v55  ;;  %v9027_v25 = vpack.c.bf16 %v557_v24, %v553_v47  ;;  %v552_v19 = vld [vmem:[#allocation2] sm:$0xff]  ;;  %v837_v55 = vld [vmem:[#allocation8 + $0x888] sm:$0xff]  ;;  %v7141_v24 = vcombine.high %v805_v7, %v813_v31 }
 0x117   :  { %v845_v47 = vld [vmem:[#allocation8 + $0x8c8] sm:$0xff] }
 0x118   :  { %v547_v48 = vpop.permute.xlu1 %546  ;;  %3752 = vmatprep.mubr.bf16.mxu0 %v9027_v25  ;;  %v7173_v35 = vcombine.high %v837_v55, %v845_v47 }
 0x119   :  { %551 = vst.msk [vmem:[#allocation2 + $0x38] sm:$0xff] %vm273_vm1, %v547_v48  ;;  %v7189_v48 = vcombine.high %v853_v15, %v861_v29 }
 0x11a   :  { %v556_v42 = vld [vmem:[#allocation2 + $0x20] sm:$0xff] }
 0x11b   :  { %v9031_v16 = vpack.c.bf16 %v556_v42, %v552_v19  ;;  %v797_v19 = vld [vmem:[#allocation8 + $0x748] sm:$0xff]  ;;  %v7188_v42 = vcombine.low %v853_v15, %v861_v29 }
 0x11c   :  { %v453_v45 = vpop.permute.xlu0 %452  ;;  %v997_v15 = vld [vmem:[#allocation8 + $0xd88] sm:$0xff] }
 0x11d   :  { %v555_v44 = vld [vmem:[#allocation2 + $0x18] sm:$0xff]  ;;  %458 = vst.msk [vmem:[#allocation2 + $0x10] sm:$0xff] %vm273_vm1, %v453_v45  ;;  %3753 = vmatmul.mubr.bf16.vlgmr.msra.gmra.mxu0 %v9031_v16  ;;  %v829_v45 = vld [vmem:[#allocation8 + $0x848] sm:$0xff] }
 0x11e   :  { %3807 = vmatpush1.bf16.msra.mxu0 %v7012_v9  ;;  %3838 = vmatprep.mubr.bf16.mxu0 %v9027_v25  ;;  %v605_v9 = vld [vmem:[#allocation8 + $0x148] sm:$0xff] }
 0x11f   :  { %v455_v0 = vpop.permute.xlu1 %454  ;;  %3808 = vmatprep.subr.bf16.mxu0 %v6997_v43  ;;  %v6933_v12 = vcombine.high %v597_v22, %v605_v9  ;;  %v6932_v13 = vcombine.low %v597_v22, %v605_v9  ;;  %v821_v43 = vld [vmem:[#allocation8 + $0x808] sm:$0xff]  ;;  %v7381_v9 = vcombine.high %v1045_v1, %v1053_v4 }
 0x120   :  { %v559_v61 = vld [vmem:[#allocation2 + $0x38] sm:$0xff]  ;;  %459 = vst.msk [vmem:[#allocation2 + $0x30] sm:$0xff] %vm273_vm1, %v455_v0  ;;  %v7124_v0 = vcombine.low %v789_v52, %v797_v19  ;;  %v7157_v3 = vcombine.high %v821_v43, %v829_v45  ;;  %v1005_v29 = vld [vmem:[#allocation8 + $0xdc8] sm:$0xff] }
 0x121   :  { %v9040_v53 = vpack.c.bf16 %v559_v61, %v555_v44  ;;  %v7125_v44 = vcombine.high %v789_v52, %v797_v19  ;;  %v7172_v61 = vcombine.low %v837_v55, %v845_v47  ;;  %v7333_v31 = vcombine.high %v997_v15, %v1005_v29  ;;  %v981_v55 = vld [vmem:[#allocation8 + $0xd08] sm:$0xff] }
 0x122   :  { %3809 = vmatpush1.bf16.msra.mxu0 %v6996_v20  ;;  %v781_v20 = vld [vmem:[#allocation8 + $0x6c8] sm:$0xff] }
 0x123   :  { %3795 = vmatprep.mubr.bf16.mxu1 %v9040_v53  ;;  %3810 = vmatprep.subr.bf16.mxu0 %v6981_v18  ;;  %v1061_v18 = vld [vmem:[#allocation8 + $0xf88] sm:$0xff]  ;;  %v7109_v54 = vcombine.high %v773_v36, %v781_v20 }
 0x124   :  { %v554_v46 = vld [vmem:[#allocation2 + $0x10] sm:$0xff]  ;;  %v7397_v14 = vcombine.high %v1061_v18, %v1069_v59  ;;  %v989_v47 = vld [vmem:[#allocation8 + $0xd48] sm:$0xff] }
 0x125   :  { %v7317_v19 = vcombine.high %v981_v55, %v989_v47 }
 0x126   :  { %3811 = vmatpush1.bf16.msra.mxu0 %v6980_v21  ;;  %v757_v21 = vld [vmem:[#allocation8 + $0x608] sm:$0xff] }
 0x127   :  { %v558_v26 = vld [vmem:[#allocation2 + $0x30] sm:$0xff]  ;;  %3812 = vmatprep.subr.bf16.mxu0 %v6965_v63  ;;  %v7108_v63 = vcombine.low %v773_v36, %v781_v20  ;;  %v7093_v49 = vcombine.high %v757_v21, %v765_v56 }
 0x128   :  { %v9043_v30 = vpack.c.bf16 %v558_v26, %v554_v46  ;;  %v7156_v46 = vcombine.low %v821_v43, %v829_v45  ;;  %v749_v26 = vld [vmem:[#allocation8 + $0x5c8] sm:$0xff] }
 0x129   :  { %v965_v43 = vld [vmem:[#allocation8 + $0xc88] sm:$0xff] }
 0x12a   :  { %3796 = vmatmul.mubr.bf16.vlgmr.msra.gmra.mxu1 %v9043_v30  ;;  %3813 = vmatpush1.bf16.msra.mxu0 %v6964_v8  ;;  %v741_v8 = vld [vmem:[#allocation8 + $0x588] sm:$0xff] }
 0x12b   :  { %3850 = vmatpush1.bf16.msra.mxu1 %v7268_v10  ;;  %3881 = vmatprep.mubr.bf16.mxu1 %v9040_v53  ;;  %v565_v10 = vld [vmem:[#allocation8 + $0x8] sm:$0xff]  ;;  %v7077_v22 = vcombine.high %v741_v8, %v749_v26 }
 0x12c   :  { %3851 = vmatprep.subr.bf16.mxu1 %v7253_v17  ;;  %3814 = vmatprep.subr.bf16.mxu0 %v6949_v62  ;;  %v6901_v34 = vcombine.high %v565_v10, %v573_v38  ;;  %v6900_v40 = vcombine.low %v565_v10, %v573_v38  ;;  %v7092_v17 = vcombine.low %v757_v21, %v765_v56  ;;  %v973_v45 = vld [vmem:[#allocation8 + $0xcc8] sm:$0xff] }
 0x12d   :  { %v7396_v62 = vcombine.low %v1061_v18, %v1069_v59  ;;  %v7349_v38 = vcombine.high %v1013_v5, %v1021_v28  ;;  %v7301_v20 = vcombine.high %v965_v43, %v973_v45  ;;  %v949_v18 = vld [vmem:[#allocation8 + $0xc08] sm:$0xff]  ;;  %v7300_v21 = vcombine.low %v965_v43, %v973_v45 }
 0x12e   :  { %3815 = vmatpush1.bf16.msra.mxu0 %v6948_v57  ;;  %v725_v57 = vld [vmem:[#allocation8 + $0x508] sm:$0xff] }
 0x12f   :  { %3852 = vmatpush1.bf16.msra.mxu1 %v7252_v58  ;;  %3816 = vmatprep.subr.bf16.mxu0 %v6933_v12  ;;  %v733_v58 = vld [vmem:[#allocation8 + $0x548] sm:$0xff]  ;;  %v7076_v12 = vcombine.low %v741_v8, %v749_v26 }
 0x130   :  { %3853 = vmatprep.subr.bf16.mxu1 %v7237_v32  ;;  %v7380_v32 = vcombine.low %v1045_v1, %v1053_v4  ;;  %v7061_v27 = vcombine.high %v725_v57, %v733_v58 }
 0x132   :  { %3817 = vmatpush1.bf16.msra.mxu0 %v6932_v13  ;;  %v709_v13 = vld [vmem:[#allocation8 + $0x488] sm:$0xff] }
 0x133   :  { %3854 = vmatpush1.bf16.msra.mxu1 %v7236_v2  ;;  %3818 = vmatprep.subr.bf16.mxu0 %v6917_v33  ;;  %v717_v2 = vld [vmem:[#allocation8 + $0x4c8] sm:$0xff]  ;;  %v7060_v33 = vcombine.low %v725_v57, %v733_v58 }
 0x134   :  { %3855 = vmatprep.subr.bf16.mxu1 %v7221_v51  ;;  %v7364_v51 = vcombine.low %v1029_v23, %v1037_v11  ;;  %v7045_v10 = vcombine.high %v709_v13, %v717_v2 }
 0x136   :  { %3819 = vmatpush1.bf16.msra.mxu0 %v6916_v41  ;;  %v693_v41 = vld [vmem:[#allocation8 + $0x408] sm:$0xff] }
 0x137   :  { %3856 = vmatpush1.bf16.msra.mxu1 %v7220_v50  ;;  %3820 = vmatprep.subr.bf16.mxu0 %v6901_v34  ;;  %v701_v50 = vld [vmem:[#allocation8 + $0x448] sm:$0xff]  ;;  %v7044_v34 = vcombine.low %v709_v13, %v717_v2 }
 0x138   :  { %3857 = vmatprep.subr.bf16.mxu1 %v7205_v6  ;;  %v7348_v6 = vcombine.low %v1013_v5, %v1021_v28  ;;  %v7029_v7 = vcombine.high %v693_v41, %v701_v50 }
 0x13a   :  { %3821 = vmatpush1.bf16.msra.mxu0 %v6900_v40  ;;  %v678_v40 = vld [vmem:[#allocation8 + $0x390] sm:$0xff] }
 0x13b   :  { %3858 = vmatpush1.bf16.msra.mxu1 %v7204_v60  ;;  %3822 = vmatprep.subr.bf16.mxu0 %v7141_v24  ;;  %v686_v60 = vld [vmem:[#allocation8 + $0x3d0] sm:$0xff]  ;;  %v7028_v24 = vcombine.low %v693_v41, %v701_v50 }
 0x13c   :  { %3859 = vmatprep.subr.bf16.mxu1 %v7189_v48  ;;  %v7332_v48 = vcombine.low %v997_v15, %v1005_v29  ;;  %v7015_v52 = vcombine.high %v678_v40, %v686_v60 }
 0x13e   :  { %3823 = vmatpush2.bf16.msra.mxu0 %v7140_v39  ;;  %v662_v39 = vld [vmem:[#allocation8 + $0x310] sm:$0xff] }
 0x13f   :  { %3860 = vmatpush1.bf16.msra.mxu1 %v7188_v42  ;;  %3824 = vmatprep.subr.bf16.mxu0 %v7125_v44  ;;  %v670_v42 = vld [vmem:[#allocation8 + $0x350] sm:$0xff]  ;;  %v7014_v44 = vcombine.low %v678_v40, %v686_v60 }
 0x140   :  { %3861 = vmatprep.subr.bf16.mxu1 %v7173_v35  ;;  %v7316_v35 = vcombine.low %v981_v55, %v989_v47  ;;  %v6999_v36 = vcombine.high %v662_v39, %v670_v42 }
 0x142   :  { %3825 = vmatpush2.bf16.msra.mxu0 %v7124_v0  ;;  %v646_v0 = vld [vmem:[#allocation8 + $0x290] sm:$0xff] }
 0x143   :  { %3862 = vmatpush1.bf16.msra.mxu1 %v7172_v61  ;;  %3826 = vmatprep.subr.bf16.mxu0 %v7109_v54  ;;  %v654_v61 = vld [vmem:[#allocation8 + $0x2d0] sm:$0xff]  ;;  %v957_v54 = vld [vmem:[#allocation8 + $0xc48] sm:$0xff] }
 0x144   :  { %3863 = vmatprep.subr.bf16.mxu1 %v7157_v3  ;;  %v6998_v3 = vcombine.low %v662_v39, %v670_v42  ;;  %v6983_v56 = vcombine.high %v646_v0, %v654_v61  ;;  %v7285_v59 = vcombine.high %v949_v18, %v957_v54  ;;  %v6982_v8 = vcombine.low %v646_v0, %v654_v61 }
 0x145   :  { %v7284_v26 = vcombine.low %v949_v18, %v957_v54 }
 0x146   :  { %3827 = vmatpush2.bf16.msra.mxu0 %v7108_v63  ;;  %v630_v63 = vld [vmem:[#allocation8 + $0x210] sm:$0xff] }
 0x147   :  { %3864 = vmatpush1.bf16.msra.mxu1 %v7156_v46  ;;  %3828 = vmatprep.subr.bf16.mxu0 %v7093_v49  ;;  %v638_v46 = vld [vmem:[#allocation8 + $0x250] sm:$0xff] }
 0x148   :  { %3865 = vmatprep.subr.bf16.mxu1 %v7397_v14  ;;  %v934_v49 = vld [vmem:[#allocation8 + $0xb90] sm:$0xff]  ;;  %v6967_v1 = vcombine.high %v630_v63, %v638_v46  ;;  %v6966_v57 = vcombine.low %v630_v63, %v638_v46 }
 0x149   :  { %v942_v14 = vld [vmem:[#allocation8 + $0xbd0] sm:$0xff] }
 0x14a   :  { %3829 = vmatpush2.bf16.msra.mxu0 %v7092_v17  ;;  %v7271_v4 = vcombine.high %v934_v49, %v942_v14  ;;  %v918_v17 = vld [vmem:[#allocation8 + $0xb10] sm:$0xff]  ;;  %v7270_v58 = vcombine.low %v934_v49, %v942_v14 }
 0x14b   :  { %3866 = vmatpush2.bf16.msra.mxu1 %v7396_v62  ;;  %3830 = vmatprep.subr.bf16.mxu0 %v7077_v22  ;;  %v926_v62 = vld [vmem:[#allocation8 + $0xb50] sm:$0xff] }
 0x14c   :  { %3867 = vmatprep.subr.bf16.mxu1 %v7381_v9  ;;  %v614_v22 = vld [vmem:[#allocation8 + $0x190] sm:$0xff]  ;;  %v7255_v23 = vcombine.high %v918_v17, %v926_v62  ;;  %v7254_v2 = vcombine.low %v918_v17, %v926_v62 }
 0x14d   :  { %v622_v9 = vld [vmem:[#allocation8 + $0x1d0] sm:$0xff] }
 0x14e   :  { %3831 = vmatpush2.bf16.msra.mxu0 %v7076_v12  ;;  %v6951_v11 = vcombine.high %v614_v22, %v622_v9  ;;  %v598_v12 = vld [vmem:[#allocation8 + $0x110] sm:$0xff]  ;;  %v6950_v13 = vcombine.low %v614_v22, %v622_v9 }
 0x14f   :  { %3868 = vmatpush2.bf16.msra.mxu1 %v7380_v32  ;;  %3832 = vmatprep.subr.bf16.mxu0 %v7061_v27  ;;  %v606_v32 = vld [vmem:[#allocation8 + $0x150] sm:$0xff] }
 0x150   :  { %3869 = vmatprep.subr.bf16.mxu1 %v7365_v37  ;;  %v902_v27 = vld [vmem:[#allocation8 + $0xa90] sm:$0xff]  ;;  %v6935_v5 = vcombine.high %v598_v12, %v606_v32  ;;  %v6934_v41 = vcombine.low %v598_v12, %v606_v32 }
 0x151   :  { %v910_v37 = vld [vmem:[#allocation8 + $0xad0] sm:$0xff] }
 0x152   :  { %3833 = vmatpush2.bf16.msra.mxu0 %v7060_v33  ;;  %v7239_v28 = vcombine.high %v902_v27, %v910_v37  ;;  %v582_v33 = vld [vmem:[#allocation8 + $0x90] sm:$0xff]  ;;  %v7238_v50 = vcombine.low %v902_v27, %v910_v37 }
 0x153   :  { %3870 = vmatpush2.bf16.msra.mxu1 %v7364_v51  ;;  %3834 = vmatprep.subr.bf16.mxu0 %v7045_v10  ;;  %v590_v51 = vld [vmem:[#allocation8 + $0xd0] sm:$0xff] }
 0x154   :  { %3871 = vmatprep.subr.bf16.mxu1 %v7349_v38  ;;  %v886_v10 = vld [vmem:[#allocation8 + $0xa10] sm:$0xff]  ;;  %v6919_v15 = vcombine.high %v582_v33, %v590_v51  ;;  %v6918_v40 = vcombine.low %v582_v33, %v590_v51 }
 0x155   :  { %v894_v38 = vld [vmem:[#allocation8 + $0xa50] sm:$0xff] }
 0x156   :  { %3835 = vmatpush2.bf16.msra.mxu0 %v7044_v34  ;;  %v7223_v29 = vcombine.high %v886_v10, %v894_v38  ;;  %v566_v34 = vld [vmem:[#allocation8 + $0x10] sm:$0xff]  ;;  %v7222_v60 = vcombine.low %v886_v10, %v894_v38 }
 0x157   :  { %3872 = vmatpush2.bf16.msra.mxu1 %v7348_v6  ;;  %3836 = vmatprep.subr.bf16.mxu0 %v7029_v7  ;;  %v574_v6 = vld [vmem:[#allocation8 + $0x50] sm:$0xff] }
 0x158   :  { %3873 = vmatprep.subr.bf16.mxu1 %v7333_v31  ;;  %v870_v7 = vld [vmem:[#allocation8 + $0x990] sm:$0xff]  ;;  %v6903_v55 = vcombine.high %v566_v34, %v574_v6  ;;  %v6902_v39 = vcombine.low %v566_v34, %v574_v6 }
 0x159   :  { %v878_v31 = vld [vmem:[#allocation8 + $0x9d0] sm:$0xff] }
 0x15a   :  { %3837 = vmatpush2.bf16.msra.mxu0 %v7028_v24  ;;  %v7207_v47 = vcombine.high %v870_v7, %v878_v31  ;;  %v806_v24 = vld [vmem:[#allocation8 + $0x790] sm:$0xff]  ;;  %v7206_v42 = vcombine.low %v870_v7, %v878_v31 }
 0x15b   :  { %3874 = vmatpush2.bf16.msra.mxu1 %v7332_v48  ;;  %3892 = vmatprep.subr.bf16.mxu0 %v7015_v52  ;;  %v814_v48 = vld [vmem:[#allocation8 + $0x7d0] sm:$0xff] }
 0x15c   :  { %3875 = vmatprep.subr.bf16.mxu1 %v7317_v19  ;;  %v854_v52 = vld [vmem:[#allocation8 + $0x910] sm:$0xff]  ;;  %v7143_v43 = vcombine.high %v806_v24, %v814_v48  ;;  %v7142_v0 = vcombine.low %v806_v24, %v814_v48 }
 0x15d   :  { %3839 = vmatmul.mubr.bf16.vlgmr.msra.gmra.mxu0 %v9031_v16  ;;  %v862_v19 = vld [vmem:[#allocation8 + $0x950] sm:$0xff] }
 0x15e   :  { %3893 = vmatpush1.bf16.msra.mxu0 %v7014_v44  ;;  %3924 = vmatprep.mubr.bf16.mxu0 %v9027_v25  ;;  %v7191_v45 = vcombine.high %v854_v52, %v862_v19  ;;  %v790_v44 = vld [vmem:[#allocation8 + $0x710] sm:$0xff]  ;;  %v7190_v61 = vcombine.low %v854_v52, %v862_v19 }
 0x15f   :  { %3876 = vmatpush2.bf16.msra.mxu1 %v7316_v35  ;;  %3894 = vmatprep.subr.bf16.mxu0 %v6999_v36  ;;  %v798_v35 = vld [vmem:[#allocation8 + $0x750] sm:$0xff] }
 0x160   :  { %3877 = vmatprep.subr.bf16.mxu1 %v7301_v20  ;;  %v838_v36 = vld [vmem:[#allocation8 + $0x890] sm:$0xff]  ;;  %v7127_v18 = vcombine.high %v790_v44, %v798_v35  ;;  %v7126_v63 = vcombine.low %v790_v44, %v798_v35 }
 0x161   :  { %v846_v20 = vld [vmem:[#allocation8 + $0x8d0] sm:$0xff] }
 0x162   :  { %3895 = vmatpush1.bf16.msra.mxu0 %v6998_v3  ;;  %v7175_v54 = vcombine.high %v838_v36, %v846_v20  ;;  %v774_v3 = vld [vmem:[#allocation8 + $0x690] sm:$0xff]  ;;  %v7174_v46 = vcombine.low %v838_v36, %v846_v20 }
 0x163   :  { %3878 = vmatpush2.bf16.msra.mxu1 %v7300_v21  ;;  %3896 = vmatprep.subr.bf16.mxu0 %v6983_v56  ;;  %v782_v21 = vld [vmem:[#allocation8 + $0x6d0] sm:$0xff] }
 0x164   :  { %3879 = vmatprep.subr.bf16.mxu1 %v7285_v59  ;;  %v822_v56 = vld [vmem:[#allocation8 + $0x810] sm:$0xff]  ;;  %v7111_v49 = vcombine.high %v774_v3, %v782_v21  ;;  %v7110_v17 = vcombine.low %v774_v3, %v782_v21 }
 0x165   :  { %v830_v59 = vld [vmem:[#allocation8 + $0x850] sm:$0xff] }
 0x166   :  { %3897 = vmatpush1.bf16.msra.mxu0 %v6982_v8  ;;  %v7159_v14 = vcombine.high %v822_v56, %v830_v59  ;;  %v758_v8 = vld [vmem:[#allocation8 + $0x610] sm:$0xff]  ;;  %v7158_v62 = vcombine.low %v822_v56, %v830_v59 }
 0x167   :  { %3880 = vmatpush2.bf16.msra.mxu1 %v7284_v26  ;;  %3898 = vmatprep.subr.bf16.mxu0 %v6967_v1  ;;  %v766_v26 = vld [vmem:[#allocation8 + $0x650] sm:$0xff] }
 0x168   :  { %3935 = vmatprep.subr.bf16.mxu1 %v7271_v4  ;;  %v1062_v1 = vld [vmem:[#allocation8 + $0xf90] sm:$0xff]  ;;  %v7095_v22 = vcombine.high %v758_v8, %v766_v26  ;;  %v7094_v12 = vcombine.low %v758_v8, %v766_v26 }
 0x169   :  { %v1070_v4 = vld [vmem:[#allocation8 + $0xfd0] sm:$0xff] }
 0x16a   :  { %3882 = vmatmul.mubr.bf16.vlgmr.msra.gmra.mxu1 %v9043_v30  ;;  %3899 = vmatpush1.bf16.msra.mxu0 %v6966_v57  ;;  %v7399_v9 = vcombine.high %v1062_v1, %v1070_v4  ;;  %v742_v57 = vld [vmem:[#allocation8 + $0x590] sm:$0xff]  ;;  %v7398_v32 = vcombine.low %v1062_v1, %v1070_v4 }
 0x16b   :  { %3936 = vmatpush1.bf16.msra.mxu1 %v7270_v58  ;;  %3967 = vmatprep.mubr.bf16.mxu1 %v9040_v53  ;;  %v750_v58 = vld [vmem:[#allocation8 + $0x5d0] sm:$0xff] }
 0x16c   :  { %3937 = vmatprep.subr.bf16.mxu1 %v7255_v23  ;;  %3900 = vmatprep.subr.bf16.mxu0 %v6951_v11  ;;  %v1046_v23 = vld [vmem:[#allocation8 + $0xf10] sm:$0xff]  ;;  %v7079_v27 = vcombine.high %v742_v57, %v750_v58  ;;  %v7078_v33 = vcombine.low %v742_v57, %v750_v58 }
 0x16d   :  { %v1054_v11 = vld [vmem:[#allocation8 + $0xf50] sm:$0xff] }
 0x16e   :  { %3901 = vmatpush1.bf16.msra.mxu0 %v6950_v13  ;;  %v7383_v37 = vcombine.high %v1046_v23, %v1054_v11  ;;  %v726_v13 = vld [vmem:[#allocation8 + $0x510] sm:$0xff]  ;;  %v7382_v51 = vcombine.low %v1046_v23, %v1054_v11 }
 0x16f   :  { %3938 = vmatpush1.bf16.msra.mxu1 %v7254_v2  ;;  %3902 = vmatprep.subr.bf16.mxu0 %v6935_v5  ;;  %v734_v2 = vld [vmem:[#allocation8 + $0x550] sm:$0xff] }
 0x170   :  { %3939 = vmatprep.subr.bf16.mxu1 %v7239_v28  ;;  %v1030_v5 = vld [vmem:[#allocation8 + $0xe90] sm:$0xff]  ;;  %v7063_v10 = vcombine.high %v726_v13, %v734_v2  ;;  %v7062_v34 = vcombine.low %v726_v13, %v734_v2 }
 0x171   :  { %v1038_v28 = vld [vmem:[#allocation8 + $0xed0] sm:$0xff] }
 0x172   :  { %3903 = vmatpush1.bf16.msra.mxu0 %v6934_v41  ;;  %v7367_v38 = vcombine.high %v1030_v5, %v1038_v28  ;;  %v710_v41 = vld [vmem:[#allocation8 + $0x490] sm:$0xff]  ;;  %v7366_v6 = vcombine.low %v1030_v5, %v1038_v28 }
 0x173   :  { %3940 = vmatpush1.bf16.msra.mxu1 %v7238_v50  ;;  %3904 = vmatprep.subr.bf16.mxu0 %v6919_v15  ;;  %v718_v50 = vld [vmem:[#allocation8 + $0x4d0] sm:$0xff] }
 0x174   :  { %3941 = vmatprep.subr.bf16.mxu1 %v7223_v29  ;;  %v1014_v15 = vld [vmem:[#allocation8 + $0xe10] sm:$0xff]  ;;  %v7047_v7 = vcombine.high %v710_v41, %v718_v50  ;;  %v7046_v24 = vcombine.low %v710_v41, %v718_v50 }
 0x175   :  { %v1022_v29 = vld [vmem:[#allocation8 + $0xe50] sm:$0xff] }
 0x176   :  { %3905 = vmatpush1.bf16.msra.mxu0 %v6918_v40  ;;  %v7351_v31 = vcombine.high %v1014_v15, %v1022_v29  ;;  %v694_v40 = vld [vmem:[#allocation8 + $0x410] sm:$0xff]  ;;  %v7350_v48 = vcombine.low %v1014_v15, %v1022_v29 }
 0x177   :  { %3942 = vmatpush1.bf16.msra.mxu1 %v7222_v60  ;;  %3906 = vmatprep.subr.bf16.mxu0 %v6903_v55  ;;  %v702_v60 = vld [vmem:[#allocation8 + $0x450] sm:$0xff] }
 0x178   :  { %3943 = vmatprep.subr.bf16.mxu1 %v7207_v47  ;;  %v998_v55 = vld [vmem:[#allocation8 + $0xd90] sm:$0xff]  ;;  %v7031_v52 = vcombine.high %v694_v40, %v702_v60  ;;  %v7030_v44 = vcombine.low %v694_v40, %v702_v60 }
 0x179   :  { %v1006_v47 = vld [vmem:[#allocation8 + $0xdd0] sm:$0xff] }
 0x17a   :  { %3907 = vmatpush1.bf16.msra.mxu0 %v6902_v39  ;;  %v7335_v19 = vcombine.high %v998_v55, %v1006_v47  ;;  %v679_v39 = vld [vmem:[#allocation8 + $0x398] sm:$0xff]  ;;  %v7334_v35 = vcombine.low %v998_v55, %v1006_v47 }
 0x17b   :  { %3944 = vmatpush1.bf16.msra.mxu1 %v7206_v42  ;;  %3908 = vmatprep.subr.bf16.mxu0 %v7143_v43  ;;  %v687_v42 = vld [vmem:[#allocation8 + $0x3d8] sm:$0xff]  ;;  %v982_v43 = vld [vmem:[#allocation8 + $0xd10] sm:$0xff] }
 0x17c   :  { %3945 = vmatprep.subr.bf16.mxu1 %v7191_v45  ;;  %v990_v45 = vld [vmem:[#allocation8 + $0xd50] sm:$0xff]  ;;  %v7017_v36 = vcombine.high %v679_v39, %v687_v42  ;;  %v7016_v3 = vcombine.low %v679_v39, %v687_v42 }
 0x17d   :  { %v7319_v20 = vcombine.high %v982_v43, %v990_v45  ;;  %v7318_v21 = vcombine.low %v982_v43, %v990_v45 }
 0x17e   :  { %3909 = vmatpush2.bf16.msra.mxu0 %v7142_v0  ;;  %v663_v0 = vld [vmem:[#allocation8 + $0x318] sm:$0xff] }
 0x17f   :  { %3946 = vmatpush1.bf16.msra.mxu1 %v7190_v61  ;;  %3910 = vmatprep.subr.bf16.mxu0 %v7127_v18  ;;  %v671_v61 = vld [vmem:[#allocation8 + $0x358] sm:$0xff]  ;;  %v966_v18 = vld [vmem:[#allocation8 + $0xc90] sm:$0xff] }
 0x180   :  { %3947 = vmatprep.subr.bf16.mxu1 %v7175_v54  ;;  %v974_v54 = vld [vmem:[#allocation8 + $0xcd0] sm:$0xff]  ;;  %v7001_v56 = vcombine.high %v663_v0, %v671_v61  ;;  %v7000_v8 = vcombine.low %v663_v0, %v671_v61 }
 0x181   :  { %v7303_v59 = vcombine.high %v966_v18, %v974_v54  ;;  %v7302_v26 = vcombine.low %v966_v18, %v974_v54 }
 0x182   :  { %3911 = vmatpush2.bf16.msra.mxu0 %v7126_v63  ;;  %v647_v63 = vld [vmem:[#allocation8 + $0x298] sm:$0xff] }
 0x183   :  { %3948 = vmatpush1.bf16.msra.mxu1 %v7174_v46  ;;  %3912 = vmatprep.subr.bf16.mxu0 %v7111_v49  ;;  %v655_v46 = vld [vmem:[#allocation8 + $0x2d8] sm:$0xff]  ;;  %v950_v49 = vld [vmem:[#allocation8 + $0xc10] sm:$0xff] }
 0x184   :  { %3949 = vmatprep.subr.bf16.mxu1 %v7159_v14  ;;  %v958_v14 = vld [vmem:[#allocation8 + $0xc50] sm:$0xff]  ;;  %v6985_v1 = vcombine.high %v647_v63, %v655_v46  ;;  %v6984_v57 = vcombine.low %v647_v63, %v655_v46 }
 0x185   :  { %v7287_v4 = vcombine.high %v950_v49, %v958_v14  ;;  %v7286_v58 = vcombine.low %v950_v49, %v958_v14 }
 0x186   :  { %3913 = vmatpush2.bf16.msra.mxu0 %v7110_v17  ;;  %v631_v17 = vld [vmem:[#allocation8 + $0x218] sm:$0xff] }
 0x187   :  { %3950 = vmatpush1.bf16.msra.mxu1 %v7158_v62  ;;  %3914 = vmatprep.subr.bf16.mxu0 %v7095_v22  ;;  %v639_v62 = vld [vmem:[#allocation8 + $0x258] sm:$0xff] }
 0x188   :  { %3951 = vmatprep.subr.bf16.mxu1 %v7399_v9  ;;  %v935_v22 = vld [vmem:[#allocation8 + $0xb98] sm:$0xff]  ;;  %v6969_v23 = vcombine.high %v631_v17, %v639_v62  ;;  %v6968_v13 = vcombine.low %v631_v17, %v639_v62 }
 0x189   :  { %v943_v9 = vld [vmem:[#allocation8 + $0xbd8] sm:$0xff] }
 0x18a   :  { %3915 = vmatpush2.bf16.msra.mxu0 %v7094_v12  ;;  %v7273_v11 = vcombine.high %v935_v22, %v943_v9  ;;  %v919_v12 = vld [vmem:[#allocation8 + $0xb18] sm:$0xff]  ;;  %v7272_v2 = vcombine.low %v935_v22, %v943_v9 }
 0x18b   :  { %3952 = vmatpush2.bf16.msra.mxu1 %v7398_v32  ;;  %3916 = vmatprep.subr.bf16.mxu0 %v7079_v27  ;;  %v927_v32 = vld [vmem:[#allocation8 + $0xb58] sm:$0xff] }
 0x18c   :  { %3953 = vmatprep.subr.bf16.mxu1 %v7383_v37  ;;  %v615_v27 = vld [vmem:[#allocation8 + $0x198] sm:$0xff]  ;;  %v7257_v5 = vcombine.high %v919_v12, %v927_v32  ;;  %v7256_v50 = vcombine.low %v919_v12, %v927_v32 }
 0x18d   :  { %v623_v37 = vld [vmem:[#allocation8 + $0x1d8] sm:$0xff] }
 0x18e   :  { %3917 = vmatpush2.bf16.msra.mxu0 %v7078_v33  ;;  %v6953_v28 = vcombine.high %v615_v27, %v623_v37  ;;  %v599_v33 = vld [vmem:[#allocation8 + $0x118] sm:$0xff]  ;;  %v6952_v41 = vcombine.low %v615_v27, %v623_v37 }
 0x18f   :  { %3954 = vmatpush2.bf16.msra.mxu1 %v7382_v51  ;;  %3918 = vmatprep.subr.bf16.mxu0 %v7063_v10  ;;  %v607_v51 = vld [vmem:[#allocation8 + $0x158] sm:$0xff] }
 0x190   :  { %3955 = vmatprep.subr.bf16.mxu1 %v7367_v38  ;;  %v903_v10 = vld [vmem:[#allocation8 + $0xa98] sm:$0xff]  ;;  %v6937_v15 = vcombine.high %v599_v33, %v607_v51  ;;  %v6936_v40 = vcombine.low %v599_v33, %v607_v51 }
 0x191   :  { %v911_v38 = vld [vmem:[#allocation8 + $0xad8] sm:$0xff] }
 0x192   :  { %3919 = vmatpush2.bf16.msra.mxu0 %v7062_v34  ;;  %v7241_v29 = vcombine.high %v903_v10, %v911_v38  ;;  %v583_v34 = vld [vmem:[#allocation8 + $0x98] sm:$0xff]  ;;  %v7240_v60 = vcombine.low %v903_v10, %v911_v38 }
 0x193   :  { %3956 = vmatpush2.bf16.msra.mxu1 %v7366_v6  ;;  %3920 = vmatprep.subr.bf16.mxu0 %v7047_v7  ;;  %v591_v6 = vld [vmem:[#allocation8 + $0xd8] sm:$0xff] }
 0x194   :  { %3957 = vmatprep.subr.bf16.mxu1 %v7351_v31  ;;  %v887_v7 = vld [vmem:[#allocation8 + $0xa18] sm:$0xff]  ;;  %v6921_v55 = vcombine.high %v583_v34, %v591_v6  ;;  %v6920_v39 = vcombine.low %v583_v34, %v591_v6 }
 0x195   :  { %v895_v31 = vld [vmem:[#allocation8 + $0xa58] sm:$0xff] }
 0x196   :  { %3921 = vmatpush2.bf16.msra.mxu0 %v7046_v24  ;;  %v7225_v47 = vcombine.high %v887_v7, %v895_v31  ;;  %v567_v24 = vld [vmem:[#allocation8 + $0x18] sm:$0xff]  ;;  %v7224_v42 = vcombine.low %v887_v7, %v895_v31 }
 0x197   :  { %3958 = vmatpush2.bf16.msra.mxu1 %v7350_v48  ;;  %3922 = vmatprep.subr.bf16.mxu0 %v7031_v52  ;;  %v575_v48 = vld [vmem:[#allocation8 + $0x58] sm:$0xff] }
 0x198   :  { %3959 = vmatprep.subr.bf16.mxu1 %v7335_v19  ;;  %v871_v52 = vld [vmem:[#allocation8 + $0x998] sm:$0xff]  ;;  %v6905_v43 = vcombine.high %v567_v24, %v575_v48  ;;  %v6904_v0 = vcombine.low %v567_v24, %v575_v48 }
 0x199   :  { %v879_v19 = vld [vmem:[#allocation8 + $0x9d8] sm:$0xff] }
 0x19a   :  { %3923 = vmatpush2.bf16.msra.mxu0 %v7030_v44  ;;  %v7209_v45 = vcombine.high %v871_v52, %v879_v19  ;;  %v807_v44 = vld [vmem:[#allocation8 + $0x798] sm:$0xff]  ;;  %v7208_v61 = vcombine.low %v871_v52, %v879_v19 }
 0x19b   :  { %3960 = vmatpush2.bf16.msra.mxu1 %v7334_v35  ;;  %3978 = vmatprep.subr.bf16.mxu0 %v7017_v36  ;;  %v815_v35 = vld [vmem:[#allocation8 + $0x7d8] sm:$0xff] }
 0x19c   :  { %3961 = vmatprep.subr.bf16.mxu1 %v7319_v20  ;;  %v855_v36 = vld [vmem:[#allocation8 + $0x918] sm:$0xff]  ;;  %v7145_v18 = vcombine.high %v807_v44, %v815_v35  ;;  %v7144_v63 = vcombine.low %v807_v44, %v815_v35 }
 0x19d   :  { %3925 = vmatmul.mubr.bf16.vlgmr.msra.gmra.mxu0 %v9031_v16  ;;  %v863_v20 = vld [vmem:[#allocation8 + $0x958] sm:$0xff] }
 0x19e   :  { %3979 = vmatpush1.bf16.msra.mxu0 %v7016_v3  ;;  %4010 = vmatprep.mubr.bf16.mxu0 %v9027_v25  ;;  %v7193_v54 = vcombine.high %v855_v36, %v863_v20  ;;  %v791_v3 = vld [vmem:[#allocation8 + $0x718] sm:$0xff]  ;;  %v7192_v46 = vcombine.low %v855_v36, %v863_v20 }
 0x19f   :  { %3962 = vmatpush2.bf16.msra.mxu1 %v7318_v21  ;;  %3980 = vmatprep.subr.bf16.mxu0 %v7001_v56  ;;  %v799_v21 = vld [vmem:[#allocation8 + $0x758] sm:$0xff] }
 0x1a0   :  { %3963 = vmatprep.subr.bf16.mxu1 %v7303_v59  ;;  %v839_v56 = vld [vmem:[#allocation8 + $0x898] sm:$0xff]  ;;  %v7129_v49 = vcombine.high %v791_v3, %v799_v21  ;;  %v7128_v17 = vcombine.low %v791_v3, %v799_v21 }
 0x1a1   :  { %v847_v59 = vld [vmem:[#allocation8 + $0x8d8] sm:$0xff] }
 0x1a2   :  { %3981 = vmatpush1.bf16.msra.mxu0 %v7000_v8  ;;  %v7177_v14 = vcombine.high %v839_v56, %v847_v59  ;;  %v775_v8 = vld [vmem:[#allocation8 + $0x698] sm:$0xff]  ;;  %v7176_v62 = vcombine.low %v839_v56, %v847_v59 }
 0x1a3   :  { %3964 = vmatpush2.bf16.msra.mxu1 %v7302_v26  ;;  %3982 = vmatprep.subr.bf16.mxu0 %v6985_v1  ;;  %v783_v26 = vld [vmem:[#allocation8 + $0x6d8] sm:$0xff] }
 0x1a4   :  { %3965 = vmatprep.subr.bf16.mxu1 %v7287_v4  ;;  %v823_v1 = vld [vmem:[#allocation8 + $0x818] sm:$0xff]  ;;  %v7113_v22 = vcombine.high %v775_v8, %v783_v26  ;;  %v7112_v12 = vcombine.low %v775_v8, %v783_v26  ;;  %v1080_v8 = vlaneseq }
 0x1a5   :  { %v831_v4 = vld [vmem:[#allocation8 + $0x858] sm:$0xff] }
 0x1a6   :  { %3983 = vmatpush1.bf16.msra.mxu0 %v6984_v57  ;;  %v7161_v9 = vcombine.high %v823_v1, %v831_v4  ;;  %v759_v57 = vld [vmem:[#allocation8 + $0x618] sm:$0xff]  ;;  %v7160_v32 = vcombine.low %v823_v1, %v831_v4 }
 0x1a7   :  { %3966 = vmatpush2.bf16.msra.mxu1 %v7286_v58  ;;  %3984 = vmatprep.subr.bf16.mxu0 %v6969_v23  ;;  %v767_v58 = vld [vmem:[#allocation8 + $0x658] sm:$0xff] }
 0x1a8   :  { %4021 = vmatprep.subr.bf16.mxu1 %v7273_v11  ;;  %v1063_v23 = vld [vmem:[#allocation8 + $0xf98] sm:$0xff]  ;;  %v7097_v27 = vcombine.high %v759_v57, %v767_v58  ;;  %v7096_v33 = vcombine.low %v759_v57, %v767_v58 }
 0x1a9   :  { %v1071_v11 = vld [vmem:[#allocation8 + $0xfd8] sm:$0xff] }
 0x1aa   :  { %3968 = vmatmul.mubr.bf16.vlgmr.msra.gmra.mxu1 %v9043_v30  ;;  %3985 = vmatpush1.bf16.msra.mxu0 %v6968_v13  ;;  %v7401_v37 = vcombine.high %v1063_v23, %v1071_v11  ;;  %v743_v13 = vld [vmem:[#allocation8 + $0x598] sm:$0xff]  ;;  %v7400_v51 = vcombine.low %v1063_v23, %v1071_v11 }
 0x1ab   :  { %4022 = vmatpush1.bf16.msra.mxu1 %v7272_v2  ;;  %4053 = vmatprep.mubr.bf16.mxu1 %v9040_v53  ;;  %v751_v2 = vld [vmem:[#allocation8 + $0x5d8] sm:$0xff] }
 0x1ac   :  { %4023 = vmatprep.subr.bf16.mxu1 %v7257_v5  ;;  %3986 = vmatprep.subr.bf16.mxu0 %v6953_v28  ;;  %v1047_v5 = vld [vmem:[#allocation8 + $0xf18] sm:$0xff]  ;;  %v7081_v10 = vcombine.high %v743_v13, %v751_v2  ;;  %v7080_v34 = vcombine.low %v743_v13, %v751_v2  ;;  %v936_v2 = vld [vmem:[#allocation8 + $0xba0] sm:$0xff] }
 0x1ad   :  { %v1055_v28 = vld [vmem:[#allocation8 + $0xf58] sm:$0xff] }
 0x1ae   :  { %3987 = vmatpush1.bf16.msra.mxu0 %v6952_v41  ;;  %v7385_v38 = vcombine.high %v1047_v5, %v1055_v28  ;;  %v727_v41 = vld [vmem:[#allocation8 + $0x518] sm:$0xff]  ;;  %v7384_v6 = vcombine.low %v1047_v5, %v1055_v28  ;;  %v944_v5 = vld [vmem:[#allocation8 + $0xbe0] sm:$0xff] }
 0x1af   :  { %4024 = vmatpush1.bf16.msra.mxu1 %v7256_v50  ;;  %3988 = vmatprep.subr.bf16.mxu0 %v6937_v15  ;;  %v735_v50 = vld [vmem:[#allocation8 + $0x558] sm:$0xff]  ;;  %v9065_v28 = vld [vmem:[#allocation9] sm:$0xff] }
 0x1b0   :  { %4025 = vmatprep.subr.bf16.mxu1 %v7241_v29  ;;  %v1031_v15 = vld [vmem:[#allocation8 + $0xe98] sm:$0xff]  ;;  %v7065_v7 = vcombine.high %v727_v41, %v735_v50  ;;  %v7064_v24 = vcombine.low %v727_v41, %v735_v50  ;;  %v7275_v41 = vcombine.high %v936_v2, %v944_v5  ;;  %v920_v50 = vld [vmem:[#allocation8 + $0xb20] sm:$0xff] }
 0x1b1   :  { %v1039_v29 = vld [vmem:[#allocation8 + $0xed8] sm:$0xff] }
 0x1b2   :  { %3989 = vmatpush1.bf16.msra.mxu0 %v6936_v40  ;;  %v7369_v31 = vcombine.high %v1031_v15, %v1039_v29  ;;  %v711_v40 = vld [vmem:[#allocation8 + $0x498] sm:$0xff]  ;;  %v7368_v48 = vcombine.low %v1031_v15, %v1039_v29  ;;  %v928_v29 = vld [vmem:[#allocation8 + $0xb60] sm:$0xff] }
 0x1b3   :  { %4026 = vmatpush1.bf16.msra.mxu1 %v7240_v60  ;;  %3990 = vmatprep.subr.bf16.mxu0 %v6921_v55  ;;  %v719_v60 = vld [vmem:[#allocation8 + $0x4d8] sm:$0xff] }
 0x1b4   :  { %4027 = vmatprep.subr.bf16.mxu1 %v7225_v47  ;;  %v1015_v55 = vld [vmem:[#allocation8 + $0xe18] sm:$0xff]  ;;  %v7049_v52 = vcombine.high %v711_v40, %v719_v60  ;;  %v7048_v44 = vcombine.low %v711_v40, %v719_v60  ;;  %v7274_v40 = vcombine.low %v936_v2, %v944_v5  ;;  %v7259_v60 = vcombine.high %v920_v50, %v928_v29  ;;  %v864_v2 = vld [vmem:[#allocation8 + $0x960] sm:$0xff] }
 0x1b5   :  { %v1023_v47 = vld [vmem:[#allocation8 + $0xe58] sm:$0xff] }
 0x1b6   :  { %3991 = vmatpush1.bf16.msra.mxu0 %v6920_v39  ;;  %v7353_v19 = vcombine.high %v1015_v55, %v1023_v47  ;;  %v695_v39 = vld [vmem:[#allocation8 + $0x418] sm:$0xff]  ;;  %v7352_v35 = vcombine.low %v1015_v55, %v1023_v47  ;;  %v600_v47 = vld [vmem:[#allocation8 + $0x120] sm:$0xff] }
 0x1b7   :  { %4028 = vmatpush1.bf16.msra.mxu1 %v7224_v42  ;;  %3992 = vmatprep.subr.bf16.mxu0 %v6905_v43  ;;  %v703_v42 = vld [vmem:[#allocation8 + $0x458] sm:$0xff] }
 0x1b8   :  { %4029 = vmatprep.subr.bf16.mxu1 %v7209_v45  ;;  %v999_v43 = vld [vmem:[#allocation8 + $0xd98] sm:$0xff]  ;;  %v7033_v36 = vcombine.high %v695_v39, %v703_v42  ;;  %v7032_v3 = vcombine.low %v695_v39, %v703_v42 }
 0x1b9   :  { %v1007_v45 = vld [vmem:[#allocation8 + $0xdd8] sm:$0xff] }
 0x1ba   :  { %3993 = vmatpush1.bf16.msra.mxu0 %v6904_v0  ;;  %v7337_v20 = vcombine.high %v999_v43, %v1007_v45  ;;  %v680_v0 = vld [vmem:[#allocation8 + $0x3a0] sm:$0xff]  ;;  %v7336_v21 = vcombine.low %v999_v43, %v1007_v45  ;;  %v951_v57 = vld [vmem:[#allocation8 + $0xc18] sm:$0xff] }
 0x1bb   :  { %4030 = vmatpush1.bf16.msra.mxu1 %v7208_v61  ;;  %3994 = vmatprep.subr.bf16.mxu0 %v7145_v18  ;;  %v688_v61 = vld [vmem:[#allocation8 + $0x3e0] sm:$0xff]  ;;  %v983_v18 = vld [vmem:[#allocation8 + $0xd18] sm:$0xff] }
 0x1bc   :  { %4031 = vmatprep.subr.bf16.mxu1 %v7193_v54  ;;  %v991_v54 = vld [vmem:[#allocation8 + $0xd58] sm:$0xff]  ;;  %v7019_v56 = vcombine.high %v680_v0, %v688_v61  ;;  %v7018_v26 = vcombine.low %v680_v0, %v688_v61  ;;  %v584_v0 = vld [vmem:[#allocation8 + $0xa0] sm:$0xff] }
 0x1bd   :  { %v7321_v59 = vcombine.high %v983_v18, %v991_v54  ;;  %v7320_v1 = vcombine.low %v983_v18, %v991_v54  ;;  %v959_v58 = vld [vmem:[#allocation8 + $0xc58] sm:$0xff]  ;;  %v592_v61 = vld [vmem:[#allocation8 + $0xe0] sm:$0xff] }
 0x1be   :  { %3995 = vmatpush2.bf16.msra.mxu0 %v7144_v63  ;;  %v664_v63 = vld [vmem:[#allocation8 + $0x320] sm:$0xff] }
 0x1bf   :  { %4032 = vmatpush1.bf16.msra.mxu1 %v7192_v46  ;;  %3996 = vmatprep.subr.bf16.mxu0 %v7129_v49  ;;  %v672_v46 = vld [vmem:[#allocation8 + $0x360] sm:$0xff]  ;;  %v967_v49 = vld [vmem:[#allocation8 + $0xc98] sm:$0xff] }
 0x1c0   :  { %4033 = vmatprep.subr.bf16.mxu1 %v7177_v14  ;;  %v975_v14 = vld [vmem:[#allocation8 + $0xcd8] sm:$0xff]  ;;  %v7003_v4 = vcombine.high %v664_v63, %v672_v46  ;;  %v7002_v23 = vcombine.low %v664_v63, %v672_v46  ;;  %v888_v54 = vld [vmem:[#allocation8 + $0xa20] sm:$0xff] }
 0x1c1   :  { %v7304_v11 = vcombine.low %v967_v49, %v975_v14 }
 0x1c2   :  { %3997 = vmatpush2.bf16.msra.mxu0 %v7128_v17  ;;  %v7305_v17 = vcombine.high %v967_v49, %v975_v14  ;;  %v6923_v49 = vcombine.high %v584_v0, %v592_v61 }
 0x1c3   :  { %4034 = vmatpush1.bf16.msra.mxu1 %v7176_v62  ;;  %3998 = vmatprep.subr.bf16.mxu0 %v7113_v22  ;;  %v648_v62 = vld [vmem:[#allocation8 + $0x2a0] sm:$0xff] }
 0x1c4   :  { %4035 = vmatprep.subr.bf16.mxu1 %v7161_v9  ;;  %v656_v22 = vld [vmem:[#allocation8 + $0x2e0] sm:$0xff]  ;;  %v9059_v9 = vshrl.u32 %v1080_v8, 7 }
 0x1c5   :  { %v568_v8 = vld [vmem:[#allocation8 + $0x20] sm:$0xff] }
 0x1c6   :  { %3999 = vmatpush2.bf16.msra.mxu0 %v7112_v12  ;;  %v6987_v12 = vcombine.high %v648_v62, %v656_v22  ;;  %v9063_v13 = vsub.s32 0, %v9059_v9 }
 0x1c7   :  { %4036 = vmatpush1.bf16.msra.mxu1 %v7160_v32  ;;  %4000 = vmatprep.subr.bf16.mxu0 %v7097_v27  ;;  %v7289_v32 = vcombine.high %v951_v57, %v959_v58  ;;  %v632_v27 = vld [vmem:[#allocation8 + $0x220] sm:$0xff] }
 0x1c8   :  { %4037 = vmatprep.subr.bf16.mxu1 %v7401_v37  ;;  %v640_v37 = vld [vmem:[#allocation8 + $0x260] sm:$0xff]  ;;  %v1083_v15 = vrot.slane %v9065_v28, %v9063_v13 }
 0x1ca   :  { %4001 = vmatpush2.bf16.msra.mxu0 %v7096_v33 }
 0x1cb   :  { %4038 = vmatpush2.bf16.msra.mxu1 %v7400_v51  ;;  %4002 = vmatprep.subr.bf16.mxu0 %v7081_v10  ;;  %v6986_v51 = vcombine.low %v648_v62, %v656_v22  ;;  %v7288_v10 = vcombine.low %v951_v57, %v959_v58  ;;  %v6922_v22 = vcombine.low %v584_v0, %v592_v61  ;;  %v744_v61 = vld [vmem:[#allocation8 + $0x5a0] sm:$0xff] }
 0x1cc   :  { %4039 = vmatprep.subr.bf16.mxu1 %v7385_v38  ;;  %v6971_v38 = vcombine.high %v632_v27, %v640_v37 }
 0x1ce   :  { %4003 = vmatpush2.bf16.msra.mxu0 %v7080_v34  ;;  %v616_v34 = vld [vmem:[#allocation8 + $0x1a0] sm:$0xff] }
 0x1cf   :  { %4040 = vmatpush2.bf16.msra.mxu1 %v7384_v6  ;;  %4004 = vmatprep.subr.bf16.mxu0 %v7065_v7  ;;  %v624_v6 = vld [vmem:[#allocation8 + $0x1e0] sm:$0xff] }
 0x1d0   :  { %4041 = vmatprep.subr.bf16.mxu1 %v7369_v31  ;;  %v6970_v31 = vcombine.low %v632_v27, %v640_v37  ;;  %v6955_v55 = vcombine.high %v616_v34, %v624_v6  ;;  %v6954_v43 = vcombine.low %v616_v34, %v624_v6  ;;  %v816_v27 = vld [vmem:[#allocation8 + $0x7e0] sm:$0xff] }
 0x1d1   :  { %v856_v37 = vld [vmem:[#allocation8 + $0x920] sm:$0xff] }
 0x1d2   :  { %4005 = vmatpush2.bf16.msra.mxu0 %v7064_v24  ;;  %v608_v24 = vld [vmem:[#allocation8 + $0x160] sm:$0xff]  ;;  %v7194_v34 = vcombine.low %v856_v37, %v864_v2 }
 0x1d3   :  { %4042 = vmatpush2.bf16.msra.mxu1 %v7368_v48  ;;  %4006 = vmatprep.subr.bf16.mxu0 %v7049_v52  ;;  %v904_v52 = vld [vmem:[#allocation8 + $0xaa0] sm:$0xff] }
 0x1d4   :  { %4043 = vmatprep.subr.bf16.mxu1 %v7353_v19  ;;  %v912_v19 = vld [vmem:[#allocation8 + $0xae0] sm:$0xff] }
 0x1d5   :  { %v7242_v46 = vcombine.low %v904_v52, %v912_v19 }
 0x1d6   :  { %4007 = vmatpush2.bf16.msra.mxu0 %v7048_v44  ;;  %v7258_v44 = vcombine.low %v920_v50, %v928_v29  ;;  %v840_v50 = vld [vmem:[#allocation8 + $0x8a0] sm:$0xff] }
 0x1d7   :  { %4044 = vmatpush2.bf16.msra.mxu1 %v7352_v35  ;;  %4008 = vmatprep.subr.bf16.mxu0 %v7033_v36  ;;  %v6939_v35 = vcombine.high %v600_v47, %v608_v24 }
 0x1d8   :  { %4045 = vmatprep.subr.bf16.mxu1 %v7337_v20  ;;  %v7243_v20 = vcombine.high %v904_v52, %v912_v19 }
 0x1da   :  { %4009 = vmatpush2.bf16.msra.mxu0 %v7032_v3  ;;  %v896_v3 = vld [vmem:[#allocation8 + $0xa60] sm:$0xff] }
 0x1db   :  { %4046 = vmatpush2.bf16.msra.mxu1 %v7336_v21  ;;  %4064 = vmatprep.subr.bf16.mxu0 %v7019_v56  ;;  %v6938_v56 = vcombine.low %v600_v47, %v608_v24  ;;  %v7227_v14 = vcombine.high %v888_v54, %v896_v3  ;;  %v7226_v62 = vcombine.low %v888_v54, %v896_v3  ;;  %v832_v47 = vld [vmem:[#allocation8 + $0x860] sm:$0xff] }
 0x1dc   :  { %4047 = vmatprep.subr.bf16.mxu1 %v7321_v59  ;;  %v1048_v54 = vld [vmem:[#allocation8 + $0xf20] sm:$0xff] }
 0x1dd   :  { %4011 = vmatmul.mubr.bf16.vlgmr.msra.gmra.mxu0 %v9031_v16  ;;  %v3754_v33 = vpop.f32.mrf.mxu0  ;;  %v1056_v3 = vld [vmem:[#allocation8 + $0xf60] sm:$0xff] }
 0x1de   :  { %4065 = vmatpush1.bf16.msra.mxu0 %v7018_v26  ;;  %4096 = vmatprep.mubr.bf16.mxu0 %v9027_v25  ;;  %v3755_v48 = vadd.f32 %v3754_v33, %v1083_v15  ;;  %v576_v26 = vld [vmem:[#allocation8 + $0x60] sm:$0xff] }
 0x1df   :  { %4048 = vmatpush2.bf16.msra.mxu1 %v7320_v1  ;;  %4066 = vmatprep.subr.bf16.mxu0 %v7003_v4  ;;  %v9069_v7 = vpop.f32.mrf.mxu0  ;;  %v872_v4 = vld [vmem:[#allocation8 + $0x9a0] sm:$0xff]  ;;  %v6906_v5 = vcombine.low %v568_v8, %v576_v26 }
 0x1e0   :  { %4049 = vmatprep.subr.bf16.mxu1 %v7305_v17  ;;  %v880_v17 = vld [vmem:[#allocation8 + $0x9e0] sm:$0xff] }
 0x1e1   :  { %v3758_v39 = vpop.f32.mrf.mxu0  ;;  %v7210_v33 = vcombine.low %v872_v4, %v880_v17 }
 0x1e2   :  { %4067 = vmatpush1.bf16.msra.mxu0 %v7002_v23  ;;  %v3759_v18 = vadd.f32 %v3758_v39, %v1083_v15  ;;  %v6907_v23 = vcombine.high %v568_v8, %v576_v26  ;;  %v848_v15 = vld [vmem:[#allocation8 + $0x8e0] sm:$0xff] }
 0x1e3   :  { %4050 = vmatpush2.bf16.msra.mxu1 %v7304_v11  ;;  %4068 = vmatprep.subr.bf16.mxu0 %v6987_v12  ;;  %v7211_v12 = vcombine.high %v872_v4, %v880_v17  ;;  %v760_v39 = vld [vmem:[#allocation8 + $0x620] sm:$0xff] }
 0x1e4   :  { %4051 = vmatprep.subr.bf16.mxu1 %v7289_v32  ;;  %v808_v32 = vld [vmem:[#allocation8 + $0x7a0] sm:$0xff] }
 0x1e5   :  { %v7146_v29 = vcombine.low %v808_v32, %v816_v27  ;;  %v1040_v8 = vld [vmem:[#allocation8 + $0xee0] sm:$0xff] }
 0x1e6   :  { %4069 = vmatpush1.bf16.msra.mxu0 %v6986_v51  ;;  %v7147_v51 = vcombine.high %v808_v32, %v816_v27 }
 0x1e7   :  { %4052 = vmatpush2.bf16.msra.mxu1 %v7288_v10  ;;  %4070 = vmatprep.subr.bf16.mxu0 %v6971_v38  ;;  %v7195_v10 = vcombine.high %v856_v37, %v864_v2  ;;  %v792_v38 = vld [vmem:[#allocation8 + $0x720] sm:$0xff] }
 0x1e8   :  { %4107 = vmatprep.subr.bf16.mxu1 %v7275_v41  ;;  %v800_v41 = vld [vmem:[#allocation8 + $0x760] sm:$0xff] }
 0x1e9   :  { %v7131_v6 = vcombine.high %v792_v38, %v800_v41  ;;  %v7130_v24 = vcombine.low %v792_v38, %v800_v41 }
 0x1ea   :  { %4054 = vmatmul.mubr.bf16.vlgmr.msra.gmra.mxu1 %v9043_v30  ;;  %v3797_v42 = vpop.f32.mrf.mxu1  ;;  %4071 = vmatpush1.bf16.msra.mxu0 %v6970_v31  ;;  %v7179_v31 = vcombine.high %v840_v50, %v848_v15 }
 0x1eb   :  { %v3798_v45 = vadd.f32 %v3797_v42, %v3755_v48  ;;  %4108 = vmatpush1.bf16.msra.mxu1 %v7274_v40  ;;  %4139 = vmatprep.mubr.bf16.mxu1 %v9040_v53  ;;  %v776_v40 = vld [vmem:[#allocation8 + $0x6a0] sm:$0xff]  ;;  %v7178_v48 = vcombine.low %v840_v50, %v848_v15 }
 0x1ec   :  { %v9073_v36 = vpop.f32.mrf.mxu1  ;;  %4109 = vmatprep.subr.bf16.mxu1 %v7259_v60  ;;  %4072 = vmatprep.subr.bf16.mxu0 %v6955_v55  ;;  %v784_v60 = vld [vmem:[#allocation8 + $0x6e0] sm:$0xff] }
 0x1ed   :  { %v4440_v59 = vmul.f32 0.1, %v3798_v45  ;;  %vm4408_vm2 = vcmp.gt.f32.partialorder %v3798_v45, 0.0  ;;  %v824_v55 = vld [vmem:[#allocation8 + $0x820] sm:$0xff]  ;;  %v7115_v52 = vcombine.high %v776_v40, %v784_v60 }
 0x1ee   :  { %v3801_v21 = vpop.f32.mrf.mxu1  ;;  %4073 = vmatpush1.bf16.msra.mxu0 %v6954_v43  ;;  %v7163_v19 = vcombine.high %v824_v55, %v832_v47  ;;  %v768_v42 = vld [vmem:[#allocation8 + $0x660] sm:$0xff] }
 0x1ef   :  { %v3802_v63 = vadd.f32 %v3801_v21, %v3759_v18  ;;  %4110 = vmatpush1.bf16.msra.mxu1 %v7258_v44  ;;  %4074 = vmatprep.subr.bf16.mxu0 %v6939_v35  ;;  %v9075_v57 = vsel %vm4408_vm2, %v3798_v45, %v4440_v59  ;;  %v1064_v43 = vld [vmem:[#allocation8 + $0xfa0] sm:$0xff]  ;;  %v7114_v44 = vcombine.low %v776_v40, %v784_v60 }
 0x1f0   :  { %4111 = vmatprep.subr.bf16.mxu1 %v7243_v20  ;;  %v1072_v45 = vld [vmem:[#allocation8 + $0xfe0] sm:$0xff]  ;;  %v7162_v35 = vcombine.low %v824_v55, %v832_v47  ;;  %v7099_v20 = vcombine.high %v760_v39, %v768_v42  ;;  %v7098_v21 = vcombine.low %v760_v39, %v768_v42 }
 0x1f1   :  { %vm4424_vm3 = vcmp.gt.f32.partialorder %v3802_v63, 0.0  ;;  %v4456_v1 = vmul.f32 0.1, %v3802_v63  ;;  %v7403_v0 = vcombine.high %v1064_v43, %v1072_v45  ;;  %v752_v18 = vld [vmem:[#allocation8 + $0x5e0] sm:$0xff] }
 0x1f2   :  { %4075 = vmatpush1.bf16.msra.mxu0 %v6938_v56  ;;  %v7402_v56 = vcombine.low %v1064_v43, %v1072_v45  ;;  %v7083_v59 = vcombine.high %v744_v61, %v752_v18  ;;  %v7082_v26 = vcombine.low %v744_v61, %v752_v18 }
 0x1f3   :  { %v9077_v58 = vsel %vm4424_vm3, %v3802_v63, %v4456_v1  ;;  %4112 = vmatpush1.bf16.msra.mxu1 %v7242_v46  ;;  %4076 = vmatprep.subr.bf16.mxu0 %v6923_v49  ;;  %v7387_v63 = vcombine.high %v1048_v54, %v1056_v3  ;;  %v728_v46 = vld [vmem:[#allocation8 + $0x520] sm:$0xff]  ;;  %v7386_v1 = vcombine.low %v1048_v54, %v1056_v3  ;;  %v9083_v3 = vpop.f32.mrf.mxu0 }
 0x1f4   :  { %v4504_v11 = vpack.c.bf16 %v9077_v58, %v9075_v57  ;;  %4113 = vmatprep.subr.bf16.mxu1 %v7227_v14  ;;  %v736_v49 = vld [vmem:[#allocation8 + $0x560] sm:$0xff] }
 0x1f5   :  { %v1032_v14 = vld [vmem:[#allocation8 + $0xea0] sm:$0xff]  ;;  %v7067_v4 = vcombine.high %v728_v46, %v736_v49  ;;  %v7066_v32 = vcombine.low %v728_v46, %v736_v49  ;;  %v937_v46 = vld [vmem:[#allocation8 + $0xba8] sm:$0xff] }
 0x1f6   :  { %4077 = vmatpush1.bf16.msra.mxu0 %v6922_v22  ;;  %v7371_v17 = vcombine.high %v1032_v14, %v1040_v8  ;;  %v720_v22 = vld [vmem:[#allocation8 + $0x4e0] sm:$0xff]  ;;  %v7370_v27 = vcombine.low %v1032_v14, %v1040_v8  ;;  %v945_v49 = vld [vmem:[#allocation8 + $0xbe8] sm:$0xff] }
 0x1f7   :  { %4114 = vmatpush1.bf16.msra.mxu1 %v7226_v62  ;;  %4078 = vmatprep.subr.bf16.mxu0 %v6907_v23  ;;  %v712_v62 = vld [vmem:[#allocation8 + $0x4a0] sm:$0xff] }
 0x1f8   :  { %4115 = vmatprep.subr.bf16.mxu1 %v7211_v12  ;;  %v1016_v23 = vld [vmem:[#allocation8 + $0xe20] sm:$0xff]  ;;  %v7051_v37 = vcombine.high %v712_v62, %v720_v22  ;;  %v7050_v38 = vcombine.low %v712_v62, %v720_v22  ;;  %v929_v22 = vld [vmem:[#allocation8 + $0xb68] sm:$0xff] }
 0x1f9   :  { %v1024_v12 = vld [vmem:[#allocation8 + $0xe60] sm:$0xff] }
 0x1fa   :  { %4079 = vmatpush1.bf16.msra.mxu0 %v6906_v5  ;;  %v7355_v2 = vcombine.high %v1016_v23, %v1024_v12  ;;  %v696_v5 = vld [vmem:[#allocation8 + $0x420] sm:$0xff]  ;;  %v7354_v41 = vcombine.low %v1016_v23, %v1024_v12  ;;  %v617_v23 = vld [vmem:[#allocation8 + $0x1a8] sm:$0xff] }
 0x1fb   :  { %4116 = vmatpush1.bf16.msra.mxu1 %v7210_v33  ;;  %4080 = vmatprep.subr.bf16.mxu0 %v7147_v51  ;;  %v704_v33 = vld [vmem:[#allocation8 + $0x460] sm:$0xff]  ;;  %v625_v12 = vld [vmem:[#allocation8 + $0x1e8] sm:$0xff] }
 0x1fc   :  { %4117 = vmatprep.subr.bf16.mxu1 %v7195_v10  ;;  %v1000_v51 = vld [vmem:[#allocation8 + $0xda0] sm:$0xff]  ;;  %v7035_v50 = vcombine.high %v696_v5, %v704_v33  ;;  %v7034_v40 = vcombine.low %v696_v5, %v704_v33  ;;  %v6957_v33 = vcombine.high %v617_v23, %v625_v12 }
 0x1fd   :  { %v1008_v10 = vld [vmem:[#allocation8 + $0xde0] sm:$0xff] }
 0x1fe   :  { %4081 = vmatpush2.bf16.msra.mxu0 %v7146_v29  ;;  %v7339_v15 = vcombine.high %v1000_v51, %v1008_v10  ;;  %v681_v29 = vld [vmem:[#allocation8 + $0x3a8] sm:$0xff]  ;;  %v7338_v60 = vcombine.low %v1000_v51, %v1008_v10 }
 0x1ff   :  { %4118 = vmatpush1.bf16.msra.mxu1 %v7194_v34  ;;  %4082 = vmatprep.subr.bf16.mxu0 %v7131_v6  ;;  %v689_v34 = vld [vmem:[#allocation8 + $0x3e8] sm:$0xff]  ;;  %v984_v6 = vld [vmem:[#allocation8 + $0xd20] sm:$0xff] }
 0x200   :  { %4119 = vmatprep.subr.bf16.mxu1 %v7179_v31  ;;  %v992_v31 = vld [vmem:[#allocation8 + $0xd60] sm:$0xff]  ;;  %v7021_v55 = vcombine.high %v681_v29, %v689_v34  ;;  %v7020_v39 = vcombine.low %v681_v29, %v689_v34  ;;  %v601_v51 = vld [vmem:[#allocation8 + $0x128] sm:$0xff]  ;;  %v6956_v34 = vcombine.low %v617_v23, %v625_v12 }
 0x201   :  { %v7323_v47 = vcombine.high %v984_v6, %v992_v31  ;;  %v7322_v42 = vcombine.low %v984_v6, %v992_v31  ;;  %v609_v10 = vld [vmem:[#allocation8 + $0x168] sm:$0xff] }
 0x202   :  { %4083 = vmatpush2.bf16.msra.mxu0 %v7130_v24  ;;  %v665_v24 = vld [vmem:[#allocation8 + $0x328] sm:$0xff] }
 0x203   :  { %4120 = vmatpush1.bf16.msra.mxu1 %v7178_v48  ;;  %4084 = vmatprep.subr.bf16.mxu0 %v7115_v52  ;;  %v673_v48 = vld [vmem:[#allocation8 + $0x368] sm:$0xff]  ;;  %v968_v52 = vld [vmem:[#allocation8 + $0xca0] sm:$0xff] }
 0x204   :  { %4121 = vmatprep.subr.bf16.mxu1 %v7163_v19  ;;  %v976_v19 = vld [vmem:[#allocation8 + $0xce0] sm:$0xff]  ;;  %v7005_v43 = vcombine.high %v665_v24, %v673_v48  ;;  %v7004_v61 = vcombine.low %v665_v24, %v673_v48  ;;  %v593_v24 = vld [vmem:[#allocation8 + $0xe8] sm:$0xff] }
 0x205   :  { %v7307_v45 = vcombine.high %v968_v52, %v976_v19  ;;  %v7306_v18 = vcombine.low %v968_v52, %v976_v19  ;;  %v889_v52 = vld [vmem:[#allocation8 + $0xa28] sm:$0xff] }
 0x206   :  { %4085 = vmatpush2.bf16.msra.mxu0 %v7114_v44  ;;  %v649_v44 = vld [vmem:[#allocation8 + $0x2a8] sm:$0xff] }
 0x207   :  { %4122 = vmatpush1.bf16.msra.mxu1 %v7162_v35  ;;  %4086 = vmatprep.subr.bf16.mxu0 %v7099_v20  ;;  %v657_v35 = vld [vmem:[#allocation8 + $0x2e8] sm:$0xff]  ;;  %v952_v20 = vld [vmem:[#allocation8 + $0xc20] sm:$0xff] }
 0x208   :  { %4123 = vmatprep.subr.bf16.mxu1 %v7403_v0  ;;  %v960_v0 = vld [vmem:[#allocation8 + $0xc60] sm:$0xff]  ;;  %v6989_v54 = vcombine.high %v649_v44, %v657_v35  ;;  %v6988_v8 = vcombine.low %v649_v44, %v657_v35  ;;  %v897_v19 = vld [vmem:[#allocation8 + $0xa68] sm:$0xff] }
 0x209   :  { %v7864_v58 = vld [vmem:[#allocation11 + $0x250] ss:$8 sps:$4 sm:$0xff]  }
 0x20a   :  { %4087 = vmatpush2.bf16.msra.mxu0 %v7098_v21  ;;  %v7291_v21 = vcombine.high %v952_v20, %v960_v0 }
 0x20b   :  { %4124 = vmatpush2.bf16.msra.mxu1 %v7402_v56  ;;  %4088 = vmatprep.subr.bf16.mxu0 %v7083_v59  ;;  %v633_v56 = vld [vmem:[#allocation8 + $0x228] sm:$0xff] }
 0x20c   :  { %4125 = vmatprep.subr.bf16.mxu1 %v7387_v63  ;;  %v641_v59 = vld [vmem:[#allocation8 + $0x268] sm:$0xff]  ;;  %v1090_v63 = vsub.s32 2, %v9059_v9 }
 0x20e   :  { %4089 = vmatpush2.bf16.msra.mxu0 %v7082_v26  ;;  %v7290_v26 = vcombine.low %v952_v20, %v960_v0  ;;  %v1091_v62 = vrot.slane %v9065_v28, %v1090_v63  ;;  %v7229_v20 = vcombine.high %v889_v52, %v897_v19  ;;  %v569_v0 = vld [vmem:[#allocation8 + $0x28] sm:$0xff] }
 0x20f   :  { %4126 = vmatpush2.bf16.msra.mxu1 %v7386_v1  ;;  %4090 = vmatprep.subr.bf16.mxu0 %v7067_v4  ;;  %v6973_v1 = vcombine.high %v633_v56, %v641_v59  ;;  %v7277_v4 = vcombine.high %v937_v46, %v945_v49 }
 0x210   :  { %4127 = vmatprep.subr.bf16.mxu1 %v7371_v17  ;;  %v921_v17 = vld [vmem:[#allocation8 + $0xb28] sm:$0xff] }
 0x211   :  { %v7261_v5 = vcombine.high %v921_v17, %v929_v22  ;;  %v7260_v31 = vcombine.low %v921_v17, %v929_v22  ;;  %v857_v17 = vld [vmem:[#allocation8 + $0x928] sm:$0xff] }
 0x212   :  { %4091 = vmatpush2.bf16.msra.mxu0 %v7066_v32 }
 0x213   :  { %4128 = vmatpush2.bf16.msra.mxu1 %v7370_v27  ;;  %4092 = vmatprep.subr.bf16.mxu0 %v7051_v37  ;;  %v6972_v27 = vcombine.low %v633_v56, %v641_v59  ;;  %v7276_v37 = vcombine.low %v937_v46, %v945_v49  ;;  %v7228_v56 = vcombine.low %v889_v52, %v897_v19  ;;  %v1065_v52 = vld [vmem:[#allocation8 + $0xfa8] sm:$0xff] }
 0x214   :  { %4129 = vmatprep.subr.bf16.mxu1 %v7355_v2  ;;  %v9091_v2 = vpop.f32.mrf.mxu1  ;;  %v1073_v19 = vld [vmem:[#allocation8 + $0xfe8] sm:$0xff] }
 0x216   :  { %4093 = vmatpush2.bf16.msra.mxu0 %v7050_v38 }
 0x217   :  { %4130 = vmatpush2.bf16.msra.mxu1 %v7354_v41  ;;  %4094 = vmatprep.subr.bf16.mxu0 %v7035_v50  ;;  %v905_v41 = vld [vmem:[#allocation8 + $0xaa8] sm:$0xff] }
 0x218   :  { %4131 = vmatprep.subr.bf16.mxu1 %v7339_v15  ;;  %v913_v50 = vld [vmem:[#allocation8 + $0xae8] sm:$0xff] }
 0x219   :  { %v7244_v44 = vcombine.low %v905_v41, %v913_v50 }
 0x21a   :  { %4095 = vmatpush2.bf16.msra.mxu0 %v7034_v40  ;;  %v6941_v40 = vcombine.high %v601_v51, %v609_v10 }
 0x21b   :  { %4132 = vmatpush2.bf16.msra.mxu1 %v7338_v60  ;;  %4150 = vmatprep.subr.bf16.mxu0 %v7021_v55  ;;  %v7245_v55 = vcombine.high %v905_v41, %v913_v50 }
 0x21c   :  { %4133 = vmatprep.subr.bf16.mxu1 %v7323_v47  ;;  %v585_v47 = vld [vmem:[#allocation8 + $0xa8] sm:$0xff] }
 0x21d   :  { %4097 = vmatmul.mubr.bf16.vlgmr.msra.gmra.mxu0 %v9031_v16  ;;  %v3840_v14 = vpop.f32.mrf.mxu0  ;;  %v6925_v35 = vcombine.high %v585_v47, %v593_v24  ;;  %v6924_v59 = vcombine.low %v585_v47, %v593_v24  ;;  %v761_v24 = vld [vmem:[#allocation8 + $0x628] sm:$0xff] }
 0x21e   :  { %4151 = vmatpush1.bf16.msra.mxu0 %v7020_v39  ;;  %4182 = vmatprep.mubr.bf16.mxu0 %v9027_v25  ;;  %v3841_v38 = vadd.f32 %v3840_v14, %v1091_v62 }
 0x21f   :  { %4134 = vmatpush2.bf16.msra.mxu1 %v7322_v42  ;;  %4152 = vmatprep.subr.bf16.mxu0 %v7005_v43  ;;  %v9089_v32 = vpop.f32.mrf.mxu0  ;;  %v6940_v42 = vcombine.low %v601_v51, %v609_v10  ;;  %v849_v51 = vld [vmem:[#allocation8 + $0x8e8] sm:$0xff] }
 0x220   :  { %4135 = vmatprep.subr.bf16.mxu1 %v7307_v45 }
 0x221   :  { %v3844_v15 = vpop.f32.mrf.mxu0 }
 0x222   :  { %4153 = vmatpush1.bf16.msra.mxu0 %v7004_v61  ;;  %v3845_v48 = vadd.f32 %v3844_v15, %v1091_v62  ;;  %v577_v61 = vld [vmem:[#allocation8 + $0x68] sm:$0xff] }
 0x223   :  { %4136 = vmatpush2.bf16.msra.mxu1 %v7306_v18  ;;  %4154 = vmatprep.subr.bf16.mxu0 %v6989_v54  ;;  %v873_v54 = vld [vmem:[#allocation8 + $0x9a8] sm:$0xff]  ;;  %v6909_v14 = vcombine.high %v569_v0, %v577_v61  ;;  %v6908_v22 = vcombine.low %v569_v0, %v577_v61 }
 0x224   :  { %4137 = vmatprep.subr.bf16.mxu1 %v7291_v21  ;;  %v881_v21 = vld [vmem:[#allocation8 + $0x9e8] sm:$0xff] }
 0x225   :  { %v865_v62 = vld [vmem:[#allocation8 + $0x968] sm:$0xff]  ;;  %v7212_v23 = vcombine.low %v873_v54, %v881_v21 }
 0x226   :  { %4155 = vmatpush1.bf16.msra.mxu0 %v6988_v8  ;;  %v777_v15 = vld [vmem:[#allocation8 + $0x6a8] sm:$0xff] }
 0x227   :  { %4138 = vmatpush2.bf16.msra.mxu1 %v7290_v26  ;;  %4156 = vmatprep.subr.bf16.mxu0 %v6973_v1  ;;  %v7213_v26 = vcombine.high %v873_v54, %v881_v21  ;;  %v809_v1 = vld [vmem:[#allocation8 + $0x7a8] sm:$0xff] }
 0x228   :  { %4193 = vmatprep.subr.bf16.mxu1 %v7277_v4  ;;  %v817_v4 = vld [vmem:[#allocation8 + $0x7e8] sm:$0xff] }
 0x229   :  { %v7149_v12 = vcombine.high %v809_v1, %v817_v4  ;;  %v7148_v10 = vcombine.low %v809_v1, %v817_v4  ;;  %v1057_v0 = vld [vmem:[#allocation8 + $0xf68] sm:$0xff] }
 0x22a   :  { %v3883_v29 = vpop.f32.mrf.mxu1  ;;  %4140 = vmatmul.mubr.bf16.vlgmr.msra.gmra.mxu1 %v9043_v30  ;;  %4157 = vmatpush1.bf16.msra.mxu0 %v6972_v27  ;;  %v7197_v27 = vcombine.high %v857_v17, %v865_v62 }
 0x22b   :  { %v3884_v6 = vadd.f32 %v3883_v29, %v3841_v38  ;;  %4194 = vmatpush1.bf16.msra.mxu1 %v7276_v37  ;;  %4225 = vmatprep.mubr.bf16.mxu1 %v9040_v53  ;;  %v793_v37 = vld [vmem:[#allocation8 + $0x728] sm:$0xff]  ;;  %v7196_v38 = vcombine.low %v857_v17, %v865_v62 }
 0x22c   :  { %v9095_v60 = vpop.f32.mrf.mxu1  ;;  %4195 = vmatprep.subr.bf16.mxu1 %v7261_v5  ;;  %4158 = vmatprep.subr.bf16.mxu0 %v6957_v33  ;;  %v801_v5 = vld [vmem:[#allocation8 + $0x768] sm:$0xff] }
 0x22d   :  { %v4442_v43 = vmul.f32 0.1, %v3884_v6  ;;  %vm4410_vm4 = vcmp.gt.f32.partialorder %v3884_v6, 0.0  ;;  %v841_v33 = vld [vmem:[#allocation8 + $0x8a8] sm:$0xff]  ;;  %v7133_v41 = vcombine.high %v793_v37, %v801_v5 }
 0x22e   :  { %v3887_v39 = vpop.f32.mrf.mxu1  ;;  %4159 = vmatpush1.bf16.msra.mxu0 %v6956_v34  ;;  %v7181_v50 = vcombine.high %v841_v33, %v849_v51  ;;  %v785_v29 = vld [vmem:[#allocation8 + $0x6e8] sm:$0xff] }
 0x22f   :  { %v3888_v45 = vadd.f32 %v3887_v39, %v3845_v48  ;;  %4196 = vmatpush1.bf16.msra.mxu1 %v7260_v31  ;;  %4160 = vmatprep.subr.bf16.mxu0 %v6941_v40  ;;  %v9097_v46 = vsel %vm4410_vm4, %v3884_v6, %v4442_v43  ;;  %v825_v34 = vld [vmem:[#allocation8 + $0x828] sm:$0xff]  ;;  %v7132_v31 = vcombine.low %v793_v37, %v801_v5 }
 0x230   :  { %4197 = vmatprep.subr.bf16.mxu1 %v7245_v55  ;;  %v833_v6 = vld [vmem:[#allocation8 + $0x868] sm:$0xff]  ;;  %v7180_v40 = vcombine.low %v841_v33, %v849_v51  ;;  %v7117_v55 = vcombine.high %v777_v15, %v785_v29  ;;  %v7116_v39 = vcombine.low %v777_v15, %v785_v29 }
 0x231   :  { %vm4426_vm5 = vcmp.gt.f32.partialorder %v3888_v45, 0.0  ;;  %v4458_v18 = vmul.f32 0.1, %v3888_v45  ;;  %v7165_v47 = vcombine.high %v825_v34, %v833_v6  ;;  %v769_v48 = vld [vmem:[#allocation8 + $0x668] sm:$0xff] }
 0x232   :  { %4161 = vmatpush1.bf16.msra.mxu0 %v6940_v42  ;;  %v7164_v42 = vcombine.low %v825_v34, %v833_v6  ;;  %v7101_v43 = vcombine.high %v761_v24, %v769_v48  ;;  %v7100_v61 = vcombine.low %v761_v24, %v769_v48 }
 0x233   :  { %v9099_v49 = vsel %vm4426_vm5, %v3888_v45, %v4458_v18  ;;  %4198 = vmatpush1.bf16.msra.mxu1 %v7244_v44  ;;  %4162 = vmatprep.subr.bf16.mxu0 %v6925_v35  ;;  %v7405_v45 = vcombine.high %v1065_v52, %v1073_v19  ;;  %v745_v44 = vld [vmem:[#allocation8 + $0x5a8] sm:$0xff]  ;;  %v7404_v18 = vcombine.low %v1065_v52, %v1073_v19 }
 0x234   :  { %v4506_v8 = vpack.c.bf16 %v9099_v49, %v9097_v46  ;;  %4199 = vmatprep.subr.bf16.mxu1 %v7229_v20  ;;  %v753_v35 = vld [vmem:[#allocation8 + $0x5e8] sm:$0xff] }
 0x235   :  { %v1049_v20 = vld [vmem:[#allocation8 + $0xf28] sm:$0xff]  ;;  %v7085_v54 = vcombine.high %v745_v44, %v753_v35  ;;  %v7084_v1 = vcombine.low %v745_v44, %v753_v35 }
 0x236   :  { %4163 = vmatpush1.bf16.msra.mxu0 %v6924_v59  ;;  %v7389_v21 = vcombine.high %v1049_v20, %v1057_v0  ;;  %v737_v59 = vld [vmem:[#allocation8 + $0x568] sm:$0xff]  ;;  %v7388_v4 = vcombine.low %v1049_v20, %v1057_v0 }
 0x237   :  { %4200 = vmatpush1.bf16.msra.mxu1 %v7228_v56  ;;  %4164 = vmatprep.subr.bf16.mxu0 %v6909_v14  ;;  %v729_v56 = vld [vmem:[#allocation8 + $0x528] sm:$0xff] }
 0x238   :  { %4201 = vmatprep.subr.bf16.mxu1 %v7213_v26  ;;  %v1033_v14 = vld [vmem:[#allocation8 + $0xea8] sm:$0xff]  ;;  %v7069_v17 = vcombine.high %v729_v56, %v737_v59  ;;  %v7068_v37 = vcombine.low %v729_v56, %v737_v59 }
 0x239   :  { %v1041_v26 = vld [vmem:[#allocation8 + $0xee8] sm:$0xff] }
 0x23a   :  { %4165 = vmatpush1.bf16.msra.mxu0 %v6908_v22  ;;  %v7373_v62 = vcombine.high %v1033_v14, %v1041_v26  ;;  %v713_v22 = vld [vmem:[#allocation8 + $0x4a8] sm:$0xff]  ;;  %v7372_v5 = vcombine.low %v1033_v14, %v1041_v26  ;;  %v9105_v26 = vpop.f32.mrf.mxu0 }
 0x23b   :  { %4202 = vmatpush1.bf16.msra.mxu1 %v7212_v23  ;;  %4166 = vmatprep.subr.bf16.mxu0 %v7149_v12  ;;  %v721_v23 = vld [vmem:[#allocation8 + $0x4e8] sm:$0xff] }
 0x23c   :  { %4203 = vmatprep.subr.bf16.mxu1 %v7197_v27  ;;  %v1017_v12 = vld [vmem:[#allocation8 + $0xe28] sm:$0xff]  ;;  %v7053_v33 = vcombine.high %v713_v22, %v721_v23  ;;  %v7052_v15 = vcombine.low %v713_v22, %v721_v23  ;;  %v938_v22 = vld [vmem:[#allocation8 + $0xbb0] sm:$0xff] }
 0x23d   :  { %v1025_v27 = vld [vmem:[#allocation8 + $0xe68] sm:$0xff]  ;;  %v946_v23 = vld [vmem:[#allocation8 + $0xbf0] sm:$0xff] }
 0x23e   :  { %4167 = vmatpush2.bf16.msra.mxu0 %v7148_v10  ;;  %v7357_v51 = vcombine.high %v1017_v12, %v1025_v27  ;;  %v697_v10 = vld [vmem:[#allocation8 + $0x428] sm:$0xff]  ;;  %v7356_v29 = vcombine.low %v1017_v12, %v1025_v27 }
 0x23f   :  { %4204 = vmatpush1.bf16.msra.mxu1 %v7196_v38  ;;  %4168 = vmatprep.subr.bf16.mxu0 %v7133_v41  ;;  %v705_v38 = vld [vmem:[#allocation8 + $0x468] sm:$0xff] }
 0x240   :  { %4205 = vmatprep.subr.bf16.mxu1 %v7181_v50  ;;  %v1001_v41 = vld [vmem:[#allocation8 + $0xda8] sm:$0xff]  ;;  %v7037_v34 = vcombine.high %v697_v10, %v705_v38  ;;  %v7036_v24 = vcombine.low %v697_v10, %v705_v38  ;;  %v930_v38 = vld [vmem:[#allocation8 + $0xb70] sm:$0xff] }
 0x241   :  { %v1009_v50 = vld [vmem:[#allocation8 + $0xde8] sm:$0xff] }
 0x242   :  { %4169 = vmatpush2.bf16.msra.mxu0 %v7132_v31  ;;  %v7341_v6 = vcombine.high %v1001_v41, %v1009_v50  ;;  %v682_v31 = vld [vmem:[#allocation8 + $0x3b0] sm:$0xff]  ;;  %v7340_v48 = vcombine.low %v1001_v41, %v1009_v50  ;;  %v7873_v46 = vld [vmem:[#allocation11 + $0x350] ss:$8 sps:$4 sm:$0xff]   ;;  %v7890_v49 = vld [vmem:[#allocation11 + $0x214] ss:$8 sps:$4 sm:$0xff]  }
 0x243   :  { %4206 = vmatpush1.bf16.msra.mxu1 %v7180_v40  ;;  %4170 = vmatprep.subr.bf16.mxu0 %v7117_v55  ;;  %v690_v40 = vld [vmem:[#allocation8 + $0x3f0] sm:$0xff]  ;;  %v985_v55 = vld [vmem:[#allocation8 + $0xd28] sm:$0xff] }
 0x244   :  { %4207 = vmatprep.subr.bf16.mxu1 %v7165_v47  ;;  %v993_v47 = vld [vmem:[#allocation8 + $0xd68] sm:$0xff]  ;;  %v7023_v52 = vcombine.high %v682_v31, %v690_v40  ;;  %v7022_v44 = vcombine.low %v682_v31, %v690_v40  ;;  %v618_v41 = vld [vmem:[#allocation8 + $0x1b0] sm:$0xff] }
 0x245   :  { %v7325_v19 = vcombine.high %v985_v55, %v993_v47  ;;  %v7324_v35 = vcombine.low %v985_v55, %v993_v47  ;;  %v626_v50 = vld [vmem:[#allocation8 + $0x1f0] sm:$0xff] }
 0x246   :  { %4171 = vmatpush2.bf16.msra.mxu0 %v7116_v39  ;;  %v666_v39 = vld [vmem:[#allocation8 + $0x330] sm:$0xff]  ;;  %v6959_v40 = vcombine.high %v618_v41, %v626_v50 }
 0x247   :  { %4208 = vmatpush1.bf16.msra.mxu1 %v7164_v42  ;;  %4172 = vmatprep.subr.bf16.mxu0 %v7101_v43  ;;  %v674_v42 = vld [vmem:[#allocation8 + $0x370] sm:$0xff]  ;;  %v969_v43 = vld [vmem:[#allocation8 + $0xca8] sm:$0xff] }
 0x248   :  { %4209 = vmatprep.subr.bf16.mxu1 %v7405_v45  ;;  %v977_v45 = vld [vmem:[#allocation8 + $0xce8] sm:$0xff]  ;;  %v7007_v20 = vcombine.high %v666_v39, %v674_v42  ;;  %v7006_v56 = vcombine.low %v666_v39, %v674_v42  ;;  %v602_v55 = vld [vmem:[#allocation8 + $0x130] sm:$0xff]  ;;  %v6958_v39 = vcombine.low %v618_v41, %v626_v50 }
 0x249   :  { %v7309_v0 = vcombine.high %v969_v43, %v977_v45  ;;  %v7308_v59 = vcombine.low %v969_v43, %v977_v45  ;;  %v610_v47 = vld [vmem:[#allocation8 + $0x170] sm:$0xff] }
 0x24a   :  { %4173 = vmatpush2.bf16.msra.mxu0 %v7100_v61  ;;  %v650_v61 = vld [vmem:[#allocation8 + $0x2b0] sm:$0xff]  ;;  %v6943_v45 = vcombine.high %v602_v55, %v610_v47 }
 0x24b   :  { %4210 = vmatpush2.bf16.msra.mxu1 %v7404_v18  ;;  %4174 = vmatprep.subr.bf16.mxu0 %v7085_v54  ;;  %v658_v18 = vld [vmem:[#allocation8 + $0x2f0] sm:$0xff]  ;;  %v953_v54 = vld [vmem:[#allocation8 + $0xc28] sm:$0xff] }
 0x24c   :  { %4211 = vmatprep.subr.bf16.mxu1 %v7389_v21  ;;  %v961_v21 = vld [vmem:[#allocation8 + $0xc68] sm:$0xff]  ;;  %v6991_v14 = vcombine.high %v650_v61, %v658_v18  ;;  %v6990_v27 = vcombine.low %v650_v61, %v658_v18  ;;  %v890_v18 = vld [vmem:[#allocation8 + $0xa30] sm:$0xff] }
 0x24e   :  { %4175 = vmatpush2.bf16.msra.mxu0 %v7084_v1  ;;  %v7293_v1 = vcombine.high %v953_v54, %v961_v21 }
 0x24f   :  { %4212 = vmatpush2.bf16.msra.mxu1 %v7388_v4  ;;  %4176 = vmatprep.subr.bf16.mxu0 %v7069_v17  ;;  %v634_v4 = vld [vmem:[#allocation8 + $0x230] sm:$0xff] }
 0x250   :  { %4213 = vmatprep.subr.bf16.mxu1 %v7373_v62  ;;  %v642_v17 = vld [vmem:[#allocation8 + $0x270] sm:$0xff]  ;;  %v1098_v62 = vsub.s32 4, %v9059_v9 }
 0x252   :  { %4177 = vmatpush2.bf16.msra.mxu0 %v7068_v37  ;;  %v7292_v37 = vcombine.low %v953_v54, %v961_v21  ;;  %v1099_v10 = vrot.slane %v9065_v28, %v1098_v62  ;;  %v914_v28 = vld [vmem:[#allocation8 + $0xaf0] sm:$0xff] }
 0x253   :  { %4214 = vmatpush2.bf16.msra.mxu1 %v7372_v5  ;;  %4178 = vmatprep.subr.bf16.mxu0 %v7053_v33  ;;  %v6975_v5 = vcombine.high %v634_v4, %v642_v17  ;;  %v7279_v33 = vcombine.high %v938_v22, %v946_v23  ;;  %v898_v54 = vld [vmem:[#allocation8 + $0xa70] sm:$0xff] }
 0x254   :  { %4215 = vmatprep.subr.bf16.mxu1 %v7357_v51  ;;  %v922_v51 = vld [vmem:[#allocation8 + $0xb30] sm:$0xff] }
 0x255   :  { %v7263_v31 = vcombine.high %v922_v51, %v930_v38  ;;  %v7262_v43 = vcombine.low %v922_v51, %v930_v38 }
 0x256   :  { %4179 = vmatpush2.bf16.msra.mxu0 %v7052_v15 }
 0x257   :  { %4216 = vmatpush2.bf16.msra.mxu1 %v7356_v29  ;;  %4180 = vmatprep.subr.bf16.mxu0 %v7037_v34  ;;  %v6974_v29 = vcombine.low %v634_v4, %v642_v17  ;;  %v7278_v34 = vcombine.low %v938_v22, %v946_v23  ;;  %v7231_v17 = vcombine.high %v890_v18, %v898_v54  ;;  %v570_v22 = vld [vmem:[#allocation8 + $0x30] sm:$0xff] }
 0x258   :  { %4217 = vmatprep.subr.bf16.mxu1 %v7341_v6  ;;  %v9113_v6 = vpop.f32.mrf.mxu1  ;;  %v578_v23 = vld [vmem:[#allocation8 + $0x70] sm:$0xff] }
 0x259   :  { %v6911_v38 = vcombine.high %v570_v22, %v578_v23 }
 0x25a   :  { %4181 = vmatpush2.bf16.msra.mxu0 %v7036_v24 }
 0x25b   :  { %4218 = vmatpush2.bf16.msra.mxu1 %v7340_v48  ;;  %4236 = vmatprep.subr.bf16.mxu0 %v7023_v52  ;;  %v906_v48 = vld [vmem:[#allocation8 + $0xab0] sm:$0xff] }
 0x25c   :  { %4219 = vmatprep.subr.bf16.mxu1 %v7325_v19 }
 0x25d   :  { %4183 = vmatmul.mubr.bf16.vlgmr.msra.gmra.mxu0 %v9031_v16  ;;  %v3926_v12 = vpop.f32.mrf.mxu0 }
 0x25e   :  { %4237 = vmatpush1.bf16.msra.mxu0 %v7022_v44  ;;  %4268 = vmatprep.mubr.bf16.mxu0 %v9027_v25  ;;  %v3927_v24 = vadd.f32 %v3926_v12, %v1099_v10 }
 0x25f   :  { %4220 = vmatpush2.bf16.msra.mxu1 %v7324_v35  ;;  %4238 = vmatprep.subr.bf16.mxu0 %v7007_v20  ;;  %v9111_v15 = vpop.f32.mrf.mxu0  ;;  %v7247_v35 = vcombine.high %v906_v48, %v914_v28  ;;  %v586_v20 = vld [vmem:[#allocation8 + $0xb0] sm:$0xff] }
 0x260   :  { %4221 = vmatprep.subr.bf16.mxu1 %v7309_v0  ;;  %v594_v0 = vld [vmem:[#allocation8 + $0xf0] sm:$0xff] }
 0x261   :  { %v3930_v52 = vpop.f32.mrf.mxu0  ;;  %v6927_v4 = vcombine.high %v586_v20, %v594_v0 }
 0x262   :  { %4239 = vmatpush1.bf16.msra.mxu0 %v7006_v56  ;;  %v3931_v61 = vadd.f32 %v3930_v52, %v1099_v10  ;;  %v6942_v56 = vcombine.low %v602_v55, %v610_v47  ;;  %v6910_v55 = vcombine.low %v570_v22, %v578_v23  ;;  %v802_v52 = vld [vmem:[#allocation8 + $0x770] sm:$0xff] }
 0x263   :  { %4222 = vmatpush2.bf16.msra.mxu1 %v7308_v59  ;;  %4240 = vmatprep.subr.bf16.mxu0 %v6991_v14 }
 0x264   :  { %4223 = vmatprep.subr.bf16.mxu1 %v7293_v1  ;;  %v7246_v1 = vcombine.low %v906_v48, %v914_v28  ;;  %v794_v28 = vld [vmem:[#allocation8 + $0x730] sm:$0xff] }
 0x266   :  { %4241 = vmatpush1.bf16.msra.mxu0 %v6990_v27  ;;  %v874_v27 = vld [vmem:[#allocation8 + $0x9b0] sm:$0xff] }
 0x267   :  { %4224 = vmatpush2.bf16.msra.mxu1 %v7292_v37  ;;  %4242 = vmatprep.subr.bf16.mxu0 %v6975_v5  ;;  %v882_v37 = vld [vmem:[#allocation8 + $0x9f0] sm:$0xff]  ;;  %v7230_v5 = vcombine.low %v890_v18, %v898_v54  ;;  %v7134_v54 = vcombine.low %v794_v28, %v802_v52 }
 0x268   :  { %4279 = vmatprep.subr.bf16.mxu1 %v7279_v33  ;;  %v6926_v33 = vcombine.low %v586_v20, %v594_v0  ;;  %v7215_v50 = vcombine.high %v874_v27, %v882_v37  ;;  %v7214_v47 = vcombine.low %v874_v27, %v882_v37  ;;  %v778_v20 = vld [vmem:[#allocation8 + $0x6b0] sm:$0xff] }
 0x269   :  { %v786_v0 = vld [vmem:[#allocation8 + $0x6f0] sm:$0xff] }
 0x26a   :  { %v3969_v19 = vpop.f32.mrf.mxu1  ;;  %4226 = vmatmul.mubr.bf16.vlgmr.msra.gmra.mxu1 %v9043_v30  ;;  %4243 = vmatpush1.bf16.msra.mxu0 %v6974_v29  ;;  %v810_v29 = vld [vmem:[#allocation8 + $0x7b0] sm:$0xff]  ;;  %v7118_v22 = vcombine.low %v778_v20, %v786_v0 }
 0x26b   :  { %v3970_v42 = vadd.f32 %v3969_v19, %v3927_v24  ;;  %4280 = vmatpush1.bf16.msra.mxu1 %v7278_v34  ;;  %4311 = vmatprep.mubr.bf16.mxu1 %v9040_v53  ;;  %v818_v34 = vld [vmem:[#allocation8 + $0x7f0] sm:$0xff] }
 0x26c   :  { %v9117_v44 = vpop.f32.mrf.mxu1  ;;  %4281 = vmatprep.subr.bf16.mxu1 %v7263_v31  ;;  %4244 = vmatprep.subr.bf16.mxu0 %v6959_v40  ;;  %v858_v31 = vld [vmem:[#allocation8 + $0x930] sm:$0xff]  ;;  %v7151_v24 = vcombine.high %v810_v29, %v818_v34 }
 0x26d   :  { %v4444_v59 = vmul.f32 0.1, %v3970_v42  ;;  %vm4412_vm6 = vcmp.gt.f32.partialorder %v3970_v42, 0.0  ;;  %v866_v40 = vld [vmem:[#allocation8 + $0x970] sm:$0xff] }
 0x26e   :  { %v3973_v21 = vpop.f32.mrf.mxu1  ;;  %4245 = vmatpush1.bf16.msra.mxu0 %v6958_v39  ;;  %v7199_v48 = vcombine.high %v858_v31, %v866_v40  ;;  %v842_v19 = vld [vmem:[#allocation8 + $0x8b0] sm:$0xff] }
 0x26f   :  { %v3974_v14 = vadd.f32 %v3973_v21, %v3931_v61  ;;  %4282 = vmatpush1.bf16.msra.mxu1 %v7262_v43  ;;  %4246 = vmatprep.subr.bf16.mxu0 %v6943_v45  ;;  %v9119_v51 = vsel %vm4412_vm6, %v3970_v42, %v4444_v59  ;;  %v850_v39 = vld [vmem:[#allocation8 + $0x8f0] sm:$0xff]  ;;  %v7150_v42 = vcombine.low %v810_v29, %v818_v34 }
 0x270   :  { %4283 = vmatprep.subr.bf16.mxu1 %v7247_v35  ;;  %v7198_v43 = vcombine.low %v858_v31, %v866_v40  ;;  %v7135_v45 = vcombine.high %v794_v28, %v802_v52  ;;  %v7183_v35 = vcombine.high %v842_v19, %v850_v39  ;;  %v826_v61 = vld [vmem:[#allocation8 + $0x830] sm:$0xff]  ;;  %v7182_v21 = vcombine.low %v842_v19, %v850_v39 }
 0x271   :  { %vm4428_vm7 = vcmp.gt.f32.partialorder %v3974_v14, 0.0  ;;  %v4460_v12 = vmul.f32 0.1, %v3974_v14  ;;  %v834_v18 = vld [vmem:[#allocation8 + $0x870] sm:$0xff] }
 0x272   :  { %4247 = vmatpush1.bf16.msra.mxu0 %v6942_v56  ;;  %v7119_v56 = vcombine.high %v778_v20, %v786_v0  ;;  %v7167_v59 = vcombine.high %v826_v61, %v834_v18  ;;  %v7166_v23 = vcombine.low %v826_v61, %v834_v18  ;;  %v746_v37 = vld [vmem:[#allocation8 + $0x5b0] sm:$0xff] }
 0x273   :  { %v9121_v10 = vsel %vm4428_vm7, %v3974_v14, %v4460_v12  ;;  %4284 = vmatpush1.bf16.msra.mxu1 %v7246_v1  ;;  %4248 = vmatprep.subr.bf16.mxu0 %v6927_v4  ;;  %v762_v14 = vld [vmem:[#allocation8 + $0x630] sm:$0xff] }
 0x274   :  { %v4508_v41 = vpack.c.bf16 %v9121_v10, %v9119_v51  ;;  %4285 = vmatprep.subr.bf16.mxu1 %v7231_v17  ;;  %v770_v1 = vld [vmem:[#allocation8 + $0x670] sm:$0xff] }
 0x275   :  { %v1066_v4 = vld [vmem:[#allocation8 + $0xfb0] sm:$0xff]  ;;  %v7103_v12 = vcombine.high %v762_v14, %v770_v1 }
 0x276   :  { %4249 = vmatpush1.bf16.msra.mxu0 %v6926_v33  ;;  %v1074_v17 = vld [vmem:[#allocation8 + $0xff0] sm:$0xff] }
 0x277   :  { %4286 = vmatpush1.bf16.msra.mxu1 %v7230_v5  ;;  %4250 = vmatprep.subr.bf16.mxu0 %v6911_v38  ;;  %v7407_v27 = vcombine.high %v1066_v4, %v1074_v17  ;;  %v754_v5 = vld [vmem:[#allocation8 + $0x5f0] sm:$0xff]  ;;  %v7406_v29 = vcombine.low %v1066_v4, %v1074_v17  ;;  %v683_v17 = vld [vmem:[#allocation8 + $0x3b8] sm:$0xff] }
 0x278   :  { %4287 = vmatprep.subr.bf16.mxu1 %v7215_v50  ;;  %v1050_v33 = vld [vmem:[#allocation8 + $0xf30] sm:$0xff]  ;;  %v7102_v50 = vcombine.low %v762_v14, %v770_v1  ;;  %v7087_v34 = vcombine.high %v746_v37, %v754_v5 }
 0x279   :  { %v1058_v38 = vld [vmem:[#allocation8 + $0xf70] sm:$0xff] }
 0x27a   :  { %4251 = vmatpush1.bf16.msra.mxu0 %v6910_v55  ;;  %v7391_v31 = vcombine.high %v1050_v33, %v1058_v38  ;;  %v730_v40 = vld [vmem:[#allocation8 + $0x530] sm:$0xff]  ;;  %v7390_v28 = vcombine.low %v1050_v33, %v1058_v38  ;;  %v667_v38 = vld [vmem:[#allocation8 + $0x338] sm:$0xff] }
 0x27b   :  { %4288 = vmatpush1.bf16.msra.mxu1 %v7214_v47  ;;  %4252 = vmatprep.subr.bf16.mxu0 %v7151_v24  ;;  %v738_v55 = vld [vmem:[#allocation8 + $0x570] sm:$0xff] }
 0x27c   :  { %4289 = vmatprep.subr.bf16.mxu1 %v7199_v48  ;;  %v1034_v47 = vld [vmem:[#allocation8 + $0xeb0] sm:$0xff]  ;;  %v7086_v48 = vcombine.low %v746_v37, %v754_v5  ;;  %v7071_v52 = vcombine.high %v730_v40, %v738_v55 }
 0x27d   :  { %v1042_v24 = vld [vmem:[#allocation8 + $0xef0] sm:$0xff] }
 0x27e   :  { %4253 = vmatpush2.bf16.msra.mxu0 %v7150_v42  ;;  %v7375_v19 = vcombine.high %v1034_v47, %v1042_v24  ;;  %v714_v39 = vld [vmem:[#allocation8 + $0x4b0] sm:$0xff]  ;;  %v7374_v20 = vcombine.low %v1034_v47, %v1042_v24  ;;  %v651_v24 = vld [vmem:[#allocation8 + $0x2b8] sm:$0xff] }
 0x27f   :  { %4290 = vmatpush1.bf16.msra.mxu1 %v7198_v43  ;;  %4254 = vmatprep.subr.bf16.mxu0 %v7135_v45  ;;  %v722_v42 = vld [vmem:[#allocation8 + $0x4f0] sm:$0xff] }
 0x280   :  { %4291 = vmatprep.subr.bf16.mxu1 %v7183_v35  ;;  %v1018_v43 = vld [vmem:[#allocation8 + $0xe30] sm:$0xff]  ;;  %v7070_v35 = vcombine.low %v730_v40, %v738_v55  ;;  %v7055_v0 = vcombine.high %v714_v39, %v722_v42 }
 0x281   :  { %v1026_v45 = vld [vmem:[#allocation8 + $0xe70] sm:$0xff] }
 0x282   :  { %4255 = vmatpush2.bf16.msra.mxu0 %v7134_v54  ;;  %v7359_v61 = vcombine.high %v1018_v43, %v1026_v45  ;;  %v698_v18 = vld [vmem:[#allocation8 + $0x430] sm:$0xff]  ;;  %v7358_v14 = vcombine.low %v1018_v43, %v1026_v45  ;;  %v9127_v43 = vpop.f32.mrf.mxu0 }
 0x283   :  { %4292 = vmatpush1.bf16.msra.mxu1 %v7182_v21  ;;  %4256 = vmatprep.subr.bf16.mxu0 %v7119_v56  ;;  %v706_v54 = vld [vmem:[#allocation8 + $0x470] sm:$0xff] }
 0x284   :  { %4293 = vmatprep.subr.bf16.mxu1 %v7167_v59  ;;  %v1002_v21 = vld [vmem:[#allocation8 + $0xdb0] sm:$0xff]  ;;  %v7054_v59 = vcombine.low %v714_v39, %v722_v42  ;;  %v7039_v1 = vcombine.high %v698_v18, %v706_v54 }
 0x285   :  { %v1010_v56 = vld [vmem:[#allocation8 + $0xdf0] sm:$0xff] }
 0x286   :  { %4257 = vmatpush2.bf16.msra.mxu0 %v7118_v22  ;;  %v7343_v4 = vcombine.high %v1002_v21, %v1010_v56  ;;  %v691_v22 = vld [vmem:[#allocation8 + $0x3f8] sm:$0xff]  ;;  %v7342_v37 = vcombine.low %v1002_v21, %v1010_v56 }
 0x287   :  { %4294 = vmatpush1.bf16.msra.mxu1 %v7166_v23  ;;  %4258 = vmatprep.subr.bf16.mxu0 %v7103_v12  ;;  %v986_v23 = vld [vmem:[#allocation8 + $0xd30] sm:$0xff]  ;;  %v7025_v5 = vcombine.high %v683_v17, %v691_v22 }
 0x288   :  { %4295 = vmatprep.subr.bf16.mxu1 %v7407_v27  ;;  %v994_v12 = vld [vmem:[#allocation8 + $0xd70] sm:$0xff]  ;;  %v7038_v27 = vcombine.low %v698_v18, %v706_v54  ;;  %v947_v18 = vld [vmem:[#allocation8 + $0xbf8] sm:$0xff] }
 0x289   :  { %v7327_v33 = vcombine.high %v986_v23, %v994_v12  ;;  %v7326_v40 = vcombine.low %v986_v23, %v994_v12  ;;  %v627_v23 = vld [vmem:[#allocation8 + $0x1f8] sm:$0xff] }
 0x28a   :  { %4259 = vmatpush2.bf16.msra.mxu0 %v7102_v50  ;;  %v675_v50 = vld [vmem:[#allocation8 + $0x378] sm:$0xff] }
 0x28b   :  { %4296 = vmatpush2.bf16.msra.mxu1 %v7406_v29  ;;  %4260 = vmatprep.subr.bf16.mxu0 %v7087_v34  ;;  %v970_v29 = vld [vmem:[#allocation8 + $0xcb0] sm:$0xff]  ;;  %v7009_v55 = vcombine.high %v667_v38, %v675_v50 }
 0x28c   :  { %4297 = vmatprep.subr.bf16.mxu1 %v7391_v31  ;;  %v978_v34 = vld [vmem:[#allocation8 + $0xcf0] sm:$0xff]  ;;  %v7024_v31 = vcombine.low %v683_v17, %v691_v22  ;;  %v931_v17 = vld [vmem:[#allocation8 + $0xb78] sm:$0xff] }
 0x28d   :  { %v7311_v47 = vcombine.high %v970_v29, %v978_v34  ;;  %v7310_v39 = vcombine.low %v970_v29, %v978_v34  ;;  %v619_v22 = vld [vmem:[#allocation8 + $0x1b8] sm:$0xff] }
 0x28e   :  { %4261 = vmatpush2.bf16.msra.mxu0 %v7086_v48  ;;  %v659_v48 = vld [vmem:[#allocation8 + $0x2f8] sm:$0xff] }
 0x28f   :  { %4298 = vmatpush2.bf16.msra.mxu1 %v7390_v28  ;;  %4262 = vmatprep.subr.bf16.mxu0 %v7071_v52  ;;  %v954_v28 = vld [vmem:[#allocation8 + $0xc30] sm:$0xff]  ;;  %v6993_v42 = vcombine.high %v651_v24, %v659_v48  ;;  %v6992_v21 = vcombine.low %v651_v24, %v659_v48  ;;  %v611_v29 = vld [vmem:[#allocation8 + $0x178] sm:$0xff]  ;;  %v6960_v24 = vcombine.low %v619_v22, %v627_v23 }
 0x290   :  { %4299 = vmatprep.subr.bf16.mxu1 %v7375_v19  ;;  %v962_v52 = vld [vmem:[#allocation8 + $0xc70] sm:$0xff]  ;;  %v7008_v19 = vcombine.low %v667_v38, %v675_v50  ;;  %v6961_v38 = vcombine.high %v619_v22, %v627_v23  ;;  %v603_v50 = vld [vmem:[#allocation8 + $0x138] sm:$0xff] }
 0x291   :  { %v7295_v45 = vcombine.high %v954_v28, %v962_v52  ;;  %v875_v23 = vld [vmem:[#allocation8 + $0x9b8] sm:$0xff] }
 0x292   :  { %4263 = vmatpush2.bf16.msra.mxu0 %v7070_v35  ;;  %v635_v35 = vld [vmem:[#allocation8 + $0x238] sm:$0xff] }
 0x293   :  { %4300 = vmatpush2.bf16.msra.mxu1 %v7374_v20  ;;  %4264 = vmatprep.subr.bf16.mxu0 %v7055_v0  ;;  %v643_v20 = vld [vmem:[#allocation8 + $0x278] sm:$0xff]  ;;  %v1106_v0 = vsub.s32 6, %v9059_v9 }
 0x294   :  { %4301 = vmatprep.subr.bf16.mxu1 %v7359_v61  ;;  %v939_v61 = vld [vmem:[#allocation8 + $0xbb8] sm:$0xff]  ;;  %v6977_v56 = vcombine.high %v635_v35, %v643_v20 }
 0x295   :  { %v7951_v51 = vld [vmem:[#allocation11 + $0x380] ss:$8 sps:$4 sm:$0xff]  }
 0x296   :  { %4265 = vmatpush2.bf16.msra.mxu0 %v7054_v59  ;;  %v7281_v59 = vcombine.high %v939_v61, %v947_v18  ;;  %v7968_v10 = vld [vmem:[#allocation14 + $0x44] ss:$8 sps:$4 sm:$0xff]  }
 0x297   :  { %4302 = vmatpush2.bf16.msra.mxu1 %v7358_v14  ;;  %4266 = vmatprep.subr.bf16.mxu0 %v7039_v1  ;;  %v923_v14 = vld [vmem:[#allocation8 + $0xb38] sm:$0xff]  ;;  %v9130_v1 = vld [vmem:[#allocation9] sm:$0xff] }
 0x298   :  { %4303 = vmatprep.subr.bf16.mxu1 %v7343_v4  ;;  %v1107_v4 = vrot.slane %v9130_v1, %v1106_v0 }
 0x29a   :  { %4267 = vmatpush2.bf16.msra.mxu0 %v7038_v27  ;;  %v6976_v27 = vcombine.low %v635_v35, %v643_v20  ;;  %v891_v20 = vld [vmem:[#allocation8 + $0xa38] sm:$0xff] }
 0x29b   :  { %4304 = vmatpush2.bf16.msra.mxu1 %v7342_v37  ;;  %4322 = vmatprep.subr.bf16.mxu0 %v7025_v5  ;;  %v7280_v37 = vcombine.low %v939_v61, %v947_v18  ;;  %v9137_v5 = vpop.f32.mrf.mxu1  ;;  %v899_v61 = vld [vmem:[#allocation8 + $0xa78] sm:$0xff] }
 0x29c   :  { %4305 = vmatprep.subr.bf16.mxu1 %v7327_v33  ;;  %v7265_v33 = vcombine.high %v923_v14, %v931_v17 }
 0x29d   :  { %4269 = vmatmul.mubr.bf16.vlgmr.msra.gmra.mxu0 %v9031_v16  ;;  %v4012_v54 = vpop.f32.mrf.mxu0 }
 0x29e   :  { %4323 = vmatpush1.bf16.msra.mxu0 %v7024_v31  ;;  %4354 = vmatprep.mubr.bf16.mxu0 %v9027_v25  ;;  %v7294_v25 = vcombine.low %v954_v28, %v962_v52  ;;  %v4013_v34 = vadd.f32 %v4012_v54, %v1107_v4  ;;  %v907_v31 = vld [vmem:[#allocation8 + $0xab8] sm:$0xff]  ;;  %v7264_v28 = vcombine.low %v923_v14, %v931_v17 }
 0x29f   :  { %4306 = vmatpush2.bf16.msra.mxu1 %v7326_v40  ;;  %4324 = vmatprep.subr.bf16.mxu0 %v7009_v55  ;;  %v9135_v12 = vpop.f32.mrf.mxu0  ;;  %v915_v40 = vld [vmem:[#allocation8 + $0xaf8] sm:$0xff]  ;;  %v6945_v52 = vcombine.high %v603_v50, %v611_v29  ;;  %v6944_v54 = vcombine.low %v603_v50, %v611_v29 }
 0x2a0   :  { %4307 = vmatprep.subr.bf16.mxu1 %v7311_v47  ;;  %v571_v14 = vld [vmem:[#allocation8 + $0x38] sm:$0xff] }
 0x2a1   :  { %v4016_v55 = vpop.f32.mrf.mxu0  ;;  %v579_v17 = vld [vmem:[#allocation8 + $0x78] sm:$0xff] }
 0x2a2   :  { %4325 = vmatpush1.bf16.msra.mxu0 %v7008_v19  ;;  %v4017_v35 = vadd.f32 %v4016_v55, %v1107_v4  ;;  %v883_v4 = vld [vmem:[#allocation8 + $0x9f8] sm:$0xff]  ;;  %v6913_v50 = vcombine.high %v571_v14, %v579_v17 }
 0x2a3   :  { %4308 = vmatpush2.bf16.msra.mxu1 %v7310_v39  ;;  %4326 = vmatprep.subr.bf16.mxu0 %v6993_v42  ;;  %v7249_v39 = vcombine.high %v907_v31, %v915_v40  ;;  %v587_v42 = vld [vmem:[#allocation8 + $0xb8] sm:$0xff] }
 0x2a4   :  { %4309 = vmatprep.subr.bf16.mxu1 %v7295_v45  ;;  %v595_v45 = vld [vmem:[#allocation8 + $0xf8] sm:$0xff] }
 0x2a5   :  { %v859_v55 = vld [vmem:[#allocation8 + $0x938] sm:$0xff] }
 0x2a6   :  { %4327 = vmatpush1.bf16.msra.mxu0 %v6992_v21 }
 0x2a7   :  { %4310 = vmatpush2.bf16.msra.mxu1 %v7294_v25  ;;  %4328 = vmatprep.subr.bf16.mxu0 %v6977_v56  ;;  %v7248_v56 = vcombine.low %v907_v31, %v915_v40  ;;  %v811_v31 = vld [vmem:[#allocation8 + $0x7b8] sm:$0xff] }
 0x2a8   :  { %4365 = vmatprep.subr.bf16.mxu1 %v7281_v59  ;;  %v7233_v59 = vcombine.high %v891_v20, %v899_v61  ;;  %v819_v40 = vld [vmem:[#allocation8 + $0x7f8] sm:$0xff] }
 0x2aa   :  { %v4055_v47 = vpop.f32.mrf.mxu1  ;;  %4312 = vmatmul.mubr.bf16.vlgmr.msra.gmra.mxu1 %v9043_v30  ;;  %4329 = vmatpush1.bf16.msra.mxu0 %v6976_v27  ;;  %v7232_v27 = vcombine.low %v891_v20, %v899_v61  ;;  %v7152_v20 = vcombine.low %v811_v31, %v819_v40 }
 0x2ab   :  { %v4056_v48 = vadd.f32 %v4055_v47, %v4013_v34  ;;  %4366 = vmatpush1.bf16.msra.mxu1 %v7280_v37  ;;  %4397 = vmatprep.mubr.bf16.mxu1 %v9040_v53  ;;  %v6929_v53 = vcombine.high %v587_v42, %v595_v45  ;;  %v6928_v37 = vcombine.low %v587_v42, %v595_v45  ;;  %v867_v47 = vld [vmem:[#allocation8 + $0x978] sm:$0xff] }
 0x2ac   :  { %v9141_v19 = vpop.f32.mrf.mxu1  ;;  %4367 = vmatprep.subr.bf16.mxu1 %v7265_v33  ;;  %4330 = vmatprep.subr.bf16.mxu0 %v6961_v38  ;;  %v7217_v34 = vcombine.high %v875_v23, %v883_v4  ;;  %v803_v42 = vld [vmem:[#allocation8 + $0x778] sm:$0xff]  ;;  %v7200_v61 = vcombine.low %v859_v55, %v867_v47 }
 0x2ad   :  { %v4446_v21 = vmul.f32 0.1, %v4056_v48  ;;  %vm4414_vm8 = vcmp.gt.f32.partialorder %v4056_v48, 0.0  ;;  %v843_v45 = vld [vmem:[#allocation8 + $0x8b8] sm:$0xff] }
 0x2ae   :  { %v4059_v18 = vpop.f32.mrf.mxu1  ;;  %4331 = vmatpush1.bf16.msra.mxu0 %v6960_v24  ;;  %v6912_v24 = vcombine.low %v571_v14, %v579_v17 }
 0x2af   :  { %v4060_v25 = vadd.f32 %v4059_v18, %v4017_v35  ;;  %4368 = vmatpush1.bf16.msra.mxu1 %v7264_v28  ;;  %4332 = vmatprep.subr.bf16.mxu0 %v6945_v52  ;;  %v9143_v33 = vsel %vm4414_vm8, %v4056_v48, %v4446_v21  ;;  %v7216_v28 = vcombine.low %v875_v23, %v883_v4  ;;  %v851_v35 = vld [vmem:[#allocation8 + $0x8f8] sm:$0xff] }
 0x2b0   :  { %4369 = vmatprep.subr.bf16.mxu1 %v7249_v39  ;;  %v7153_v48 = vcombine.high %v811_v31, %v819_v40  ;;  %v7201_v52 = vcombine.high %v859_v55, %v867_v47  ;;  %v795_v39 = vld [vmem:[#allocation8 + $0x738] sm:$0xff]  ;;  %v7184_v14 = vcombine.low %v843_v45, %v851_v35 }
 0x2b1   :  { %vm4430_vm9 = vcmp.gt.f32.partialorder %v4060_v25, 0.0  ;;  %v4462_v22 = vmul.f32 0.1, %v4060_v25  ;;  %v7137_v18 = vcombine.high %v795_v39, %v803_v42  ;;  %v779_v21 = vld [vmem:[#allocation8 + $0x6b8] sm:$0xff] }
 0x2b2   :  { %4333 = vmatpush1.bf16.msra.mxu0 %v6944_v54  ;;  %v7185_v54 = vcombine.high %v843_v45, %v851_v35  ;;  %v763_v23 = vld [vmem:[#allocation8 + $0x638] sm:$0xff] }
 0x2b3   :  { %v9145_v38 = vsel %vm4430_vm9, %v4060_v25, %v4462_v22  ;;  %4370 = vmatpush1.bf16.msra.mxu1 %v7248_v56  ;;  %4334 = vmatprep.subr.bf16.mxu0 %v6929_v53  ;;  %v787_v25 = vld [vmem:[#allocation8 + $0x6f8] sm:$0xff] }
 0x2b4   :  { %v4510_v29 = vpack.c.bf16 %v9145_v38, %v9143_v33  ;;  %4371 = vmatprep.subr.bf16.mxu1 %v7233_v59  ;;  %v827_v56 = vld [vmem:[#allocation8 + $0x838] sm:$0xff]  ;;  %v7136_v59 = vcombine.low %v795_v39, %v803_v42  ;;  %v7121_v17 = vcombine.high %v779_v21, %v787_v25  ;;  %v7969_v33 = vld [vmem:[#allocation14 + $0x150] ss:$8 sps:$4 sm:$0xff]   ;;  %v7986_v38 = vld [vmem:[#allocation14 + $0x14] ss:$8 sps:$4 sm:$0xff]  }
 0x2b5   :  { %v835_v53 = vld [vmem:[#allocation8 + $0x878] sm:$0xff] }
 0x2b6   :  { %4335 = vmatpush1.bf16.msra.mxu0 %v6928_v37  ;;  %v7169_v22 = vcombine.high %v827_v56, %v835_v53  ;;  %v771_v4 = vld [vmem:[#allocation8 + $0x678] sm:$0xff] }
 0x2b7   :  { %4372 = vmatpush1.bf16.msra.mxu1 %v7232_v27  ;;  %4336 = vmatprep.subr.bf16.mxu0 %v6913_v50  ;;  %v1067_v27 = vld [vmem:[#allocation8 + $0xfb8] sm:$0xff]  ;;  %v7120_v50 = vcombine.low %v779_v21, %v787_v25  ;;  %v7105_v31 = vcombine.high %v763_v23, %v771_v4 }
 0x2b8   :  { %4373 = vmatprep.subr.bf16.mxu1 %v7217_v34  ;;  %v1075_v37 = vld [vmem:[#allocation8 + $0xff8] sm:$0xff]  ;;  %v7168_v34 = vcombine.low %v827_v56, %v835_v53 }
 0x2b9   :  { %v7409_v40 = vcombine.high %v1067_v27, %v1075_v37  ;;  %v747_v55 = vld [vmem:[#allocation8 + $0x5b8] sm:$0xff] }
 0x2ba   :  { %4337 = vmatpush1.bf16.msra.mxu0 %v6912_v24  ;;  %v755_v47 = vld [vmem:[#allocation8 + $0x5f8] sm:$0xff] }
 0x2bb   :  { %4374 = vmatpush1.bf16.msra.mxu1 %v7216_v28  ;;  %4338 = vmatprep.subr.bf16.mxu0 %v7153_v48  ;;  %v1051_v24 = vld [vmem:[#allocation8 + $0xf38] sm:$0xff]  ;;  %v7104_v48 = vcombine.low %v763_v23, %v771_v4  ;;  %v7089_v39 = vcombine.high %v747_v55, %v755_v47 }
 0x2bc   :  { %4375 = vmatprep.subr.bf16.mxu1 %v7201_v52  ;;  %v1059_v28 = vld [vmem:[#allocation8 + $0xf78] sm:$0xff]  ;;  %v7408_v52 = vcombine.low %v1067_v27, %v1075_v37 }
 0x2bd   :  { %v7393_v42 = vcombine.high %v1051_v24, %v1059_v28  ;;  %v731_v45 = vld [vmem:[#allocation8 + $0x538] sm:$0xff]  ;;  %v7392_v21 = vcombine.low %v1051_v24, %v1059_v28 }
 0x2be   :  { %4339 = vmatpush2.bf16.msra.mxu0 %v7152_v20  ;;  %v739_v35 = vld [vmem:[#allocation8 + $0x578] sm:$0xff]  ;;  %v9150_v20 = vsub.s32 1, %v9059_v9 }
 0x2bf   :  { %4376 = vmatpush1.bf16.msra.mxu1 %v7200_v61  ;;  %4340 = vmatprep.subr.bf16.mxu0 %v7137_v18  ;;  %v1035_v61 = vld [vmem:[#allocation8 + $0xeb8] sm:$0xff]  ;;  %v7073_v25 = vcombine.high %v731_v45, %v739_v35  ;;  %v7072_v23 = vcombine.low %v731_v45, %v739_v35 }
 0x2c0   :  { %4377 = vmatprep.subr.bf16.mxu1 %v7185_v54  ;;  %v1043_v18 = vld [vmem:[#allocation8 + $0xef8] sm:$0xff]  ;;  %v7088_v54 = vcombine.low %v747_v55, %v755_v47 }
 0x2c1   :  { %v7377_v56 = vcombine.high %v1035_v61, %v1043_v18  ;;  %v715_v53 = vld [vmem:[#allocation8 + $0x4b8] sm:$0xff]  ;;  %v7376_v27 = vcombine.low %v1035_v61, %v1043_v18 }
 0x2c2   :  { %4341 = vmatpush2.bf16.msra.mxu0 %v7136_v59  ;;  %v723_v59 = vld [vmem:[#allocation8 + $0x4f8] sm:$0xff] }
 0x2c3   :  { %4378 = vmatpush1.bf16.msra.mxu1 %v7184_v14  ;;  %4342 = vmatprep.subr.bf16.mxu0 %v7121_v17  ;;  %v1087_v14 = vrot.slane %v9130_v1, %v9150_v20  ;;  %v1019_v17 = vld [vmem:[#allocation8 + $0xe38] sm:$0xff]  ;;  %v7057_v37 = vcombine.high %v715_v53, %v723_v59  ;;  %v7056_v28 = vcombine.low %v715_v53, %v723_v59  ;;  %v7759_v59 = vld [vmem:[#allocation11 + $0x70] ss:$8 sps:$4 sm:$0xff]  }
 0x2c4   :  { %4379 = vmatprep.subr.bf16.mxu1 %v7169_v22  ;;  %v1027_v22 = vld [vmem:[#allocation8 + $0xe78] sm:$0xff] }
 0x2c5   :  { %v3761_v4 = vadd.f32 %v9083_v3, %v1087_v14  ;;  %v1003_v47 = vld [vmem:[#allocation8 + $0xdb8] sm:$0xff]  ;;  %v7360_v3 = vcombine.low %v1019_v17, %v1027_v22 }
 0x2c6   :  { %4343 = vmatpush2.bf16.msra.mxu0 %v7120_v50  ;;  %v7361_v50 = vcombine.high %v1019_v17, %v1027_v22  ;;  %v1011_v24 = vld [vmem:[#allocation8 + $0xdf8] sm:$0xff] }
 0x2c7   :  { %4380 = vmatpush1.bf16.msra.mxu1 %v7168_v34  ;;  %4344 = vmatprep.subr.bf16.mxu0 %v7105_v31  ;;  %v699_v34 = vld [vmem:[#allocation8 + $0x438] sm:$0xff]  ;;  %v3804_v55 = vadd.f32 %v9091_v2, %v3761_v4  ;;  %v7344_v18 = vcombine.low %v1003_v47, %v1011_v24 }
 0x2c8   :  { %4381 = vmatprep.subr.bf16.mxu1 %v7409_v40  ;;  %v707_v31 = vld [vmem:[#allocation8 + $0x478] sm:$0xff]  ;;  %v3757_v40 = vadd.f32 %v9069_v7, %v1087_v14  ;;  %v1094_v7 = vsub.s32 3, %v9059_v9 }
 0x2c9   :  { %v987_v45 = vld [vmem:[#allocation8 + $0xd38] sm:$0xff]  ;;  %vm4425_vm10 = vcmp.gt.f32.partialorder %v3804_v55, 0.0  ;;  %v7040_v2 = vcombine.low %v699_v34, %v707_v31 }
 0x2ca   :  { %4345 = vmatpush2.bf16.msra.mxu0 %v7104_v48  ;;  %v3800_v48 = vadd.f32 %v9073_v36, %v3757_v40  ;;  %v995_v35 = vld [vmem:[#allocation8 + $0xd78] sm:$0xff]  ;;  %v1095_v53 = vrot.slane %v9130_v1, %v1094_v7 }
 0x2cb   :  { %4382 = vmatpush2.bf16.msra.mxu1 %v7408_v52  ;;  %4346 = vmatprep.subr.bf16.mxu0 %v7089_v39  ;;  %v7041_v52 = vcombine.high %v699_v34, %v707_v31  ;;  %v7345_v39 = vcombine.high %v1003_v47, %v1011_v24  ;;  %v7329_v36 = vcombine.high %v987_v45, %v995_v35  ;;  %v7764_v22 = vld [vmem:[#allocation11 + $0x64] ss:$8 sps:$4 sm:$0xff]   ;;  %v7762_v40 = vld [vmem:[#allocation11 + $0x60] ss:$8 sps:$4 sm:$0xff]   ;;  %v7770_v47 = vld [vmem:[#allocation11 + $0x54] ss:$8 sps:$4 sm:$0xff]   ;;  %v9167_v24 = vpop.f32.mrf.mxu0 }
 0x2cc   :  { %4383 = vmatprep.subr.bf16.mxu1 %v7393_v42  ;;  %v4457_v42 = vmul.f32 0.1, %v3804_v55  ;;  %v4441_v61 = vmul.f32 0.1, %v3800_v48  ;;  %vm4409_vm11 = vcmp.gt.f32.partialorder %v3800_v48, 0.0  ;;  %v7328_v14 = vcombine.low %v987_v45, %v995_v35 }
 0x2cd   :  { %v3843_v34 = vadd.f32 %v9089_v32, %v1095_v53  ;;  %v7768_v32 = vld [vmem:[#allocation11 + $0x50] ss:$8 sps:$4 sm:$0xff]  }
 0x2ce   :  { %4347 = vmatpush2.bf16.msra.mxu0 %v7088_v54  ;;  %v7761_v54 = vld [vmem:[#allocation11 + $0x74] ss:$8 sps:$4 sm:$0xff]   ;;  %v4473_v17 = vsel %vm4409_vm11, %v3800_v48, %v4441_v61  ;;  %v7765_v61 = vld [vmem:[#allocation11 + $0x170] ss:$8 sps:$4 sm:$0xff]  }
 0x2cf   :  { %4384 = vmatpush2.bf16.msra.mxu1 %v7392_v21  ;;  %4348 = vmatprep.subr.bf16.mxu0 %v7073_v25  ;;  %v971_v21 = vld [vmem:[#allocation8 + $0xcb8] sm:$0xff]  ;;  %v9169_v48 = vld [vmem:[#allocation9 + $0x8] sm:$0xff] }
 0x2d0   :  { %4385 = vmatprep.subr.bf16.mxu1 %v7377_v56  ;;  %v979_v25 = vld [vmem:[#allocation8 + $0xcf8] sm:$0xff]  ;;  %v4489_v56 = vsel %vm4425_vm10, %v3804_v55, %v4457_v42  ;;  %v7767_v42 = vld [vmem:[#allocation11 + $0x174] ss:$8 sps:$4 sm:$0xff]  }
 0x2d1   :  { %v7313_v4 = vcombine.high %v971_v21, %v979_v25  ;;  %v7312_v55 = vcombine.low %v971_v21, %v979_v25  ;;  %v7782_v21 = vld [vmem:[#allocation11 + $0x34] ss:$8 sps:$4 sm:$0xff]  }
 0x2d2   :  { %4349 = vmatpush2.bf16.msra.mxu0 %v7072_v23  ;;  %v3847_v23 = vadd.f32 %v9105_v26, %v1095_v53  ;;  %v3886_v26 = vadd.f32 %v9095_v60, %v3843_v34  ;;  %v1115_v60 = vrot.slane %v9169_v48, %v9063_v13  ;;  %v7786_v34 = vld [vmem:[#allocation11 + $0x20] ss:$8 sps:$4 sm:$0xff]  }
 0x2d3   :  { %4386 = vmatpush2.bf16.msra.mxu1 %v7376_v27  ;;  %4350 = vmatprep.subr.bf16.mxu0 %v7057_v37  ;;  %v4505_v27 = vpack.c.bf16 %v4489_v56, %v4473_v17  ;;  %v955_v37 = vld [vmem:[#allocation8 + $0xc38] sm:$0xff] }
 0x2d4   :  { %4387 = vmatprep.subr.bf16.mxu1 %v7361_v50  ;;  %v963_v50 = vld [vmem:[#allocation8 + $0xc78] sm:$0xff]  ;;  %v3890_v31 = vadd.f32 %v9113_v6, %v3847_v23  ;;  %vm4411_vm13 = vcmp.gt.f32.partialorder %v3886_v26, 0.0 }
 0x2d5   :  { %v7296_v6 = vcombine.low %v955_v37, %v963_v50  ;;  %v7788_v23 = vld [vmem:[#allocation11 + $0x24] ss:$8 sps:$4 sm:$0xff]  }
 0x2d6   :  { %4351 = vmatpush2.bf16.msra.mxu0 %v7056_v28  ;;  %v7297_v28 = vcombine.high %v955_v37, %v963_v50  ;;  %vm4427_vm12 = vcmp.gt.f32.partialorder %v3890_v31, 0.0 }
 0x2d7   :  { %4388 = vmatpush2.bf16.msra.mxu1 %v7360_v3  ;;  %4352 = vmatprep.subr.bf16.mxu0 %v7041_v52  ;;  %v7776_v52 = vld [vmem:[#allocation11 + $0x44] ss:$8 sps:$4 sm:$0xff]  }
 0x2d8   :  { %4389 = vmatprep.subr.bf16.mxu1 %v7345_v39  ;;  %v4443_v39 = vmul.f32 0.1, %v3886_v26 }
 0x2da   :  { %4353 = vmatpush2.bf16.msra.mxu0 %v7040_v2  ;;  %v7774_v2 = vld [vmem:[#allocation11 + $0x40] ss:$8 sps:$4 sm:$0xff]  }
 0x2db   :  { %4390 = vmatpush2.bf16.msra.mxu1 %v7344_v18  ;;  %5300 = vmatprep.subr.bf16.mxu0 %v7761_v54  ;;  %v9175_v18 = vpop.f32.mrf.mxu1  ;;  %v4475_v54 = vsel %vm4411_vm13, %v3886_v26, %v4443_v39  ;;  %v7791_v39 = vld [vmem:[#allocation11 + $0x134] ss:$8 sps:$4 sm:$0xff]  }
 0x2dc   :  { %4391 = vmatprep.subr.bf16.mxu1 %v7329_v36  ;;  %v7773_v36 = vld [vmem:[#allocation11 + $0x164] ss:$8 sps:$4 sm:$0xff]  }
 0x2dd   :  { %4355 = vmatmul.mubr.bf16.vlgmr.msra.gmra.mxu0 %v9031_v16  ;;  %v4459_v16 = vmul.f32 0.1, %v3890_v31  ;;  %v4098_v3 = vpop.f32.mrf.mxu0 }
 0x2de   :  { %5301 = vmatpush1.bf16.msra.mxu0 %v7759_v59  ;;  %5332 = vmatprep.mubr.bf16.mxu0 %v4505_v27  ;;  %v4099_v25 = vadd.f32 %v4098_v3, %v1115_v60  ;;  %v7779_v27 = vld [vmem:[#allocation11 + $0x154] ss:$8 sps:$4 sm:$0xff]  }
 0x2df   :  { %4392 = vmatpush2.bf16.msra.mxu1 %v7328_v14  ;;  %5302 = vmatprep.subr.bf16.mxu0 %v7764_v22  ;;  %v9173_v45 = vpop.f32.mrf.mxu0  ;;  %v4491_v35 = vsel %vm4427_vm12, %v3890_v31, %v4459_v16  ;;  %v7780_v14 = vld [vmem:[#allocation11 + $0x30] ss:$8 sps:$4 sm:$0xff]   ;;  %v7771_v22 = vld [vmem:[#allocation11 + $0x160] ss:$8 sps:$4 sm:$0xff]  }
 0x2e0   :  { %4393 = vmatprep.subr.bf16.mxu1 %v7313_v4  ;;  %v4507_v56 = vpack.c.bf16 %v4491_v35, %v4475_v54  ;;  %v7806_v35 = vld [vmem:[#allocation11 + $0xf4] ss:$8 sps:$4 sm:$0xff]   ;;  %v7795_v54 = vld [vmem:[#allocation11 + $0x120] ss:$8 sps:$4 sm:$0xff]  }
 0x2e1   :  { %v4102_v53 = vpop.f32.mrf.mxu0 }
 0x2e2   :  { %5303 = vmatpush1.bf16.msra.mxu0 %v7762_v40  ;;  %v4103_v37 = vadd.f32 %v4102_v53, %v1115_v60  ;;  %v7789_v60 = vld [vmem:[#allocation11 + $0x130] ss:$8 sps:$4 sm:$0xff]   ;;  %v7818_v53 = vld [vmem:[#allocation11 + $0xd4] ss:$8 sps:$4 sm:$0xff]  }
 0x2e3   :  { %4394 = vmatpush2.bf16.msra.mxu1 %v7312_v55  ;;  %5304 = vmatprep.subr.bf16.mxu0 %v7770_v47  ;;  %v7794_v55 = vld [vmem:[#allocation11 + $0x14] ss:$8 sps:$4 sm:$0xff]   ;;  %v7785_v47 = vld [vmem:[#allocation11 + $0x144] ss:$8 sps:$4 sm:$0xff]  }
 0x2e4   :  { %4395 = vmatprep.subr.bf16.mxu1 %v7297_v28  ;;  %v7792_v28 = vld [vmem:[#allocation11 + $0x10] ss:$8 sps:$4 sm:$0xff]  }
 0x2e6   :  { %5305 = vmatpush1.bf16.msra.mxu0 %v7768_v32  ;;  %v7783_v32 = vld [vmem:[#allocation11 + $0x140] ss:$8 sps:$4 sm:$0xff]  }
 0x2e7   :  { %4396 = vmatpush2.bf16.msra.mxu1 %v7296_v6  ;;  %5306 = vmatprep.subr.bf16.mxu0 %v7776_v52  ;;  %v7800_v6 = vld [vmem:[#allocation11 + $0x4] ss:$8 sps:$4 sm:$0xff]  }
 0x2e8   :  { %5343 = vmatprep.subr.bf16.mxu1 %v7767_v42  ;;  %v7798_v42 = vld [vmem:[#allocation11] ss:$8 sps:$4 sm:$0xff]  }
 0x2ea   :  { %v4141_v59 = vpop.f32.mrf.mxu1  ;;  %4398 = vmatmul.mubr.bf16.vlgmr.msra.gmra.mxu1 %v9043_v30  ;;  %5307 = vmatpush1.bf16.msra.mxu0 %v7774_v2  ;;  %v7777_v30 = vld [vmem:[#allocation11 + $0x150] ss:$8 sps:$4 sm:$0xff]   ;;  %v7797_v2 = vld [vmem:[#allocation11 + $0x124] ss:$8 sps:$4 sm:$0xff]  }
 0x2eb   :  { %v4142_v17 = vadd.f32 %v4141_v59, %v4099_v25  ;;  %5344 = vmatpush1.bf16.msra.mxu1 %v7765_v61  ;;  %5375 = vmatprep.mubr.bf16.mxu1 %v4507_v56  ;;  %v7804_v61 = vld [vmem:[#allocation11 + $0xf0] ss:$8 sps:$4 sm:$0xff]   ;;  %v7810_v25 = vld [vmem:[#allocation11 + $0xe0] ss:$8 sps:$4 sm:$0xff]   ;;  %v7809_v59 = vld [vmem:[#allocation11 + $0x104] ss:$8 sps:$4 sm:$0xff]  }
 0x2ec   :  { %v9178_v4 = vpop.f32.mrf.mxu1  ;;  %5345 = vmatprep.subr.bf16.mxu1 %v7773_v36  ;;  %5308 = vmatprep.subr.bf16.mxu0 %v7782_v21  ;;  %v7812_v36 = vld [vmem:[#allocation11 + $0xe4] ss:$8 sps:$4 sm:$0xff]   ;;  %v7803_v21 = vld [vmem:[#allocation11 + $0x114] ss:$8 sps:$4 sm:$0xff]   ;;  %v7801_v56 = vld [vmem:[#allocation11 + $0x110] ss:$8 sps:$4 sm:$0xff]  }
 0x2ed   :  { %v4448_v31 = vmul.f32 0.1, %v4142_v17  ;;  %vm4416_vm14 = vcmp.gt.f32.partialorder %v4142_v17, 0.0 }
 0x2ee   :  { %v4145_v50 = vpop.f32.mrf.mxu1  ;;  %5309 = vmatpush1.bf16.msra.mxu0 %v7780_v14  ;;  %v7816_v14 = vld [vmem:[#allocation11 + $0xd0] ss:$8 sps:$4 sm:$0xff]  }
 0x2ef   :  { %v4146_v40 = vadd.f32 %v4145_v50, %v4103_v37  ;;  %5346 = vmatpush1.bf16.msra.mxu1 %v7771_v22  ;;  %5310 = vmatprep.subr.bf16.mxu0 %v7788_v23  ;;  %v9180_v16 = vsel %vm4416_vm14, %v4142_v17, %v4448_v31  ;;  %v7807_v17 = vld [vmem:[#allocation11 + $0x100] ss:$8 sps:$4 sm:$0xff]   ;;  %v7824_v22 = vld [vmem:[#allocation11 + $0xc4] ss:$8 sps:$4 sm:$0xff]   ;;  %v7815_v23 = vld [vmem:[#allocation11 + $0x1f4] ss:$8 sps:$4 sm:$0xff]  }
 0x2f0   :  { %5347 = vmatprep.subr.bf16.mxu1 %v7779_v27  ;;  %v7822_v27 = vld [vmem:[#allocation11 + $0xc0] ss:$8 sps:$4 sm:$0xff]   ;;  %v7813_v37 = vld [vmem:[#allocation11 + $0x1f0] ss:$8 sps:$4 sm:$0xff]   ;;  %v7830_v50 = vld [vmem:[#allocation11 + $0xb4] ss:$8 sps:$4 sm:$0xff]  }
 0x2f1   :  { %vm4432_vm15 = vcmp.gt.f32.partialorder %v4146_v40, 0.0  ;;  %v4464_v26 = vmul.f32 0.1, %v4146_v40  ;;  %v1102_v31 = vsub.s32 5, %v9059_v9 }
 0x2f2   :  { %5311 = vmatpush1.bf16.msra.mxu0 %v7786_v34  ;;  %v7821_v34 = vld [vmem:[#allocation11 + $0x1e4] ss:$8 sps:$4 sm:$0xff]  }
 0x2f3   :  { %v9182_v3 = vsel %vm4432_vm15, %v4146_v40, %v4464_v26  ;;  %5348 = vmatpush1.bf16.msra.mxu1 %v7777_v30  ;;  %5312 = vmatprep.subr.bf16.mxu0 %v7794_v55  ;;  %v7828_v40 = vld [vmem:[#allocation11 + $0xb0] ss:$8 sps:$4 sm:$0xff]   ;;  %v7819_v30 = vld [vmem:[#allocation11 + $0x1e0] ss:$8 sps:$4 sm:$0xff]   ;;  %v7836_v55 = vld [vmem:[#allocation11 + $0xa4] ss:$8 sps:$4 sm:$0xff]   ;;  %v1103_v26 = vrot.slane %v9130_v1, %v1102_v31 }
 0x2f4   :  { %v4512_v52 = vpack.c.bf16 %v9182_v3, %v9180_v16  ;;  %5349 = vmatprep.subr.bf16.mxu1 %v7785_v47  ;;  %v7827_v47 = vld [vmem:[#allocation11 + $0x1d4] ss:$8 sps:$4 sm:$0xff]   ;;  %v8062_v3 = vld [vmem:[#allocation14 + $0x240] ss:$8 sps:$4 sm:$0xff]  }
 0x2f5   :  { %v8055_v16 = vld [vmem:[#allocation14 + $0x374] ss:$8 sps:$4 sm:$0xff]  }
 0x2f6   :  { %5313 = vmatpush1.bf16.msra.mxu0 %v7792_v28  ;;  %v7834_v28 = vld [vmem:[#allocation11 + $0xa0] ss:$8 sps:$4 sm:$0xff]  }
 0x2f7   :  { %5350 = vmatpush1.bf16.msra.mxu1 %v7783_v32  ;;  %5314 = vmatprep.subr.bf16.mxu0 %v7800_v6  ;;  %v3933_v32 = vadd.f32 %v9127_v43, %v1103_v26  ;;  %v7825_v6 = vld [vmem:[#allocation11 + $0x1d0] ss:$8 sps:$4 sm:$0xff]   ;;  %v7839_v43 = vld [vmem:[#allocation11 + $0x1b4] ss:$8 sps:$4 sm:$0xff]  }
 0x2f8   :  { %5351 = vmatprep.subr.bf16.mxu1 %v7791_v39  ;;  %v7842_v39 = vld [vmem:[#allocation11 + $0x94] ss:$8 sps:$4 sm:$0xff]  }
 0x2fa   :  { %5315 = vmatpush1.bf16.msra.mxu0 %v7798_v42  ;;  %v7833_v42 = vld [vmem:[#allocation11 + $0x1c4] ss:$8 sps:$4 sm:$0xff]  }
 0x2fb   :  { %5352 = vmatpush1.bf16.msra.mxu1 %v7789_v60  ;;  %5316 = vmatprep.subr.bf16.mxu0 %v7806_v35  ;;  %v3929_v60 = vadd.f32 %v9111_v15, %v1103_v26  ;;  %v3976_v35 = vadd.f32 %v9137_v5, %v3933_v32  ;;  %v7837_v15 = vld [vmem:[#allocation11 + $0x1b0] ss:$8 sps:$4 sm:$0xff]   ;;  %v7854_v5 = vld [vmem:[#allocation11 + $0x274] ss:$8 sps:$4 sm:$0xff]   ;;  %v9205_v26 = vpop.f32.mrf.mxu0 }
 0x2fc   :  { %5353 = vmatprep.subr.bf16.mxu1 %v7797_v2  ;;  %v7840_v2 = vld [vmem:[#allocation11 + $0x90] ss:$8 sps:$4 sm:$0xff]  }
 0x2fd   :  { %vm4429_vm0 = vcmp.gt.f32.partialorder %v3976_v35, 0.0 }
 0x2fe   :  { %5317 = vmatpush2.bf16.msra.mxu0 %v7804_v61  ;;  %v3972_v61 = vadd.f32 %v9117_v44, %v3929_v60  ;;  %v7845_v44 = vld [vmem:[#allocation11 + $0x1a4] ss:$8 sps:$4 sm:$0xff]   ;;  %v7870_v60 = vld [vmem:[#allocation11 + $0x240] ss:$8 sps:$4 sm:$0xff]  }
 0x2ff   :  { %5354 = vmatpush1.bf16.msra.mxu1 %v7795_v54  ;;  %5318 = vmatprep.subr.bf16.mxu0 %v7812_v36  ;;  %v7831_v54 = vld [vmem:[#allocation11 + $0x1c0] ss:$8 sps:$4 sm:$0xff]   ;;  %v7848_v36 = vld [vmem:[#allocation11 + $0x84] ss:$8 sps:$4 sm:$0xff]  }
 0x300   :  { %5355 = vmatprep.subr.bf16.mxu1 %v7803_v21  ;;  %v4461_v21 = vmul.f32 0.1, %v3976_v35  ;;  %vm4413_vm1 = vcmp.gt.f32.partialorder %v3972_v61, 0.0 }
 0x302   :  { %5319 = vmatpush2.bf16.msra.mxu0 %v7810_v25  ;;  %v1110_v25 = vsub.s32 7, %v9059_v9  ;;  %v8137_v9 = vld [vmem:[#allocation14 + $0x390] ss:$8 sps:$4 sm:$0xff]  }
 0x303   :  { %5356 = vmatpush1.bf16.msra.mxu1 %v7801_v56  ;;  %5320 = vmatprep.subr.bf16.mxu0 %v7818_v53  ;;  %v7846_v56 = vld [vmem:[#allocation11 + $0x80] ss:$8 sps:$4 sm:$0xff]   ;;  %v4445_v53 = vmul.f32 0.1, %v3972_v61 }
 0x304   :  { %5357 = vmatprep.subr.bf16.mxu1 %v7809_v59  ;;  %v4493_v59 = vsel %vm4429_vm0, %v3976_v35, %v4461_v21  ;;  %v7861_v35 = vld [vmem:[#allocation11 + $0x370] ss:$8 sps:$4 sm:$0xff]  }
 0x306   :  { %5321 = vmatpush2.bf16.msra.mxu0 %v7816_v14  ;;  %v1111_v14 = vrot.slane %v9130_v1, %v1110_v25 }
 0x307   :  { %5358 = vmatpush1.bf16.msra.mxu1 %v7807_v17  ;;  %5322 = vmatprep.subr.bf16.mxu0 %v7824_v22  ;;  %v7852_v17 = vld [vmem:[#allocation11 + $0x270] ss:$8 sps:$4 sm:$0xff]   ;;  %v7843_v22 = vld [vmem:[#allocation11 + $0x1a0] ss:$8 sps:$4 sm:$0xff]  }
 0x308   :  { %5359 = vmatprep.subr.bf16.mxu1 %v7815_v23  ;;  %v4477_v23 = vsel %vm4413_vm1, %v3972_v61, %v4445_v53 }
 0x30a   :  { %5323 = vmatpush2.bf16.msra.mxu0 %v7822_v27  ;;  %v7860_v27 = vld [vmem:[#allocation11 + $0x264] ss:$8 sps:$4 sm:$0xff]  }
 0x30b   :  { %5360 = vmatpush2.bf16.msra.mxu1 %v7813_v37  ;;  %5324 = vmatprep.subr.bf16.mxu0 %v7830_v50  ;;  %v4019_v37 = vadd.f32 %v9167_v24, %v1111_v14  ;;  %v7851_v50 = vld [vmem:[#allocation11 + $0x194] ss:$8 sps:$4 sm:$0xff]  }
 0x30c   :  { %5361 = vmatprep.subr.bf16.mxu1 %v7821_v34  ;;  %v4509_v34 = vpack.c.bf16 %v4493_v59, %v4477_v23  ;;  %v7882_v23 = vld [vmem:[#allocation11 + $0x220] ss:$8 sps:$4 sm:$0xff]  }
 0x30d   :  { %v4062_v1 = vadd.f32 %v9175_v18, %v4019_v37 }
 0x30e   :  { %5325 = vmatpush2.bf16.msra.mxu0 %v7828_v40  ;;  %v4015_v40 = vadd.f32 %v9135_v12, %v1111_v14  ;;  %v7872_v12 = vld [vmem:[#allocation11 + $0x244] ss:$8 sps:$4 sm:$0xff]   ;;  %v7875_v14 = vld [vmem:[#allocation11 + $0x354] ss:$8 sps:$4 sm:$0xff]  }
 0x30f   :  { %5362 = vmatpush2.bf16.msra.mxu1 %v7819_v30  ;;  %5326 = vmatprep.subr.bf16.mxu0 %v7836_v55  ;;  %v7858_v30 = vld [vmem:[#allocation11 + $0x260] ss:$8 sps:$4 sm:$0xff]   ;;  %v7849_v55 = vld [vmem:[#allocation11 + $0x190] ss:$8 sps:$4 sm:$0xff]   ;;  %v4463_v32 = vmul.f32 0.1, %v4062_v1 }
 0x310   :  { %5363 = vmatprep.subr.bf16.mxu1 %v7827_v47  ;;  %v7866_v47 = vld [vmem:[#allocation11 + $0x254] ss:$8 sps:$4 sm:$0xff]   ;;  %v4058_v24 = vadd.f32 %v9141_v19, %v4015_v40  ;;  %vm4431_vm2 = vcmp.gt.f32.partialorder %v4062_v1, 0.0  ;;  %v1123_v19 = vrot.slane %v9169_v48, %v1090_v63  ;;  %v7876_v63 = vld [vmem:[#allocation11 + $0x230] ss:$8 sps:$4 sm:$0xff]  }
 0x312   :  { %5327 = vmatpush2.bf16.msra.mxu0 %v7834_v28  ;;  %v7857_v28 = vld [vmem:[#allocation11 + $0x184] ss:$8 sps:$4 sm:$0xff]   ;;  %v4447_v18 = vmul.f32 0.1, %v4058_v24  ;;  %vm4415_vm3 = vcmp.gt.f32.partialorder %v4058_v24, 0.0 }
 0x313   :  { %5364 = vmatpush2.bf16.msra.mxu1 %v7825_v6  ;;  %5328 = vmatprep.subr.bf16.mxu0 %v7842_v39  ;;  %v7863_v6 = vld [vmem:[#allocation11 + $0x374] ss:$8 sps:$4 sm:$0xff]  }
 0x314   :  { %5365 = vmatprep.subr.bf16.mxu1 %v7833_v42  ;;  %v4495_v42 = vsel %vm4431_vm2, %v4062_v1, %v4463_v32  ;;  %v4479_v61 = vsel %vm4415_vm3, %v4058_v24, %v4447_v18  ;;  %v7887_v24 = vld [vmem:[#allocation11 + $0x334] ss:$8 sps:$4 sm:$0xff]   ;;  %v7885_v32 = vld [vmem:[#allocation11 + $0x330] ss:$8 sps:$4 sm:$0xff]   ;;  %v7908_v18 = vld [vmem:[#allocation11 + $0x2e4] ss:$8 sps:$4 sm:$0xff]  }
 0x315   :  { %v4511_v21 = vpack.c.bf16 %v4495_v42, %v4479_v61  ;;  %v7897_v42 = vld [vmem:[#allocation11 + $0x310] ss:$8 sps:$4 sm:$0xff]  }
 0x316   :  { %5329 = vmatpush2.bf16.msra.mxu0 %v7840_v2  ;;  %v9212_v2 = vpop.f32.mrf.mxu1  ;;  %v7912_v61 = vld [vmem:[#allocation11 + $0x2d0] ss:$8 sps:$4 sm:$0xff]  }
 0x317   :  { %5366 = vmatpush2.bf16.msra.mxu1 %v7831_v54  ;;  %5330 = vmatprep.subr.bf16.mxu0 %v7848_v36  ;;  %v7869_v54 = vld [vmem:[#allocation11 + $0x364] ss:$8 sps:$4 sm:$0xff]   ;;  %v7878_v36 = vld [vmem:[#allocation11 + $0x234] ss:$8 sps:$4 sm:$0xff]  }
 0x318   :  { %5367 = vmatprep.subr.bf16.mxu1 %v7839_v43 }
 0x31a   :  { %5331 = vmatpush2.bf16.msra.mxu0 %v7846_v56 }
 0x31b   :  { %5368 = vmatpush2.bf16.msra.mxu1 %v7837_v15  ;;  %5386 = vmatprep.subr.bf16.mxu0 %v7854_v5  ;;  %v7867_v5 = vld [vmem:[#allocation11 + $0x360] ss:$8 sps:$4 sm:$0xff]  }
 0x31c   :  { %5369 = vmatprep.subr.bf16.mxu1 %v7845_v44  ;;  %v7884_v44 = vld [vmem:[#allocation11 + $0x224] ss:$8 sps:$4 sm:$0xff]  }
 0x31d   :  { %5333 = vmatmul.mubr.bf16.vlgmr.msra.gmra.mxu0 %v4504_v11  ;;  %v4184_v57 = vpop.f32.mrf.mxu0  ;;  %v7855_v11 = vld [vmem:[#allocation11 + $0x180] ss:$8 sps:$4 sm:$0xff]  }
 0x31e   :  { %5387 = vmatpush1.bf16.msra.mxu0 %v7852_v17  ;;  %5418 = vmatprep.mubr.bf16.mxu0 %v4509_v34  ;;  %v4185_v43 = vadd.f32 %v4184_v57, %v1123_v19  ;;  %v7888_v34 = vld [vmem:[#allocation11 + $0x210] ss:$8 sps:$4 sm:$0xff]   ;;  %v7902_v57 = vld [vmem:[#allocation11 + $0x2f4] ss:$8 sps:$4 sm:$0xff]  }
 0x31f   :  { %5370 = vmatpush2.bf16.msra.mxu1 %v7843_v22  ;;  %5388 = vmatprep.subr.bf16.mxu0 %v7860_v27  ;;  %v9210_v39 = vpop.f32.mrf.mxu0 }
 0x320   :  { %5371 = vmatprep.subr.bf16.mxu1 %v7851_v50 }
 0x321   :  { %v4188_v56 = vpop.f32.mrf.mxu0 }
 0x322   :  { %5389 = vmatpush1.bf16.msra.mxu0 %v7858_v30  ;;  %v4189_v17 = vadd.f32 %v4188_v56, %v1123_v19  ;;  %v7879_v30 = vld [vmem:[#allocation11 + $0x340] ss:$8 sps:$4 sm:$0xff]   ;;  %v7909_v56 = vld [vmem:[#allocation11 + $0x3f0] ss:$8 sps:$4 sm:$0xff]  }
 0x323   :  { %5372 = vmatpush2.bf16.msra.mxu1 %v7849_v55  ;;  %5390 = vmatprep.subr.bf16.mxu0 %v7866_v47  ;;  %v7896_v55 = vld [vmem:[#allocation11 + $0x204] ss:$8 sps:$4 sm:$0xff]   ;;  %v7906_v19 = vld [vmem:[#allocation11 + $0x2e0] ss:$8 sps:$4 sm:$0xff]  }
 0x324   :  { %5373 = vmatprep.subr.bf16.mxu1 %v7857_v28  ;;  %v7894_v28 = vld [vmem:[#allocation11 + $0x200] ss:$8 sps:$4 sm:$0xff]  }
 0x326   :  { %5391 = vmatpush1.bf16.msra.mxu0 %v7864_v58  ;;  %v7893_v58 = vld [vmem:[#allocation11 + $0x324] ss:$8 sps:$4 sm:$0xff]  }
 0x327   :  { %5374 = vmatpush2.bf16.msra.mxu1 %v7855_v11  ;;  %5392 = vmatprep.subr.bf16.mxu0 %v7872_v12  ;;  %v7900_v11 = vld [vmem:[#allocation11 + $0x2f0] ss:$8 sps:$4 sm:$0xff]   ;;  %v7891_v12 = vld [vmem:[#allocation11 + $0x320] ss:$8 sps:$4 sm:$0xff]  }
 0x328   :  { %5429 = vmatprep.subr.bf16.mxu1 %v7863_v6  ;;  %v7899_v6 = vld [vmem:[#allocation11 + $0x314] ss:$8 sps:$4 sm:$0xff]  }
 0x32a   :  { %v4227_v53 = vpop.f32.mrf.mxu1  ;;  %5376 = vmatmul.mubr.bf16.vlgmr.msra.gmra.mxu1 %v4506_v8  ;;  %5393 = vmatpush1.bf16.msra.mxu0 %v7870_v60  ;;  %v7881_v8 = vld [vmem:[#allocation11 + $0x344] ss:$8 sps:$4 sm:$0xff]   ;;  %v7914_v60 = vld [vmem:[#allocation11 + $0x2d4] ss:$8 sps:$4 sm:$0xff]  }
 0x32b   :  { %v4228_v15 = vadd.f32 %v4227_v53, %v4185_v43  ;;  %5430 = vmatpush1.bf16.msra.mxu1 %v7861_v35  ;;  %5461 = vmatprep.mubr.bf16.mxu1 %v4511_v21  ;;  %v7905_v35 = vld [vmem:[#allocation11 + $0x304] ss:$8 sps:$4 sm:$0xff]   ;;  %v7911_v43 = vld [vmem:[#allocation11 + $0x3f4] ss:$8 sps:$4 sm:$0xff]   ;;  %v7918_v21 = vld [vmem:[#allocation11 + $0x2c0] ss:$8 sps:$4 sm:$0xff]  }
 0x32c   :  { %v9217_v59 = vpop.f32.mrf.mxu1  ;;  %5431 = vmatprep.subr.bf16.mxu1 %v7869_v54  ;;  %5394 = vmatprep.subr.bf16.mxu0 %v7878_v36  ;;  %v7903_v54 = vld [vmem:[#allocation11 + $0x300] ss:$8 sps:$4 sm:$0xff]   ;;  %v7920_v36 = vld [vmem:[#allocation11 + $0x2c4] ss:$8 sps:$4 sm:$0xff]   ;;  %v7926_v53 = vld [vmem:[#allocation11 + $0x2b4] ss:$8 sps:$4 sm:$0xff]  }
 0x32d   :  { %v4450_v27 = vmul.f32 0.1, %v4228_v15  ;;  %vm4418_vm4 = vcmp.gt.f32.partialorder %v4228_v15, 0.0 }
 0x32e   :  { %v4231_v22 = vpop.f32.mrf.mxu1  ;;  %5395 = vmatpush1.bf16.msra.mxu0 %v7876_v63  ;;  %v7917_v63 = vld [vmem:[#allocation11 + $0x3e4] ss:$8 sps:$4 sm:$0xff]  }
 0x32f   :  { %v4232_v37 = vadd.f32 %v4231_v22, %v4189_v17  ;;  %5432 = vmatpush1.bf16.msra.mxu1 %v7867_v5  ;;  %5396 = vmatprep.subr.bf16.mxu0 %v7884_v44  ;;  %v9219_v40 = vsel %vm4418_vm4, %v4228_v15, %v4450_v27  ;;  %v7924_v15 = vld [vmem:[#allocation11 + $0x2b0] ss:$8 sps:$4 sm:$0xff]   ;;  %v7915_v5 = vld [vmem:[#allocation11 + $0x3e0] ss:$8 sps:$4 sm:$0xff]   ;;  %v7932_v44 = vld [vmem:[#allocation11 + $0x2a4] ss:$8 sps:$4 sm:$0xff]   ;;  %v1119_v17 = vrot.slane %v9169_v48, %v9150_v20 }
 0x330   :  { %5433 = vmatprep.subr.bf16.mxu1 %v7875_v14  ;;  %v7923_v14 = vld [vmem:[#allocation11 + $0x3d4] ss:$8 sps:$4 sm:$0xff]   ;;  %v7930_v22 = vld [vmem:[#allocation11 + $0x2a0] ss:$8 sps:$4 sm:$0xff]   ;;  %v7921_v27 = vld [vmem:[#allocation11 + $0x3d0] ss:$8 sps:$4 sm:$0xff]  }
 0x331   :  { %vm4434_vm5 = vcmp.gt.f32.partialorder %v4232_v37, 0.0  ;;  %v4466_v50 = vmul.f32 0.1, %v4232_v37 }
 0x332   :  { %5397 = vmatpush1.bf16.msra.mxu0 %v7882_v23  ;;  %v4105_v23 = vadd.f32 %v9205_v26, %v1119_v17  ;;  %v7935_v26 = vld [vmem:[#allocation11 + $0x3b4] ss:$8 sps:$4 sm:$0xff]  }
 0x333   :  { %v9221_v1 = vsel %vm4434_vm5, %v4232_v37, %v4466_v50  ;;  %5434 = vmatpush1.bf16.msra.mxu1 %v7873_v46  ;;  %5398 = vmatprep.subr.bf16.mxu0 %v7890_v49  ;;  %v7938_v37 = vld [vmem:[#allocation11 + $0x294] ss:$8 sps:$4 sm:$0xff]   ;;  %v7929_v46 = vld [vmem:[#allocation11 + $0x3c4] ss:$8 sps:$4 sm:$0xff]   ;;  %v4101_v49 = vadd.f32 %v9173_v45, %v1119_v17  ;;  %v7936_v50 = vld [vmem:[#allocation11 + $0x290] ss:$8 sps:$4 sm:$0xff]  }
 0x334   :  { %v4514_v47 = vpack.c.bf16 %v9221_v1, %v9219_v40  ;;  %5435 = vmatprep.subr.bf16.mxu1 %v7881_v8  ;;  %v4148_v8 = vadd.f32 %v9212_v2, %v4105_v23  ;;  %v7950_v45 = vld [vmem:[#allocation14 + $0x74] ss:$8 sps:$4 sm:$0xff]   ;;  %v7941_v2 = vld [vmem:[#allocation11 + $0x3a4] ss:$8 sps:$4 sm:$0xff]   ;;  %v8065_v40 = vld [vmem:[#allocation14 + $0x350] ss:$8 sps:$4 sm:$0xff]  }
 0x335   :  { %v7966_v17 = vld [vmem:[#allocation14 + $0x40] ss:$8 sps:$4 sm:$0xff]   ;;  %v8082_v1 = vld [vmem:[#allocation14 + $0x214] ss:$8 sps:$4 sm:$0xff]  }
 0x336   :  { %5399 = vmatpush1.bf16.msra.mxu0 %v7888_v34  ;;  %v4144_v34 = vadd.f32 %v9178_v4, %v4101_v49  ;;  %vm4433_vm6 = vcmp.gt.f32.partialorder %v4148_v8, 0.0 }
 0x337   :  { %5436 = vmatpush1.bf16.msra.mxu1 %v7879_v30  ;;  %5400 = vmatprep.subr.bf16.mxu0 %v7896_v55  ;;  %v7927_v30 = vld [vmem:[#allocation11 + $0x3c0] ss:$8 sps:$4 sm:$0xff]   ;;  %v7944_v55 = vld [vmem:[#allocation11 + $0x284] ss:$8 sps:$4 sm:$0xff]  }
 0x338   :  { %5437 = vmatprep.subr.bf16.mxu1 %v7887_v24  ;;  %v4465_v24 = vmul.f32 0.1, %v4148_v8  ;;  %vm4417_vm7 = vcmp.gt.f32.partialorder %v4144_v34, 0.0 }
 0x33a   :  { %5401 = vmatpush1.bf16.msra.mxu0 %v7894_v28  ;;  %v7942_v28 = vld [vmem:[#allocation11 + $0x280] ss:$8 sps:$4 sm:$0xff]   ;;  %v4497_v4 = vsel %vm4433_vm6, %v4148_v8, %v4465_v24 }
 0x33b   :  { %5438 = vmatpush1.bf16.msra.mxu1 %v7885_v32  ;;  %5402 = vmatprep.subr.bf16.mxu0 %v7902_v57  ;;  %v4449_v32 = vmul.f32 0.1, %v4144_v34  ;;  %v7933_v57 = vld [vmem:[#allocation11 + $0x3b0] ss:$8 sps:$4 sm:$0xff]  }
 0x33c   :  { %5439 = vmatprep.subr.bf16.mxu1 %v7893_v58  ;;  %v4190_v58 = vpop.f32.mrf.mxu0  ;;  %v7971_v24 = vld [vmem:[#allocation14 + $0x154] ss:$8 sps:$4 sm:$0xff]  }
 0x33e   :  { %5403 = vmatpush2.bf16.msra.mxu0 %v7900_v11  ;;  %v1127_v11 = vrot.slane %v9169_v48, %v1094_v7  ;;  %v7954_v7 = vld [vmem:[#allocation14 + $0x60] ss:$8 sps:$4 sm:$0xff]  }
 0x33f   :  { %5440 = vmatpush1.bf16.msra.mxu1 %v7891_v12  ;;  %5404 = vmatprep.subr.bf16.mxu0 %v7908_v18  ;;  %v7948_v12 = vld [vmem:[#allocation14 + $0x70] ss:$8 sps:$4 sm:$0xff]   ;;  %v4233_v18 = vpop.f32.mrf.mxu1 }
 0x340   :  { %5441 = vmatprep.subr.bf16.mxu1 %v7899_v6  ;;  %v7939_v6 = vld [vmem:[#allocation11 + $0x3a0] ss:$8 sps:$4 sm:$0xff]  }
 0x342   :  { %5405 = vmatpush2.bf16.msra.mxu0 %v7906_v19  ;;  %v4481_v19 = vsel %vm4417_vm7, %v4144_v34, %v4449_v32 }
 0x343   :  { %5442 = vmatpush1.bf16.msra.mxu1 %v7897_v42  ;;  %5406 = vmatprep.subr.bf16.mxu0 %v7914_v60  ;;  %v7956_v42 = vld [vmem:[#allocation14 + $0x64] ss:$8 sps:$4 sm:$0xff]   ;;  %v4191_v60 = vadd.f32 %v4190_v58, %v1127_v11 }
 0x344   :  { %5443 = vmatprep.subr.bf16.mxu1 %v7905_v35  ;;  %v7947_v35 = vld [vmem:[#allocation11 + $0x394] ss:$8 sps:$4 sm:$0xff]  }
 0x346   :  { %5407 = vmatpush2.bf16.msra.mxu0 %v7912_v61  ;;  %v4513_v61 = vpack.c.bf16 %v4497_v4, %v4481_v19  ;;  %v7984_v4 = vld [vmem:[#allocation14 + $0x10] ss:$8 sps:$4 sm:$0xff]  }
 0x347   :  { %5444 = vmatpush1.bf16.msra.mxu1 %v7903_v54  ;;  %5408 = vmatprep.subr.bf16.mxu0 %v7920_v36  ;;  %v4187_v54 = vadd.f32 %v9210_v39, %v1127_v11  ;;  %v4234_v36 = vadd.f32 %v4233_v18, %v4191_v60  ;;  %v7959_v39 = vld [vmem:[#allocation14 + $0x174] ss:$8 sps:$4 sm:$0xff]   ;;  %v7975_v18 = vld [vmem:[#allocation14 + $0x140] ss:$8 sps:$4 sm:$0xff]  }
 0x348   :  { %5445 = vmatprep.subr.bf16.mxu1 %v7911_v43  ;;  %v7945_v43 = vld [vmem:[#allocation11 + $0x390] ss:$8 sps:$4 sm:$0xff]   ;;  %v7990_v60 = vld [vmem:[#allocation14] ss:$8 sps:$4 sm:$0xff]  }
 0x349   :  { %vm4435_vm8 = vcmp.gt.f32.partialorder %v4234_v36, 0.0 }
 0x34a   :  { %5409 = vmatpush2.bf16.msra.mxu0 %v7918_v21  ;;  %v7962_v21 = vld [vmem:[#allocation14 + $0x54] ss:$8 sps:$4 sm:$0xff]  }
 0x34b   :  { %5446 = vmatpush2.bf16.msra.mxu1 %v7909_v56  ;;  %5410 = vmatprep.subr.bf16.mxu0 %v7926_v53  ;;  %v4230_v56 = vadd.f32 %v9217_v59, %v4187_v54  ;;  %v7953_v53 = vld [vmem:[#allocation11 + $0x384] ss:$8 sps:$4 sm:$0xff]  }
 0x34c   :  { %5447 = vmatprep.subr.bf16.mxu1 %v7917_v63  ;;  %v4467_v63 = vmul.f32 0.1, %v4234_v36  ;;  %v7989_v54 = vld [vmem:[#allocation14 + $0x124] ss:$8 sps:$4 sm:$0xff]  }
 0x34d   :  { %vm4419_vm9 = vcmp.gt.f32.partialorder %v4230_v56, 0.0 }
 0x34e   :  { %5411 = vmatpush2.bf16.msra.mxu0 %v7924_v15 }
 0x34f   :  { %5448 = vmatpush2.bf16.msra.mxu1 %v7915_v5  ;;  %5412 = vmatprep.subr.bf16.mxu0 %v7932_v44  ;;  %v7960_v5 = vld [vmem:[#allocation14 + $0x50] ss:$8 sps:$4 sm:$0xff]   ;;  %v1131_v44 = vrot.slane %v9169_v48, %v1098_v62 }
 0x350   :  { %5449 = vmatprep.subr.bf16.mxu1 %v7923_v14  ;;  %v4499_v14 = vsel %vm4435_vm8, %v4234_v36, %v4467_v63  ;;  %v7972_v62 = vld [vmem:[#allocation14 + $0x30] ss:$8 sps:$4 sm:$0xff]   ;;  %v8010_v63 = vld [vmem:[#allocation14 + $0xd4] ss:$8 sps:$4 sm:$0xff]  }
 0x351   :  { %v7996_v36 = vld [vmem:[#allocation14 + $0xf0] ss:$8 sps:$4 sm:$0xff]  }
 0x352   :  { %5413 = vmatpush2.bf16.msra.mxu0 %v7930_v22  ;;  %v7957_v22 = vld [vmem:[#allocation14 + $0x170] ss:$8 sps:$4 sm:$0xff]  }
 0x353   :  { %5450 = vmatpush2.bf16.msra.mxu1 %v7921_v27  ;;  %5414 = vmatprep.subr.bf16.mxu0 %v7938_v37  ;;  %v7965_v27 = vld [vmem:[#allocation14 + $0x164] ss:$8 sps:$4 sm:$0xff]   ;;  %v7974_v37 = vld [vmem:[#allocation14 + $0x34] ss:$8 sps:$4 sm:$0xff]  }
 0x354   :  { %5451 = vmatprep.subr.bf16.mxu1 %v7929_v46 }
 0x356   :  { %5415 = vmatpush2.bf16.msra.mxu0 %v7936_v50 }
 0x357   :  { %5452 = vmatpush2.bf16.msra.mxu1 %v7927_v30  ;;  %5416 = vmatprep.subr.bf16.mxu0 %v7944_v55  ;;  %v7963_v30 = vld [vmem:[#allocation14 + $0x160] ss:$8 sps:$4 sm:$0xff]   ;;  %v7980_v55 = vld [vmem:[#allocation14 + $0x24] ss:$8 sps:$4 sm:$0xff]  }
 0x358   :  { %5453 = vmatprep.subr.bf16.mxu1 %v7935_v26 }
 0x35a   :  { %5417 = vmatpush2.bf16.msra.mxu0 %v7942_v28 }
 0x35b   :  { %5454 = vmatpush2.bf16.msra.mxu1 %v7933_v57  ;;  %6266 = vmatprep.subr.bf16.mxu0 %v7950_v45  ;;  %v7978_v57 = vld [vmem:[#allocation14 + $0x20] ss:$8 sps:$4 sm:$0xff]  }
 0x35c   :  { %5455 = vmatprep.subr.bf16.mxu1 %v7941_v2 }
 0x35d   :  { %5419 = vmatmul.mubr.bf16.vlgmr.msra.gmra.mxu0 %v4508_v41  ;;  %v4270_v15 = vpop.f32.mrf.mxu0  ;;  %v4451_v41 = vmul.f32 0.1, %v4230_v56 }
 0x35e   :  { %6267 = vmatpush1.bf16.msra.mxu0 %v7948_v12  ;;  %6298 = vmatprep.mubr.bf16.mxu0 %v4513_v61  ;;  %v4271_v46 = vadd.f32 %v4270_v15, %v1131_v44  ;;  %v7998_v61 = vld [vmem:[#allocation14 + $0xf4] ss:$8 sps:$4 sm:$0xff]   ;;  %v8001_v15 = vld [vmem:[#allocation14 + $0x104] ss:$8 sps:$4 sm:$0xff]  }
 0x35f   :  { %5456 = vmatpush2.bf16.msra.mxu1 %v7939_v6  ;;  %6268 = vmatprep.subr.bf16.mxu0 %v7956_v42  ;;  %v9242_v59 = vpop.f32.mrf.mxu0  ;;  %v4483_v23 = vsel %vm4419_vm9, %v4230_v56, %v4451_v41  ;;  %v7992_v6 = vld [vmem:[#allocation14 + $0x4] ss:$8 sps:$4 sm:$0xff]   ;;  %v7983_v42 = vld [vmem:[#allocation14 + $0x134] ss:$8 sps:$4 sm:$0xff]   ;;  %v8002_v56 = vld [vmem:[#allocation14 + $0xe0] ss:$8 sps:$4 sm:$0xff]  }
 0x360   :  { %5457 = vmatprep.subr.bf16.mxu1 %v7947_v35  ;;  %v4515_v49 = vpack.c.bf16 %v4499_v14, %v4483_v23  ;;  %v7981_v35 = vld [vmem:[#allocation14 + $0x130] ss:$8 sps:$4 sm:$0xff]   ;;  %v8007_v41 = vld [vmem:[#allocation14 + $0x1f4] ss:$8 sps:$4 sm:$0xff]   ;;  %v8011_v23 = vld [vmem:[#allocation14 + $0x1e0] ss:$8 sps:$4 sm:$0xff]  }
 0x361   :  { %v4274_v8 = vpop.f32.mrf.mxu0  ;;  %v8022_v14 = vld [vmem:[#allocation14 + $0xb4] ss:$8 sps:$4 sm:$0xff]  }
 0x362   :  { %6269 = vmatpush1.bf16.msra.mxu0 %v7954_v7  ;;  %v4275_v28 = vadd.f32 %v4274_v8, %v1131_v44  ;;  %v7987_v7 = vld [vmem:[#allocation14 + $0x120] ss:$8 sps:$4 sm:$0xff]   ;;  %v8005_v44 = vld [vmem:[#allocation14 + $0x1f0] ss:$8 sps:$4 sm:$0xff]  }
 0x363   :  { %5458 = vmatpush2.bf16.msra.mxu1 %v7945_v43  ;;  %6270 = vmatprep.subr.bf16.mxu0 %v7962_v21  ;;  %v8004_v43 = vld [vmem:[#allocation14 + $0xe4] ss:$8 sps:$4 sm:$0xff]   ;;  %v7995_v21 = vld [vmem:[#allocation14 + $0x114] ss:$8 sps:$4 sm:$0xff]  }
 0x364   :  { %5459 = vmatprep.subr.bf16.mxu1 %v7953_v53  ;;  %v7993_v53 = vld [vmem:[#allocation14 + $0x110] ss:$8 sps:$4 sm:$0xff]  }
 0x366   :  { %6271 = vmatpush1.bf16.msra.mxu0 %v7960_v5  ;;  %v8008_v5 = vld [vmem:[#allocation14 + $0xd0] ss:$8 sps:$4 sm:$0xff]  }
 0x367   :  { %5460 = vmatpush2.bf16.msra.mxu1 %v7951_v51  ;;  %6272 = vmatprep.subr.bf16.mxu0 %v7968_v10  ;;  %v7999_v51 = vld [vmem:[#allocation14 + $0x100] ss:$8 sps:$4 sm:$0xff]   ;;  %v8016_v10 = vld [vmem:[#allocation14 + $0xc4] ss:$8 sps:$4 sm:$0xff]  }
 0x368   :  { %6309 = vmatprep.subr.bf16.mxu1 %v7959_v39  ;;  %v8014_v39 = vld [vmem:[#allocation14 + $0xc0] ss:$8 sps:$4 sm:$0xff]  }
 0x36a   :  { %v4313_v50 = vpop.f32.mrf.mxu1  ;;  %5462 = vmatmul.mubr.bf16.vlgmr.msra.gmra.mxu1 %v4510_v29  ;;  %6273 = vmatpush1.bf16.msra.mxu0 %v7966_v17  ;;  %v7977_v29 = vld [vmem:[#allocation14 + $0x144] ss:$8 sps:$4 sm:$0xff]  }
 0x36b   :  { %v4314_v34 = vadd.f32 %v4313_v50, %v4271_v46  ;;  %6310 = vmatpush1.bf16.msra.mxu1 %v7957_v22  ;;  %6341 = vmatprep.mubr.bf16.mxu1 %v4515_v49  ;;  %v8013_v17 = vld [vmem:[#allocation14 + $0x1e4] ss:$8 sps:$4 sm:$0xff]   ;;  %v8020_v22 = vld [vmem:[#allocation14 + $0xb0] ss:$8 sps:$4 sm:$0xff]   ;;  %v8019_v46 = vld [vmem:[#allocation14 + $0x1d4] ss:$8 sps:$4 sm:$0xff]   ;;  %v1135_v49 = vrot.slane %v9169_v48, %v1102_v31 }
 0x36c   :  { %v9247_v26 = vpop.f32.mrf.mxu1  ;;  %6311 = vmatprep.subr.bf16.mxu1 %v7965_v27  ;;  %6274 = vmatprep.subr.bf16.mxu0 %v7974_v37  ;;  %v8028_v27 = vld [vmem:[#allocation14 + $0xa4] ss:$8 sps:$4 sm:$0xff]   ;;  %v4276_v37 = vpop.f32.mrf.mxu0  ;;  %v8026_v50 = vld [vmem:[#allocation14 + $0xa0] ss:$8 sps:$4 sm:$0xff]   ;;  %v8031_v31 = vld [vmem:[#allocation14 + $0x1b4] ss:$8 sps:$4 sm:$0xff]  }
 0x36d   :  { %v4452_v45 = vmul.f32 0.1, %v4314_v34  ;;  %vm4420_vm10 = vcmp.gt.f32.partialorder %v4314_v34, 0.0  ;;  %v8040_v48 = vld [vmem:[#allocation14 + $0x84] ss:$8 sps:$4 sm:$0xff]  }
 0x36e   :  { %v4317_v32 = vpop.f32.mrf.mxu1  ;;  %6275 = vmatpush1.bf16.msra.mxu0 %v7972_v62  ;;  %v4277_v62 = vadd.f32 %v4276_v37, %v1135_v49 }
 0x36f   :  { %v4318_v2 = vadd.f32 %v4317_v32, %v4275_v28  ;;  %6312 = vmatpush1.bf16.msra.mxu1 %v7963_v30  ;;  %6276 = vmatprep.subr.bf16.mxu0 %v7980_v55  ;;  %v9249_v11 = vsel %vm4420_vm10, %v4314_v34, %v4452_v45  ;;  %v8017_v34 = vld [vmem:[#allocation14 + $0x1d0] ss:$8 sps:$4 sm:$0xff]   ;;  %v8034_v30 = vld [vmem:[#allocation14 + $0x94] ss:$8 sps:$4 sm:$0xff]   ;;  %v8025_v55 = vld [vmem:[#allocation14 + $0x1c4] ss:$8 sps:$4 sm:$0xff]  }
 0x370   :  { %6313 = vmatprep.subr.bf16.mxu1 %v7971_v24  ;;  %v4319_v8 = vpop.f32.mrf.mxu1  ;;  %v4273_v24 = vadd.f32 %v9242_v59, %v1135_v49  ;;  %v8032_v32 = vld [vmem:[#allocation14 + $0x90] ss:$8 sps:$4 sm:$0xff]   ;;  %v8023_v45 = vld [vmem:[#allocation14 + $0x1c0] ss:$8 sps:$4 sm:$0xff]   ;;  %v8046_v59 = vld [vmem:[#allocation14 + $0x274] ss:$8 sps:$4 sm:$0xff]  }
 0x371   :  { %vm4436_vm11 = vcmp.gt.f32.partialorder %v4318_v2, 0.0  ;;  %v4468_v58 = vmul.f32 0.1, %v4318_v2  ;;  %v4320_v28 = vadd.f32 %v4319_v8, %v4277_v62  ;;  %v8074_v49 = vld [vmem:[#allocation14 + $0x220] ss:$8 sps:$4 sm:$0xff]  }
 0x372   :  { %6277 = vmatpush1.bf16.msra.mxu0 %v7978_v57  ;;  %v4316_v57 = vadd.f32 %v9247_v26, %v4273_v24  ;;  %v8044_v26 = vld [vmem:[#allocation14 + $0x270] ss:$8 sps:$4 sm:$0xff]  }
 0x373   :  { %v9251_v12 = vsel %vm4436_vm11, %v4318_v2, %v4468_v58  ;;  %6314 = vmatpush1.bf16.msra.mxu1 %v7969_v33  ;;  %6278 = vmatprep.subr.bf16.mxu0 %v7986_v38  ;;  %v4469_v2 = vmul.f32 0.1, %v4320_v28  ;;  %vm4437_vm12 = vcmp.gt.f32.partialorder %v4320_v28, 0.0  ;;  %v8038_v33 = vld [vmem:[#allocation14 + $0x80] ss:$8 sps:$4 sm:$0xff]  }
 0x374   :  { %v4516_v19 = vpack.c.bf16 %v9251_v12, %v9249_v11  ;;  %6315 = vmatprep.subr.bf16.mxu1 %v7977_v29  ;;  %v4453_v38 = vmul.f32 0.1, %v4316_v57  ;;  %v8029_v29 = vld [vmem:[#allocation14 + $0x1b0] ss:$8 sps:$4 sm:$0xff]   ;;  %vm4421_vm13 = vcmp.gt.f32.partialorder %v4316_v57, 0.0 }
 0x375   :  { %v8037_v58 = vld [vmem:[#allocation14 + $0x1a4] ss:$8 sps:$4 sm:$0xff]   ;;  %v8145_v12 = vld [vmem:[#allocation17 + $0x70] sm:$0xff]  }
 0x376   :  { %6279 = vmatpush1.bf16.msra.mxu0 %v7984_v4  ;;  %v4501_v4 = vsel %vm4437_vm12, %v4320_v28, %v4469_v2  ;;  %v8088_v28 = vld [vmem:[#allocation14 + $0x204] ss:$8 sps:$4 sm:$0xff]   ;;  %v8077_v2 = vld [vmem:[#allocation14 + $0x330] ss:$8 sps:$4 sm:$0xff]  }
 0x377   :  { %6316 = vmatpush1.bf16.msra.mxu1 %v7975_v18  ;;  %6280 = vmatprep.subr.bf16.mxu0 %v7992_v6  ;;  %v8035_v18 = vld [vmem:[#allocation14 + $0x1a0] ss:$8 sps:$4 sm:$0xff]   ;;  %v4485_v6 = vsel %vm4421_vm13, %v4316_v57, %v4453_v38  ;;  %v8085_v38 = vld [vmem:[#allocation14 + $0x324] ss:$8 sps:$4 sm:$0xff]  }
 0x378   :  { %6317 = vmatprep.subr.bf16.mxu1 %v7983_v42  ;;  %v8052_v42 = vld [vmem:[#allocation14 + $0x264] ss:$8 sps:$4 sm:$0xff]  }
 0x37a   :  { %6281 = vmatpush1.bf16.msra.mxu0 %v7990_v60  ;;  %v8043_v60 = vld [vmem:[#allocation14 + $0x194] ss:$8 sps:$4 sm:$0xff]  }
 0x37b   :  { %6318 = vmatpush1.bf16.msra.mxu1 %v7981_v35  ;;  %6282 = vmatprep.subr.bf16.mxu0 %v7998_v61  ;;  %v4517_v35 = vpack.c.bf16 %v4501_v4, %v4485_v6  ;;  %v8050_v61 = vld [vmem:[#allocation14 + $0x260] ss:$8 sps:$4 sm:$0xff]   ;;  %v8091_v4 = vld [vmem:[#allocation14 + $0x314] ss:$8 sps:$4 sm:$0xff]  }
 0x37c   :  { %6319 = vmatprep.subr.bf16.mxu1 %v7989_v54  ;;  %v8041_v54 = vld [vmem:[#allocation14 + $0x190] ss:$8 sps:$4 sm:$0xff]   ;;  %v8106_v6 = vld [vmem:[#allocation14 + $0x2d4] ss:$8 sps:$4 sm:$0xff]  }
 0x37e   :  { %6283 = vmatpush2.bf16.msra.mxu0 %v7996_v36  ;;  %v8058_v36 = vld [vmem:[#allocation14 + $0x254] ss:$8 sps:$4 sm:$0xff]  }
 0x37f   :  { %6320 = vmatpush1.bf16.msra.mxu1 %v7987_v7  ;;  %6284 = vmatprep.subr.bf16.mxu0 %v8004_v43  ;;  %v8049_v43 = vld [vmem:[#allocation14 + $0x184] ss:$8 sps:$4 sm:$0xff]  }
 0x380   :  { %6321 = vmatprep.subr.bf16.mxu1 %v7995_v21  ;;  %v8056_v21 = vld [vmem:[#allocation14 + $0x250] ss:$8 sps:$4 sm:$0xff]  }
 0x382   :  { %6285 = vmatpush2.bf16.msra.mxu0 %v8002_v56  ;;  %v8047_v56 = vld [vmem:[#allocation14 + $0x180] ss:$8 sps:$4 sm:$0xff]  }
 0x383   :  { %6322 = vmatpush1.bf16.msra.mxu1 %v7993_v53  ;;  %6286 = vmatprep.subr.bf16.mxu0 %v8010_v63  ;;  %v8064_v53 = vld [vmem:[#allocation14 + $0x244] ss:$8 sps:$4 sm:$0xff]  }
 0x384   :  { %6323 = vmatprep.subr.bf16.mxu1 %v8001_v15 }
 0x386   :  { %6287 = vmatpush2.bf16.msra.mxu0 %v8008_v5  ;;  %v8053_v5 = vld [vmem:[#allocation14 + $0x370] ss:$8 sps:$4 sm:$0xff]  }
 0x387   :  { %6324 = vmatpush1.bf16.msra.mxu1 %v7999_v51  ;;  %6288 = vmatprep.subr.bf16.mxu0 %v8016_v10  ;;  %v8070_v51 = vld [vmem:[#allocation14 + $0x234] ss:$8 sps:$4 sm:$0xff]  }
 0x388   :  { %6325 = vmatprep.subr.bf16.mxu1 %v8007_v41  ;;  %v8061_v41 = vld [vmem:[#allocation14 + $0x364] ss:$8 sps:$4 sm:$0xff]  }
 0x38a   :  { %6289 = vmatpush2.bf16.msra.mxu0 %v8014_v39 }
 0x38b   :  { %6326 = vmatpush2.bf16.msra.mxu1 %v8005_v44  ;;  %6290 = vmatprep.subr.bf16.mxu0 %v8022_v14  ;;  %v8068_v44 = vld [vmem:[#allocation14 + $0x230] ss:$8 sps:$4 sm:$0xff]  }
 0x38c   :  { %6327 = vmatprep.subr.bf16.mxu1 %v8013_v17  ;;  %v8059_v17 = vld [vmem:[#allocation14 + $0x360] ss:$8 sps:$4 sm:$0xff]  }
 0x38e   :  { %6291 = vmatpush2.bf16.msra.mxu0 %v8020_v22 }
 0x38f   :  { %6328 = vmatpush2.bf16.msra.mxu1 %v8011_v23  ;;  %6292 = vmatprep.subr.bf16.mxu0 %v8028_v27  ;;  %v8067_v27 = vld [vmem:[#allocation14 + $0x354] ss:$8 sps:$4 sm:$0xff]  }
 0x390   :  { %6329 = vmatprep.subr.bf16.mxu1 %v8019_v46 }
 0x392   :  { %6293 = vmatpush2.bf16.msra.mxu0 %v8026_v50  ;;  %v8073_v50 = vld [vmem:[#allocation14 + $0x344] ss:$8 sps:$4 sm:$0xff]  }
 0x393   :  { %6330 = vmatpush2.bf16.msra.mxu1 %v8017_v34  ;;  %6294 = vmatprep.subr.bf16.mxu0 %v8034_v30  ;;  %v8071_v30 = vld [vmem:[#allocation14 + $0x340] ss:$8 sps:$4 sm:$0xff]  }
 0x394   :  { %6331 = vmatprep.subr.bf16.mxu1 %v8025_v55  ;;  %v8080_v55 = vld [vmem:[#allocation14 + $0x210] ss:$8 sps:$4 sm:$0xff]  }
 0x396   :  { %6295 = vmatpush2.bf16.msra.mxu0 %v8032_v32  ;;  %v8079_v32 = vld [vmem:[#allocation14 + $0x334] ss:$8 sps:$4 sm:$0xff]  }
 0x397   :  { %6332 = vmatpush2.bf16.msra.mxu1 %v8023_v45  ;;  %6296 = vmatprep.subr.bf16.mxu0 %v8040_v48 }
 0x398   :  { %6333 = vmatprep.subr.bf16.mxu1 %v8031_v31  ;;  %v8086_v31 = vld [vmem:[#allocation14 + $0x200] ss:$8 sps:$4 sm:$0xff]  }
 0x39a   :  { %6297 = vmatpush2.bf16.msra.mxu0 %v8038_v33  ;;  %v8094_v33 = vld [vmem:[#allocation14 + $0x2f4] ss:$8 sps:$4 sm:$0xff]  }
 0x39b   :  { %6334 = vmatpush2.bf16.msra.mxu1 %v8029_v29  ;;  %6352 = vmatprep.subr.bf16.mxu0 %v8046_v59  ;;  %v8092_v29 = vld [vmem:[#allocation14 + $0x2f0] ss:$8 sps:$4 sm:$0xff]   ;;  %v8083_v59 = vld [vmem:[#allocation14 + $0x320] ss:$8 sps:$4 sm:$0xff]  }
 0x39c   :  { %6335 = vmatprep.subr.bf16.mxu1 %v8037_v58  ;;  %v8100_v58 = vld [vmem:[#allocation14 + $0x2e4] ss:$8 sps:$4 sm:$0xff]  }
 0x39d   :  { %6299 = vmatmul.mubr.bf16.vlgmr.msra.gmra.mxu0 %v4512_v52  ;;  %v9263_v7 = vpop.f32.mrf.mxu0  ;;  %v9265_v52 = vld [vmem:[#allocation9 + $0x8] sm:$0xff] }
 0x39e   :  { %6353 = vmatpush1.bf16.msra.mxu0 %v8044_v26  ;;  %6384 = vmatprep.mubr.bf16.mxu0 %v4517_v35  ;;  %v1143_v15 = vrot.slane %v9265_v52, %v1110_v25  ;;  %v8076_v25 = vld [vmem:[#allocation14 + $0x224] ss:$8 sps:$4 sm:$0xff]   ;;  %v8098_v26 = vld [vmem:[#allocation14 + $0x2e0] ss:$8 sps:$4 sm:$0xff]  }
 0x39f   :  { %6336 = vmatpush2.bf16.msra.mxu1 %v8035_v18  ;;  %6354 = vmatprep.subr.bf16.mxu0 %v8052_v42  ;;  %v4358_v63 = vpop.f32.mrf.mxu0  ;;  %v8089_v18 = vld [vmem:[#allocation14 + $0x310] ss:$8 sps:$4 sm:$0xff]   ;;  %v8097_v42 = vld [vmem:[#allocation14 + $0x304] ss:$8 sps:$4 sm:$0xff]   ;;  %v8095_v35 = vld [vmem:[#allocation14 + $0x300] ss:$8 sps:$4 sm:$0xff]  }
 0x3a0   :  { %6337 = vmatprep.subr.bf16.mxu1 %v8043_v60  ;;  %v4359_v14 = vadd.f32 %v4358_v63, %v1143_v15  ;;  %v8104_v60 = vld [vmem:[#allocation14 + $0x2d0] ss:$8 sps:$4 sm:$0xff]   ;;  %v8107_v63 = vld [vmem:[#allocation14 + $0x3e0] ss:$8 sps:$4 sm:$0xff]  }
 0x3a1   :  { %v9270_v10 = vpop.f32.mrf.mxu0 }
 0x3a2   :  { %6355 = vmatpush1.bf16.msra.mxu0 %v8050_v61  ;;  %v8112_v61 = vld [vmem:[#allocation14 + $0x2c4] ss:$8 sps:$4 sm:$0xff]  }
 0x3a3   :  { %6338 = vmatpush2.bf16.msra.mxu1 %v8041_v54  ;;  %6356 = vmatprep.subr.bf16.mxu0 %v8058_v36  ;;  %v4362_v22 = vpop.f32.mrf.mxu0  ;;  %v8103_v54 = vld [vmem:[#allocation14 + $0x3f4] ss:$8 sps:$4 sm:$0xff]   ;;  %v8110_v36 = vld [vmem:[#allocation14 + $0x2c0] ss:$8 sps:$4 sm:$0xff]  }
 0x3a4   :  { %6339 = vmatprep.subr.bf16.mxu1 %v8049_v43  ;;  %v4363_v8 = vadd.f32 %v4362_v22, %v1143_v15  ;;  %v8101_v43 = vld [vmem:[#allocation14 + $0x3f0] ss:$8 sps:$4 sm:$0xff]   ;;  %v8122_v15 = vld [vmem:[#allocation14 + $0x2a0] ss:$8 sps:$4 sm:$0xff]  }
 0x3a5   :  { %v8134_v22 = vld [vmem:[#allocation14 + $0x280] ss:$8 sps:$4 sm:$0xff]  }
 0x3a6   :  { %6357 = vmatpush1.bf16.msra.mxu0 %v8056_v21  ;;  %v8118_v21 = vld [vmem:[#allocation14 + $0x2b4] ss:$8 sps:$4 sm:$0xff]  }
 0x3a7   :  { %6340 = vmatpush2.bf16.msra.mxu1 %v8047_v56  ;;  %6358 = vmatprep.subr.bf16.mxu0 %v8064_v53  ;;  %v8109_v56 = vld [vmem:[#allocation14 + $0x3e4] ss:$8 sps:$4 sm:$0xff]   ;;  %v8116_v53 = vld [vmem:[#allocation14 + $0x2b0] ss:$8 sps:$4 sm:$0xff]  }
 0x3a8   :  { %6395 = vmatprep.subr.bf16.mxu1 %v8055_v16  ;;  %v8124_v16 = vld [vmem:[#allocation14 + $0x2a4] ss:$8 sps:$4 sm:$0xff]  }
 0x3aa   :  { %v9272_v39 = vpop.f32.mrf.mxu1  ;;  %6342 = vmatmul.mubr.bf16.vlgmr.msra.gmra.mxu1 %v4514_v47  ;;  %6359 = vmatpush1.bf16.msra.mxu0 %v8062_v3  ;;  %v8115_v3 = vld [vmem:[#allocation14 + $0x3d4] ss:$8 sps:$4 sm:$0xff]  }
 0x3ab   :  { %6396 = vmatpush1.bf16.msra.mxu1 %v8053_v5  ;;  %6360 = vmatprep.subr.bf16.mxu0 %v8070_v51  ;;  %v8113_v5 = vld [vmem:[#allocation14 + $0x3d0] ss:$8 sps:$4 sm:$0xff]   ;;  %v8130_v51 = vld [vmem:[#allocation14 + $0x294] ss:$8 sps:$4 sm:$0xff]  }
 0x3ac   :  { %v4401_v23 = vpop.f32.mrf.mxu1  ;;  %6397 = vmatprep.subr.bf16.mxu1 %v8061_v41  ;;  %v8121_v41 = vld [vmem:[#allocation14 + $0x3c4] ss:$8 sps:$4 sm:$0xff]  }
 0x3ad   :  { %v4402_v37 = vadd.f32 %v4401_v23, %v4359_v14  ;;  %v8119_v14 = vld [vmem:[#allocation14 + $0x3c0] ss:$8 sps:$4 sm:$0xff]   ;;  %v8125_v23 = vld [vmem:[#allocation14 + $0x3b0] ss:$8 sps:$4 sm:$0xff]  }
 0x3ae   :  { %v9277_v46 = vpop.f32.mrf.mxu1  ;;  %6361 = vmatpush1.bf16.msra.mxu0 %v8068_v44  ;;  %v8128_v44 = vld [vmem:[#allocation14 + $0x290] ss:$8 sps:$4 sm:$0xff]  }
 0x3af   :  { %6398 = vmatpush1.bf16.msra.mxu1 %v8059_v17  ;;  %6362 = vmatprep.subr.bf16.mxu0 %v8076_v25  ;;  %v4455_v62 = vmul.f32 0.1, %v4402_v37  ;;  %vm4423_vm14 = vcmp.gt.f32.partialorder %v4402_v37, 0.0  ;;  %v8136_v17 = vld [vmem:[#allocation14 + $0x284] ss:$8 sps:$4 sm:$0xff]  }
 0x3b0   :  { %v4405_v47 = vpop.f32.mrf.mxu1  ;;  %6399 = vmatprep.subr.bf16.mxu1 %v8067_v27  ;;  %v8127_v25 = vld [vmem:[#allocation14 + $0x3b4] ss:$8 sps:$4 sm:$0xff]   ;;  %v8133_v27 = vld [vmem:[#allocation14 + $0x3a4] ss:$8 sps:$4 sm:$0xff]  }
 0x3b1   :  { %v4406_v34 = vadd.f32 %v4405_v47, %v4363_v8  ;;  %v4487_v57 = vsel %vm4423_vm14, %v4402_v37, %v4455_v62  ;;  %v1139_v37 = vrot.slane %v9265_v52, %v1106_v0  ;;  %v8131_v8 = vld [vmem:[#allocation14 + $0x3a0] ss:$8 sps:$4 sm:$0xff]   ;;  %v8142_v0 = vld [vmem:[#allocation14 + $0x384] ss:$8 sps:$4 sm:$0xff]  }
 0x3b2   :  { %6363 = vmatpush1.bf16.msra.mxu0 %v8074_v49  ;;  %v8140_v62 = vld [vmem:[#allocation14 + $0x380] ss:$8 sps:$4 sm:$0xff]  }
 0x3b3   :  { %vm4439_vm15 = vcmp.gt.f32.partialorder %v4406_v34, 0.0  ;;  %v4471_v24 = vmul.f32 0.1, %v4406_v34  ;;  %6400 = vmatpush1.bf16.msra.mxu1 %v8065_v40  ;;  %6364 = vmatprep.subr.bf16.mxu0 %v8082_v1  ;;  %v4361_v49 = vadd.f32 %v9270_v10, %v1139_v37  ;;  %v8139_v40 = vld [vmem:[#allocation14 + $0x394] ss:$8 sps:$4 sm:$0xff]   ;;  %v4357_v1 = vadd.f32 %v9263_v7, %v1139_v37 }
 0x3b4   :  { %6401 = vmatprep.subr.bf16.mxu1 %v8073_v50  ;;  %v8143_v7 = vld [vmem:[#allocation17 + $0x78] sm:$0xff]  }
 0x3b5   :  { %v4503_v45 = vsel %vm4439_vm15, %v4406_v34, %v4471_v24  ;;  %v4404_v47 = vadd.f32 %v9277_v46, %v4361_v49  ;;  %v4400_v50 = vadd.f32 %v9272_v39, %v4357_v1  ;;  %v8147_v39 = vld [vmem:[#allocation17 + $0x68] sm:$0xff]   ;;  %v8149_v24 = vld [vmem:[#allocation17 + $0x60] sm:$0xff]  }
 0x3b6   :  { %v4519_v48 = vpack.c.bf16 %v4503_v45, %v4487_v57  ;;  %6365 = vmatpush1.bf16.msra.mxu0 %v8080_v55  ;;  %v8148_v55 = vld [vmem:[#allocation17 + $0x28] sm:$0xff]   ;;  %v8161_v57 = vld [vmem:[#allocation18 + $0x70] sm:$0xff]   ;;  %v8150_v45 = vld [vmem:[#allocation17 + $0x20] sm:$0xff]  }
 0x3b7   :  { %6402 = vmatpush1.bf16.msra.mxu1 %v8071_v30  ;;  %6366 = vmatprep.subr.bf16.mxu0 %v8088_v28  ;;  %v4470_v52 = vmul.f32 0.1, %v4404_v47  ;;  %vm4438_vm0 = vcmp.gt.f32.partialorder %v4404_v47, 0.0  ;;  %v4454_v10 = vmul.f32 0.1, %v4400_v50  ;;  %vm4422_vm1 = vcmp.gt.f32.partialorder %v4400_v50, 0.0 }
 0x3b8   :  { %6427 = vmatprep.mubr.bf16.mxu1 %v4519_v48  ;;  %6403 = vmatprep.subr.bf16.mxu1 %v8079_v32  ;;  %v8144_v30 = vld [vmem:[#allocation17 + $0x38] sm:$0xff]  }
 0x3b9   :  { %v4502_v34 = vsel %vm4438_vm0, %v4404_v47, %v4470_v52  ;;  %v4486_v46 = vsel %vm4422_vm1, %v4400_v50, %v4454_v10  ;;  %v8159_v28 = vld [vmem:[#allocation18 + $0x78] sm:$0xff]   ;;  %v8169_v47 = vld [vmem:[#allocation18 + $0x50] sm:$0xff]  }
 0x3ba   :  { %6367 = vmatpush1.bf16.msra.mxu0 %v8086_v31  ;;  %v4518_v11 = vpack.c.bf16 %v4502_v34, %v4486_v46  ;;  %v8160_v32 = vld [vmem:[#allocation18 + $0x38] sm:$0xff]   ;;  %v8162_v31 = vld [vmem:[#allocation18 + $0x30] sm:$0xff]  }
 0x3bb   :  { %6404 = vmatpush1.bf16.msra.mxu1 %v8077_v2  ;;  %6368 = vmatprep.subr.bf16.mxu0 %v8094_v33  ;;  %v8151_v48 = vld [vmem:[#allocation17 + $0x58] sm:$0xff]   ;;  %v8163_v2 = vld [vmem:[#allocation18 + $0x68] sm:$0xff]   ;;  %v8170_v52 = vld [vmem:[#allocation18 + $0x10] sm:$0xff]  }
 0x3bc   :  { %6405 = vmatprep.subr.bf16.mxu1 %v8085_v38  ;;  %v8152_v33 = vld [vmem:[#allocation17 + $0x18] sm:$0xff]   ;;  %v8153_v38 = vld [vmem:[#allocation17 + $0x50] sm:$0xff]  }
 0x3be   :  { %6369 = vmatpush2.bf16.msra.mxu0 %v8092_v29  ;;  %v8164_v29 = vld [vmem:[#allocation18 + $0x28] sm:$0xff]  }
 0x3bf   :  { %6406 = vmatpush1.bf16.msra.mxu1 %v8083_v59  ;;  %6370 = vmatprep.subr.bf16.mxu0 %v8100_v58  ;;  %v8154_v59 = vld [vmem:[#allocation17 + $0x10] sm:$0xff]   ;;  %v8155_v58 = vld [vmem:[#allocation17 + $0x48] sm:$0xff]  }
 0x3c0   :  { %6407 = vmatprep.subr.bf16.mxu1 %v8091_v4  ;;  %v8156_v4 = vld [vmem:[#allocation17 + $0x8] sm:$0xff]  }
 0x3c2   :  { %6371 = vmatpush2.bf16.msra.mxu0 %v8098_v26  ;;  %v8157_v26 = vld [vmem:[#allocation17 + $0x40] sm:$0xff]  }
 0x3c3   :  { %6408 = vmatpush1.bf16.msra.mxu1 %v8089_v18  ;;  %6372 = vmatprep.subr.bf16.mxu0 %v8106_v6  ;;  %v8158_v18 = vld [vmem:[#allocation17] sm:$0xff]  }
 0x3c4   :  { %6409 = vmatprep.subr.bf16.mxu1 %v8097_v42 }
 0x3c6   :  { %6373 = vmatpush2.bf16.msra.mxu0 %v8104_v60 }
 0x3c7   :  { %6410 = vmatpush1.bf16.msra.mxu1 %v8095_v35  ;;  %6374 = vmatprep.subr.bf16.mxu0 %v8112_v61 }
 0x3c8   :  { %6411 = vmatprep.subr.bf16.mxu1 %v8103_v54 }
 0x3ca   :  { %6375 = vmatpush2.bf16.msra.mxu0 %v8110_v36 }
 0x3cb   :  { %6412 = vmatpush2.bf16.msra.mxu1 %v8101_v43  ;;  %6376 = vmatprep.subr.bf16.mxu0 %v8118_v21  ;;  %v8165_v43 = vld [vmem:[#allocation18 + $0x60] sm:$0xff]  }
 0x3cc   :  { %6413 = vmatprep.subr.bf16.mxu1 %v8109_v56  ;;  %v8166_v21 = vld [vmem:[#allocation18 + $0x20] sm:$0xff]   ;;  %v4648_v56 = vld [vmem:[#allocation12] sm:$0x3] }
 0x3ce   :  { %6377 = vmatpush2.bf16.msra.mxu0 %v8116_v53  ;;  %v4657_v53 = vrot.slane %v4648_v56, %v9150_v20 }
 0x3cf   :  { %6414 = vmatpush2.bf16.msra.mxu1 %v8107_v63  ;;  %6378 = vmatprep.subr.bf16.mxu0 %v8124_v16  ;;  %v4653_v63 = vrot.slane %v4648_v56, %v9063_v13 }
 0x3d0   :  { %6415 = vmatprep.subr.bf16.mxu1 %v8115_v3 }
 0x3d2   :  { %6379 = vmatpush2.bf16.msra.mxu0 %v8122_v15  ;;  %v8167_v15 = vld [vmem:[#allocation18 + $0x58] sm:$0xff]  }
 0x3d3   :  { %6416 = vmatpush2.bf16.msra.mxu1 %v8113_v5  ;;  %6380 = vmatprep.subr.bf16.mxu0 %v8130_v51 }
 0x3d4   :  { %6417 = vmatprep.subr.bf16.mxu1 %v8121_v41 }
 0x3d6   :  { %6381 = vmatpush2.bf16.msra.mxu0 %v8128_v44 }
 0x3d7   :  { %6418 = vmatpush2.bf16.msra.mxu1 %v8119_v14  ;;  %6382 = vmatprep.subr.bf16.mxu0 %v8136_v17 }
 0x3d8   :  { %6419 = vmatprep.subr.bf16.mxu1 %v8127_v25  ;;  %v8168_v25 = vld [vmem:[#allocation18 + $0x18] sm:$0xff]  }
 0x3da   :  { %6383 = vmatpush2.bf16.msra.mxu0 %v8134_v22 }
 0x3db   :  { %6420 = vmatpush2.bf16.msra.mxu1 %v8125_v23  ;;  %7699 = vmatprep.subr.bf16.mxu0 %v8159_v28 }
 0x3dc   :  { %6421 = vmatprep.subr.bf16.mxu1 %v8133_v27 }
 0x3dd   :  { %6385 = vmatmul.mubr.bf16.vlgmr.msra.gmra.mxu0 %v4516_v19  ;;  %v8146_v19 = vld [vmem:[#allocation17 + $0x30] sm:$0xff]   ;;  %v5334_v6 = vpop.f32.mrf.mxu0 }
 0x3de   :  { %7700 = vmatpush3.bf16.msra.mxu0 %v8160_v32  ;;  %v5335_v51 = vadd.f32 %v5334_v6, %v4653_v63  ;;  %v8173_v32 = vld [vmem:[#allocation18 + $0x40] sm:$0xff]   ;;  %v5614_v6 = vld [vmem:[#allocation15] sm:$0x3] }
 0x3df   :  { %6422 = vmatpush2.bf16.msra.mxu1 %v8131_v8  ;;  %7701 = vmatprep.subr.bf16.mxu0 %v8161_v57  ;;  %v5336_v42 = vpop.f32.mrf.mxu0  ;;  %v8174_v57 = vld [vmem:[#allocation18] sm:$0xff]  }
 0x3e0   :  { %6423 = vmatprep.subr.bf16.mxu1 %v8139_v40  ;;  %v5337_v5 = vadd.f32 %v5336_v42, %v4657_v53  ;;  %v5623_v42 = vrot.slane %v5614_v6, %v9150_v20 }
 0x3e1   :  { %v5338_v60 = vpop.f32.mrf.mxu0 }
 0x3e2   :  { %7702 = vmatpush3.bf16.msra.mxu0 %v8162_v31  ;;  %v5339_v14 = vadd.f32 %v5338_v60, %v4653_v63  ;;  %v5619_v60 = vrot.slane %v5614_v6, %v9063_v13 }
 0x3e3   :  { %6424 = vmatpush2.bf16.msra.mxu1 %v8137_v9  ;;  %7703 = vmatprep.subr.bf16.mxu0 %v8163_v2  ;;  %v5340_v61 = vpop.f32.mrf.mxu0 }
 0x3e4   :  { %6425 = vmatprep.subr.bf16.mxu1 %v8142_v0  ;;  %v5341_v27 = vadd.f32 %v5340_v61, %v4657_v53 }
 0x3e6   :  { %7704 = vmatpush3.bf16.msra.mxu0 %v8164_v29 }
 0x3e7   :  { %6426 = vmatpush2.bf16.msra.mxu1 %v8140_v62  ;;  %7705 = vmatprep.subr.bf16.mxu0 %v8165_v43 }
 0x3e8   :  { %7721 = vmatprep.subr.bf16.mxu1 %v8143_v7 }
 0x3ea   :  { %6428 = vmatmul.mubr.bf16.vlgmr.msra.gmra.mxu1 %v4518_v11  ;;  %v5377_v35 = vpop.f32.mrf.mxu1  ;;  %7706 = vmatpush3.bf16.msra.mxu0 %v8166_v21 }
 0x3eb   :  { %7722 = vmatpush3.bf16.msra.mxu1 %v8144_v30  ;;  %7707 = vmatprep.subr.bf16.mxu0 %v8167_v15  ;;  %v5378_v22 = vadd.f32 %v5377_v35, %v5335_v51  ;;  %v8171_v30 = vld [vmem:[#allocation18 + $0x48] sm:$0xff]  }
 0x3ec   :  { %7723 = vmatprep.subr.bf16.mxu1 %v8145_v12  ;;  %v5379_v54 = vpop.f32.mrf.mxu1 }
 0x3ed   :  { %v5380_v17 = vadd.f32 %v5379_v54, %v5337_v5 }
 0x3ee   :  { %v5381_v16 = vpop.f32.mrf.mxu1  ;;  %7708 = vmatpush3.bf16.msra.mxu0 %v8168_v25 }
 0x3ef   :  { %7724 = vmatpush3.bf16.msra.mxu1 %v8146_v19  ;;  %v5382_v37 = vadd.f32 %v5381_v16, %v5339_v14  ;;  %7709 = vmatprep.subr.bf16.mxu0 %v8169_v47 }
 0x3f0   :  { %7725 = vmatprep.subr.bf16.mxu1 %v8147_v39  ;;  %v5383_v41 = vpop.f32.mrf.mxu1  ;;  %v8172_v39 = vld [vmem:[#allocation18 + $0x8] sm:$0xff]  }
 0x3f1   :  { %v5384_v50 = vadd.f32 %v5383_v41, %v5341_v27 }
 0x3f2   :  { %7710 = vmatpush3.bf16.msra.mxu0 %v8170_v52 }
 0x3f3   :  { %7726 = vmatpush3.bf16.msra.mxu1 %v8148_v55  ;;  %7711 = vmatprep.subr.bf16.mxu0 %v8171_v30 }
 0x3f4   :  { %7727 = vmatprep.subr.bf16.mxu1 %v8149_v24 }
 0x3f6   :  { %7712 = vmatpush3.bf16.msra.mxu0 %v8172_v39  ;;  %v7698_v39 = vld [vmem:[#allocation20] ss:$0 sm:$0xff] }
 0x3f7   :  { %7728 = vmatpush3.bf16.msra.mxu1 %v8150_v45  ;;  %7713 = vmatprep.subr.bf16.mxu0 %v8173_v32 }
 0x3f8   :  { %7729 = vmatprep.subr.bf16.mxu1 %v8151_v48 }
 0x3fa   :  { %7714 = vmatpush3.bf16.msra.mxu0 %v8174_v57 }
 0x3fb   :  { %7730 = vmatpush3.bf16.msra.mxu1 %v8152_v33 }
 0x3fc   :  { %7731 = vmatprep.subr.bf16.mxu1 %v8153_v38 }
 0x3ff   :  { %7732 = vmatpush3.bf16.msra.mxu1 %v8154_v59 }
 0x400   :  { %7733 = vmatprep.subr.bf16.mxu1 %v8155_v58 }
 0x403   :  { %7734 = vmatpush3.bf16.msra.mxu1 %v8156_v4 }
 0x404   :  { %7735 = vmatprep.subr.bf16.mxu1 %v8157_v26 }
 0x407   :  { %7736 = vmatpush3.bf16.msra.mxu1 %v8158_v18 }
 0x41d   :  { %v5420_v36 = vpop.f32.mrf.mxu0 }
 0x41e   :  { %v5421_v8 = vadd.f32 %v5420_v36, %v5378_v22 }
 0x41f   :  { %v5422_v3 = vpop.f32.mrf.mxu0 }
 0x420   :  { %v5423_v49 = vadd.f32 %v5422_v3, %v5380_v17 }
 0x421   :  { %v5424_v44 = vpop.f32.mrf.mxu0 }
 0x422   :  { %v5425_v9 = vadd.f32 %v5424_v44, %v5382_v37 }
 0x423   :  { %v5426_v40 = vpop.f32.mrf.mxu0 }
 0x424   :  { %v5427_v7 = vadd.f32 %v5426_v40, %v5384_v50 }
 0x42a   :  { %v5463_v23 = vpop.f32.mrf.mxu1 }
 0x42b   :  { %v5464_v10 = vadd.f32 %v5463_v23, %v5421_v8 }
 0x42c   :  { %v5465_v1 = vpop.f32.mrf.mxu1 }
 0x42d   :  { %v5466_v0 = vadd.f32 %v5465_v1, %v5423_v49  ;;  %v5476_v55 = vmul.f32 0.1, %v5464_v10  ;;  %vm5472_vm4 = vcmp.gt.f32.partialorder %v5464_v10, 0.0 }
 0x42e   :  { %v5467_v62 = vpop.f32.mrf.mxu1 }
 0x42f   :  { %v5468_v34 = vadd.f32 %v5467_v62, %v5425_v9  ;;  %v5477_v11 = vmul.f32 0.1, %v5466_v0  ;;  %vm5473_vm3 = vcmp.gt.f32.partialorder %v5466_v0, 0.0  ;;  %v5480_v31 = vsel %vm5472_vm4, %v5464_v10, %v5476_v55 }
 0x430   :  { %v5469_v46 = vpop.f32.mrf.mxu1 }
 0x431   :  { %vm5474_vm2 = vcmp.gt.f32.partialorder %v5468_v34, 0.0  ;;  %v5478_v12 = vmul.f32 0.1, %v5468_v34  ;;  %v5470_v19 = vadd.f32 %v5469_v46, %v5427_v7  ;;  %v5481_v45 = vsel %vm5473_vm3, %v5466_v0, %v5477_v11 }
 0x433   :  { %vm5475_vm5 = vcmp.gt.f32.partialorder %v5470_v19, 0.0  ;;  %v5479_v24 = vmul.f32 0.1, %v5470_v19  ;;  %v5482_v28 = vsel %vm5474_vm2, %v5468_v34, %v5478_v12 }
 0x434   :  { %v5484_v33 = vpack.c.bf16 %v5482_v28, %v5480_v31 }
 0x435   :  { %v5483_v48 = vsel %vm5475_vm5, %v5470_v19, %v5479_v24 }
 0x436   :  { %v5485_v2 = vpack.c.bf16 %v5483_v48, %v5481_v45 }
 0x438   :  { %6781 = vmatprep.mubr.bf16.mxu1 %v5485_v2 }
 0x439   :  { %6782 = vmatmul.mubr.bf16.vlgmr.msra.gmra.mxu1 %v5484_v33 }
 0x45d   :  { %v6300_v38 = vpop.f32.mrf.mxu0 }
 0x45e   :  { %v6301_v36 = vadd.f32 %v6300_v38, %v5619_v60 }
 0x45f   :  { %v6302_v29 = vpop.f32.mrf.mxu0 }
 0x460   :  { %v6303_v54 = vadd.f32 %v6302_v29, %v5623_v42 }
 0x461   :  { %v6304_v59 = vpop.f32.mrf.mxu0 }
 0x462   :  { %v6305_v56 = vadd.f32 %v6304_v59, %v5619_v60 }
 0x463   :  { %v6306_v4 = vpop.f32.mrf.mxu0 }
 0x464   :  { %v6307_v3 = vadd.f32 %v6306_v4, %v5623_v42 }
 0x46a   :  { %v6343_v58 = vpop.f32.mrf.mxu1 }
 0x46b   :  { %v6344_v63 = vadd.f32 %v6343_v58, %v6301_v36 }
 0x46c   :  { %v6345_v26 = vpop.f32.mrf.mxu1 }
 0x46d   :  { %v6346_v53 = vadd.f32 %v6345_v26, %v6303_v54 }
 0x46e   :  { %v6347_v35 = vpop.f32.mrf.mxu1 }
 0x46f   :  { %v6348_v15 = vadd.f32 %v6347_v35, %v6305_v56 }
 0x470   :  { %v6349_v43 = vpop.f32.mrf.mxu1 }
 0x471   :  { %v6350_v14 = vadd.f32 %v6349_v43, %v6307_v3 }
 0x49d   :  { %v6386_v18 = vpop.f32.mrf.mxu0 }
 0x49e   :  { %v6387_v51 = vadd.f32 %v6386_v18, %v6344_v63 }
 0x49f   :  { %v6388_v61 = vpop.f32.mrf.mxu0 }
 0x4a0   :  { %v6389_v5 = vadd.f32 %v6388_v61, %v6346_v53 }
 0x4a1   :  { %v6390_v21 = vpop.f32.mrf.mxu0 }
 0x4a2   :  { %v6391_v20 = vadd.f32 %v6390_v21, %v6348_v15 }
 0x4a3   :  { %v6392_v41 = vpop.f32.mrf.mxu0 }
 0x4a4   :  { %v6393_v22 = vadd.f32 %v6392_v41, %v6350_v14 }
 0x4aa   :  { %v6429_v16 = vpop.f32.mrf.mxu1 }
 0x4ab   :  { %v6430_v13 = vadd.f32 %v6429_v16, %v6387_v51 }
 0x4ac   :  { %v6431_v44 = vpop.f32.mrf.mxu1 }
 0x4ad   :  { %v6432_v17 = vadd.f32 %v6431_v44, %v6389_v5  ;;  %v6442_v40 = vmul.f32 0.1, %v6430_v13  ;;  %vm6438_vm8 = vcmp.gt.f32.partialorder %v6430_v13, 0.0 }
 0x4ae   :  { %v6433_v25 = vpop.f32.mrf.mxu1 }
 0x4af   :  { %v6434_v23 = vadd.f32 %v6433_v25, %v6391_v20  ;;  %v6443_v37 = vmul.f32 0.1, %v6432_v17  ;;  %vm6439_vm7 = vcmp.gt.f32.partialorder %v6432_v17, 0.0  ;;  %v6446_v0 = vsel %vm6438_vm8, %v6430_v13, %v6442_v40 }
 0x4b0   :  { %v6435_v27 = vpop.f32.mrf.mxu1 }
 0x4b1   :  { %vm6440_vm6 = vcmp.gt.f32.partialorder %v6434_v23, 0.0  ;;  %v6444_v49 = vmul.f32 0.1, %v6434_v23  ;;  %v6436_v8 = vadd.f32 %v6435_v27, %v6393_v22  ;;  %v6447_v50 = vsel %vm6439_vm7, %v6432_v17, %v6443_v37 }
 0x4b3   :  { %vm6441_vm9 = vcmp.gt.f32.partialorder %v6436_v8, 0.0  ;;  %v6445_v1 = vmul.f32 0.1, %v6436_v8  ;;  %v6448_v47 = vsel %vm6440_vm6, %v6434_v23, %v6444_v49 }
 0x4b4   :  { %v6450_v10 = vpack.c.bf16 %v6448_v47, %v6446_v0 }
 0x4b5   :  { %v6449_v9 = vsel %vm6441_vm9, %v6436_v8, %v6445_v1 }
 0x4b6   :  { %v6451_v52 = vpack.c.bf16 %v6449_v9, %v6447_v50 }
 0x4b8   :  { %6644 = vmatprep.mubr.bf16.mxu0 %v6451_v52 }
 0x4b9   :  { %6645 = vmatmul.mubr.bf16.vlgmr.msra.gmra.mxu0 %v6450_v10 }
 0x4f9   :  { %v7737_v62 = vpop.f32.mrf.mxu1 }
 0x4fb   :  { %v7738_v7 = vpop.f32.mrf.mxu1 }
 0x4fc   :  { %v7739_v11 = vadd.f32 %v7738_v7, %v7737_v62 }
 0x4fd   :  { %v7740_v34 = vpop.f32.mrf.mxu1 }
 0x4ff   :  { %v7741_v19 = vpop.f32.mrf.mxu1 }
 0x500   :  { %v7742_v32 = vadd.f32 %v7741_v19, %v7740_v34 }
 0x579   :  { %v7715_v46 = vpop.f32.mrf.mxu0 }
 0x57b   :  { %v7716_v30 = vpop.f32.mrf.mxu0 }
 0x57c   :  { %v7717_v12 = vadd.f32 %v7716_v30, %v7715_v46 }
 0x57d   :  { %v7718_v55 = vpop.f32.mrf.mxu0 }
 0x57e   :  { %v6784_v24 = vadd.f32 %v7739_v11, %v7717_v12 }
 0x57f   :  { %v7719_v28 = vpop.f32.mrf.mxu0 }
 0x580   :  { %v6797_v57 = vadd.f32 %v7698_v39, %v6784_v24  ;;  %v7720_v45 = vadd.f32 %v7719_v28, %v7718_v55 }
 0x582   :  { %6799 = vst [vmem:[%s9311_s12] sm:$0xff] %v6797_v57  ;;  %v6787_v48 = vadd.f32 %v7742_v32, %v7720_v45 }
 0x584   :  { %v6798_v31 = vadd.f32 %v7698_v39, %v6787_v48 }
 0x586   :  { %6800 = vst [vmem:[%s9311_s12 + $0x8] sm:$0xff] %v6798_v31 }
 0x587   :  { %6805 = vsyncpa [#allocation4], 1 }
 0x588   :  { %6806 = vsyncpa [#allocation10], 1 }
 0x589   :  { %6807 = vsyncpa [#allocation13], 1 }
 0x58a   :  { %6808 = vsyncpa [#allocation16], 1 }
 0x58b   :  { %6809 = vsyncpa [#allocation19], 1 }
 0x58c   :  { %6810 = vsyncpa [#allocation5], 1 }
 0x58d   :  { %6811 = vsyncpa [#allocation6], 1 }

</bundles_post_ra>
